<compile_context>
chip_gen: v5e
topology: v5e:2x2
jax: 0.10.0
libtpu: 0.0.40
codegen_flags: <defaults>
</compile_context>

<pallas_src>
import math

import jax
import jax.numpy as jnp
import numpy as np
from jax import lax
from jax.experimental import pallas as pl
from jax.experimental.pallas import tpu as pltpu

# --- hyperparameters (the `params` dict of the torch module) ---------------
D_EMBED = 32        # d_embed_dec
N_HEADS = 4         # num_heads
D_HEAD = D_EMBED // N_HEADS
D_FF = 64           # d_ff
N_LAYERS = 2        # num_layers
LN_EPS = 1e-6       # layer_norm_eps
FF_ACTIVATION = "relu"
NEG_INF = -1e9

BATCH = 2
T_TGT = 8           # target_length
S_SRC = 8           # input_length (encoder sequence)

# Fused attention-weight output layout (lane-dense store).
AW_SELF = N_LAYERS * N_HEADS * T_TGT    # lanes holding self-attn weights
AW_ENC = N_LAYERS * N_HEADS * S_SRC     # lanes holding enc-dec attn weights
AW_LANES = AW_SELF + AW_ENC             # = 128 for these params -> unmasked vst


# ---------------------------------------------------------------------------
# in-kernel helpers (traced inside the Pallas kernel body)
# ---------------------------------------------------------------------------
def _layer_norm(v, gamma, beta):
    mean = jnp.mean(v, axis=-1, keepdims=True)
    var = jnp.mean((v - mean) ** 2, axis=-1, keepdims=True)
    return (v - mean) * lax.rsqrt(var + LN_EPS) * gamma + beta


# ---------------------------------------------------------------------------
# Pallas kernel: the FULL decoder (all layers, full batch) in one invocation
# ---------------------------------------------------------------------------
def decoder_kernel(x_ref, enc_ref, causal_ref, pad_ref,
                   wqkv_s_ref, bqkv_s_ref, wo_s_ref, bo_s_ref,
                   wq_e_ref, bq_e_ref, wkv_e_ref, bkv_e_ref, wo_e_ref, bo_e_ref,
                   w1_ref, b1_ref, w2_ref, b2_ref,
                   lg_ref, lb_ref,
                   y_ref, aw_ref):
    x = x_ref[...]            # (B*T, D)   batch-flattened decoder activations
    enc = enc_ref[...]        # (B*S, D)   batch-flattened encoder output

    # Additive mask biases, broadcast ONCE (hoisted: JAX does not CSE broadcasts).
    causal_b3 = jnp.broadcast_to(causal_ref[...].reshape(1, T_TGT, T_TGT),
                                 (BATCH, T_TGT, T_TGT))         # (B, T, T)
    pad_b3 = jnp.broadcast_to(pad_ref[...].reshape(BATCH, 1, S_SRC),
                              (BATCH, T_TGT, S_SRC))            # (B, T, S)

    scale = 1.0 / math.sqrt(D_HEAD)

    def attention(q3, k3, v3, bias3, aw_parts_out):
        """Multi-head attention core, batched over B, statically unrolled over heads.

        q3: (B, T, D), k3/v3: (B, Tk, D), bias3: (B, T, Tk) additive bias.
        Appends the per-layer attention weights (B, T, H*Tk) to aw_parts_out.
        Returns the head-concatenated context, batch-flattened to (B*T, D).
        """
        ctx_parts = []
        aw_parts = []
        for h in range(N_HEADS):                                # static unroll
            sl = slice(h * D_HEAD, (h + 1) * D_HEAD)
            s = jnp.einsum("bqd,bkd->bqk", q3[:, :, sl], k3[:, :, sl],
                           preferred_element_type=jnp.float32) * scale + bias3
            m = jnp.max(s, axis=-1, keepdims=True)
            e = jnp.exp(s - m)
            denom = jnp.sum(e, axis=-1, keepdims=True)
            aw = e * pl.reciprocal(denom, approx=True)          # EUP reciprocal
            aw_parts.append(aw)
            ctx_parts.append(jnp.einsum("bqk,bkd->bqd", aw, v3[:, :, sl],
                                        preferred_element_type=jnp.float32))
        aw_parts_out.append(jnp.concatenate(aw_parts, axis=-1))   # (B, T, H*Tk)
        return jnp.concatenate(ctx_parts, axis=-1).reshape(BATCH * T_TGT, D_EMBED)

    sw_parts = []   # per-layer self-attention weights   (B, T, H*T)
    ew_parts = []   # per-layer enc-dec attention weights (B, T, H*S)

    # Statically unrolled loop over decoder layers (all weights already in VMEM).
    for l in range(N_LAYERS):
        # --- masked multi-head self-attention (fused QKV) + residual + LN ----
        qkv = jnp.dot(x, wqkv_s_ref[l],
                      preferred_element_type=jnp.float32) + bqkv_s_ref[l]
        q3 = qkv[:, :D_EMBED].reshape(BATCH, T_TGT, D_EMBED)
        k3 = qkv[:, D_EMBED:2 * D_EMBED].reshape(BATCH, T_TGT, D_EMBED)
        v3 = qkv[:, 2 * D_EMBED:].reshape(BATCH, T_TGT, D_EMBED)
        ctx = attention(q3, k3, v3, causal_b3, sw_parts)
        sa = jnp.dot(ctx, wo_s_ref[l],
                     preferred_element_type=jnp.float32) + bo_s_ref[l]
        norm1 = _layer_norm(sa + x, lg_ref[l, 0], lb_ref[l, 0])

        # --- enc-dec attention (split Q / fused KV) + residual + LN ----------
        q = jnp.dot(norm1, wq_e_ref[l],
                    preferred_element_type=jnp.float32) + bq_e_ref[l]
        kv = jnp.dot(enc, wkv_e_ref[l],
                     preferred_element_type=jnp.float32) + bkv_e_ref[l]
        q3 = q.reshape(BATCH, T_TGT, D_EMBED)
        k3 = kv[:, :D_EMBED].reshape(BATCH, S_SRC, D_EMBED)
        v3 = kv[:, D_EMBED:].reshape(BATCH, S_SRC, D_EMBED)
        ctx = attention(q3, k3, v3, pad_b3, ew_parts)
        ea = jnp.dot(ctx, wo_e_ref[l],
                     preferred_element_type=jnp.float32) + bo_e_ref[l]
        norm2 = _layer_norm(ea + norm1, lg_ref[l, 1], lb_ref[l, 1])

        # --- FFN (Linear -> ReLU -> Linear) + residual + LN ------------------
        hidden = jnp.maximum(
            jnp.dot(norm2, w1_ref[l], preferred_element_type=jnp.float32)
            + b1_ref[l], 0.0)
        ff = jnp.dot(hidden, w2_ref[l],
                     preferred_element_type=jnp.float32) + b2_ref[l]
        x = _layer_norm(ff + norm2, lg_ref[l, 2], lb_ref[l, 2])

    y_ref[...] = x
    # Single lane-dense (B, T, 128) store for ALL attention weights (unmasked vst);
    # the JAX wrapper slices / transposes it back to (L, B, H, T, Tk).
    aw_ref[...] = jnp.concatenate(sw_parts + ew_parts, axis=-1)


# ---------------------------------------------------------------------------
# JAX-level weight packing (done once, outside the kernel)
# ---------------------------------------------------------------------------
def pack_weights(weights):
    """Stack per-layer weight dicts into layer-major arrays with fused projections."""
    cat = jnp.concatenate
    wqkv_s = jnp.stack([cat([w["attn_w"][0, j] for j in range(3)], axis=-1)
                        for w in weights])                       # (L, D, 3D)
    bqkv_s = jnp.stack([cat([w["attn_b"][0, j] for j in range(3)], axis=-1)
                        for w in weights])                       # (L, 1, 3D)
    wo_s = jnp.stack([w["attn_w"][0, 3] for w in weights])       # (L, D, D)
    bo_s = jnp.stack([w["attn_b"][0, 3] for w in weights])       # (L, 1, D)
    wq_e = jnp.stack([w["attn_w"][1, 0] for w in weights])       # (L, D, D)
    bq_e = jnp.stack([w["attn_b"][1, 0] for w in weights])       # (L, 1, D)
    wkv_e = jnp.stack([cat([w["attn_w"][1, j] for j in (1, 2)], axis=-1)
                       for w in weights])                        # (L, D, 2D)
    bkv_e = jnp.stack([cat([w["attn_b"][1, j] for j in (1, 2)], axis=-1)
                       for w in weights])                        # (L, 1, 2D)
    wo_e = jnp.stack([w["attn_w"][1, 3] for w in weights])       # (L, D, D)
    bo_e = jnp.stack([w["attn_b"][1, 3] for w in weights])       # (L, 1, D)
    w1 = jnp.stack([w["ff_w1"] for w in weights])                # (L, D, F)
    b1 = jnp.stack([w["ff_b1"] for w in weights])                # (L, 1, F)
    w2 = jnp.stack([w["ff_w2"] for w in weights])                # (L, F, D)
    b2 = jnp.stack([w["ff_b2"] for w in weights])                # (L, 1, D)
    ln_g = jnp.stack([w["ln_g"] for w in weights])               # (L, 3, 1, D)
    ln_b = jnp.stack([w["ln_b"] for w in weights])               # (L, 3, 1, D)
    return (wqkv_s, bqkv_s, wo_s, bo_s, wq_e, bq_e, wkv_e, bkv_e, wo_e, bo_e,
            w1, b1, w2, b2, ln_g, ln_b)


def transformer_decoder(x, enc_output, look_ahead_mask, padding_mask, weights):
    """Mirrors TransformerDecoder.forward: returns (x, attn_weights dict)."""
    # TODO(synk): incremental decoding `cache` path not implemented (cache=None only).
    B, T, D = x.shape
    S = enc_output.shape[1]
    packed = pack_weights(weights)

    x2d = x.reshape(B * T, D)
    enc2d = enc_output.reshape(B * S, D)
    # Masks converted to pre-scaled additive biases (0 keep / -1e9 masked).
    causal_bias = look_ahead_mask.reshape(T, T).astype(jnp.float32) * NEG_INF
    pad_bias = padding_mask.reshape(B, S).astype(jnp.float32) * NEG_INF

    vmem_spec = pl.BlockSpec(memory_space=pltpu.MemorySpace.VMEM)
    y2d, aw = pl.pallas_call(
        decoder_kernel,
        out_shape=(
            jax.ShapeDtypeStruct((B * T, D), jnp.float32),
            jax.ShapeDtypeStruct((B, T, AW_LANES), jnp.float32),
        ),
        in_specs=[vmem_spec] * (4 + len(packed)),
        out_specs=(vmem_spec, vmem_spec),
    )(x2d, enc2d, causal_bias, pad_bias, *packed)

    y = y2d.reshape(B, T, D)
    # kernel stored lanes [sw_l0 | sw_l1 | ew_l0 | ew_l1], each block indexed h*Tk + k.
    sw = aw[..., :AW_SELF].reshape(B, T, N_LAYERS, N_HEADS, T)
    sw = sw.transpose(2, 0, 3, 1, 4)                              # (L, B, H, T, T)
    ew = aw[..., AW_SELF:].reshape(B, T, N_LAYERS, N_HEADS, S)
    ew = ew.transpose(2, 0, 3, 1, 4)                              # (L, B, H, T, S)
    attn_weights = {
        f"layer_{i + 1}": {"self_attn": sw[i], "enc_dec_attn": ew[i]}
        for i in range(N_LAYERS)
    }
    return y, attn_weights


# ---------------------------------------------------------------------------
# pure-JAX reference (for correctness checking only)
# ---------------------------------------------------------------------------
def _ref_mha(q_in, kv_in, mask, w, i):
    wq, wk, wv, wo = (w["attn_w"][i, j] for j in range(4))
    bq, bk, bv, bo = (w["attn_b"][i, j, 0] for j in range(4))
    q = q_in @ wq + bq
    k = kv_in @ wk + bk
    v = kv_in @ wv + bv
    B, Tq, _ = q.shape
    Tk = k.shape[1]
    qh = q.reshape(B, Tq, N_HEADS, D_HEAD).transpose(0, 2, 1, 3)
    kh = k.reshape(B, Tk, N_HEADS, D_HEAD).transpose(0, 2, 1, 3)
    vh = v.reshape(B, Tk, N_HEADS, D_HEAD).transpose(0, 2, 1, 3)
    scores = jnp.einsum("bhqd,bhkd->bhqk", qh, kh) / math.sqrt(D_HEAD)
    scores = scores + mask * NEG_INF
    aw = jax.nn.softmax(scores, axis=-1)
    ctx = jnp.einsum("bhqk,bhkd->bhqd", aw, vh)
    ctx = ctx.transpose(0, 2, 1, 3).reshape(B, Tq, D_EMBED)
    return ctx @ wo + bo, aw


def _ref_ln(x, g, b):
    mean = jnp.mean(x, -1, keepdims=True)
    var = jnp.mean((x - mean) ** 2, -1, keepdims=True)
    return (x - mean) / jnp.sqrt(var + LN_EPS) * g + b


def ref_decoder(x, enc, la_mask, pad_mask, weights):
    attn = {}
    for i, w in enumerate(weights):
        sa, sw = _ref_mha(x, x, la_mask, w, 0)
        nsa = _ref_ln(sa + x, w["ln_g"][0, 0], w["ln_b"][0, 0])
        eda, ew = _ref_mha(nsa, enc, pad_mask, w, 1)
        neda = _ref_ln(eda + nsa, w["ln_g"][1, 0], w["ln_b"][1, 0])
        h = jnp.maximum(neda @ w["ff_w1"] + w["ff_b1"][0], 0.0)
        ff = h @ w["ff_w2"] + w["ff_b2"][0]
        x = _ref_ln(ff + neda, w["ln_g"][2, 0], w["ln_b"][2, 0])
        attn[f"layer_{i + 1}"] = {"self_attn": sw, "enc_dec_attn": ew}
    return x, attn


# ---------------------------------------------------------------------------
# deterministic parameter initialization (original per-layer format)
# ---------------------------------------------------------------------------
def init_weights(key):
    weights = []
    for _ in range(N_LAYERS):
        key, k0, k1, k2, k3, k4, k5 = jax.random.split(key, 7)
        w = {
            "attn_w": 0.05 * jax.random.normal(k0, (2, 4, D_EMBED, D_EMBED),
                                               jnp.float32),
            "attn_b": 0.05 * jax.random.normal(k1, (2, 4, 1, D_EMBED),
                                               jnp.float32),
            "ff_w1": 0.05 * jax.random.normal(k2, (D_EMBED, D_FF), jnp.float32),
            "ff_b1": 0.05 * jax.random.normal(k3, (1, D_FF), jnp.float32),
            "ff_w2": 0.05 * jax.random.normal(k4, (D_FF, D_EMBED), jnp.float32),
            "ff_b2": 0.05 * jax.random.normal(k5, (1, D_EMBED), jnp.float32),
            "ln_g": jnp.ones((3, 1, D_EMBED), jnp.float32),
            "ln_b": jnp.zeros((3, 1, D_EMBED), jnp.float32),
        }
        weights.append(w)
    return weights


if __name__ == "__main__":
    key = jax.random.PRNGKey(0)
    key, kx, ke = jax.random.split(key, 3)

    x = jax.random.normal(kx, (BATCH, T_TGT, D_EMBED), jnp.float32)
    enc_output = jax.random.normal(ke, (BATCH, S_SRC, D_EMBED), jnp.float32)

    # look-ahead mask: 1 above the diagonal (future positions masked)
    look_ahead_mask = (1.0 - jnp.tril(jnp.ones((T_TGT, T_TGT), jnp.float32))
                       ).reshape(1, 1, T_TGT, T_TGT)
    # padding mask: mask last 2 encoder positions of the second batch element
    pad = np.zeros((BATCH, 1, 1, S_SRC), np.float32)
    pad[1, 0, 0, -2:] = 1.0
    padding_mask = jnp.asarray(pad)

    weights = init_weights(key)

    out, attn_weights = transformer_decoder(
        x, enc_output, look_ahead_mask, padding_mask, weights)
    out = jax.block_until_ready(out)

    # Correctness check against pure-JAX reference.  Tolerance is loosened (vs 1e-4)
    # because the kernel uses the EUP approximate reciprocal for the softmax
    # normalization; real structural bugs would produce O(0.1+) errors.
    TOL = 1e-2
    ref_out, ref_attn = ref_decoder(
        x, enc_output, look_ahead_mask, padding_mask, weights)
    np.testing.assert_allclose(np.asarray(out), np.asarray(ref_out),
                               rtol=TOL, atol=TOL)
    for i in range(1, N_LAYERS + 1):
        np.testing.assert_allclose(
            np.asarray(attn_weights[f"layer_{i}"]["self_attn"]),
            np.asarray(ref_attn[f"layer_{i}"]["self_attn"]),
            rtol=TOL, atol=TOL)
        np.testing.assert_allclose(
            np.asarray(attn_weights[f"layer_{i}"]["enc_dec_attn"]),
            np.asarray(ref_attn[f"layer_{i}"]["enc_dec_attn"]),
            rtol=TOL, atol=TOL)

    print("KERNEL_OK")
</pallas_src>

<mosaic_0001>
module attributes {stable_mosaic.version = 11 : i64} {
  func.func @decoder_kernel(%arg0: memref<16x32xf32, #tpu.memory_space<vmem>>, %arg1: memref<16x32xf32, #tpu.memory_space<vmem>>, %arg2: memref<8x8xf32, #tpu.memory_space<vmem>>, %arg3: memref<2x8xf32, #tpu.memory_space<vmem>>, %arg4: memref<2x32x96xf32, #tpu.memory_space<vmem>>, %arg5: memref<2x1x96xf32, #tpu.memory_space<vmem>>, %arg6: memref<2x32x32xf32, #tpu.memory_space<vmem>>, %arg7: memref<2x1x32xf32, #tpu.memory_space<vmem>>, %arg8: memref<2x32x32xf32, #tpu.memory_space<vmem>>, %arg9: memref<2x1x32xf32, #tpu.memory_space<vmem>>, %arg10: memref<2x32x64xf32, #tpu.memory_space<vmem>>, %arg11: memref<2x1x64xf32, #tpu.memory_space<vmem>>, %arg12: memref<2x32x32xf32, #tpu.memory_space<vmem>>, %arg13: memref<2x1x32xf32, #tpu.memory_space<vmem>>, %arg14: memref<2x32x64xf32, #tpu.memory_space<vmem>>, %arg15: memref<2x1x64xf32, #tpu.memory_space<vmem>>, %arg16: memref<2x64x32xf32, #tpu.memory_space<vmem>>, %arg17: memref<2x1x32xf32, #tpu.memory_space<vmem>>, %arg18: memref<2x3x1x32xf32, #tpu.memory_space<vmem>>, %arg19: memref<2x3x1x32xf32, #tpu.memory_space<vmem>>, %arg20: memref<16x32xf32, #tpu.memory_space<vmem>>, %arg21: memref<2x8x128xf32, #tpu.memory_space<vmem>>) attributes {dimension_semantics = [], scalar_prefetch = 0 : i64, scratch_operands = 0 : i64, tpu.core_type = #tpu.core_type<tc>} {
    %c0 = arith.constant 0 : index
    %c0_0 = arith.constant 0 : index
    %0 = vector.load %arg0[%c0, %c0_0] : memref<16x32xf32, #tpu.memory_space<vmem>>, vector<16x32xf32>
    %c0_1 = arith.constant 0 : index
    %c0_2 = arith.constant 0 : index
    %1 = vector.load %arg1[%c0_1, %c0_2] : memref<16x32xf32, #tpu.memory_space<vmem>>, vector<16x32xf32>
    %c0_3 = arith.constant 0 : index
    %c0_4 = arith.constant 0 : index
    %2 = vector.load %arg2[%c0_3, %c0_4] : memref<8x8xf32, #tpu.memory_space<vmem>>, vector<8x8xf32>
    %3 = vector.shape_cast %2 : vector<8x8xf32> to vector<1x8x8xf32>
    %4 = vector.shape_cast %3 : vector<1x8x8xf32> to vector<1x8x8xf32>
    %5 = vector.broadcast %4 : vector<1x8x8xf32> to vector<2x8x8xf32>
    %c0_5 = arith.constant 0 : index
    %c0_6 = arith.constant 0 : index
    %6 = vector.load %arg3[%c0_5, %c0_6] : memref<2x8xf32, #tpu.memory_space<vmem>>, vector<2x8xf32>
    %7 = vector.shape_cast %6 : vector<2x8xf32> to vector<2x1x8xf32>
    %8 = vector.shape_cast %7 : vector<2x1x8xf32> to vector<2x1x8xf32>
    %9 = vector.broadcast %8 : vector<2x1x8xf32> to vector<2x8x8xf32>
    %c0_7 = arith.constant 0 : index
    %c0_8 = arith.constant 0 : index
    %c0_9 = arith.constant 0 : index
    %10 = vector.load %arg4[%c0_7, %c0_8, %c0_9] : memref<2x32x96xf32, #tpu.memory_space<vmem>>, vector<1x32x96xf32>
    %11 = vector.shape_cast %10 : vector<1x32x96xf32> to vector<32x96xf32>
    %cst = arith.constant dense<0.000000e+00> : vector<16x96xf32>
    %12 = tpu.matmul %0, %11, %cst {dimension_numbers = #tpu.dot_dimension_numbers<[1], [0], [0], [1], [0, 0, 1, 1], [], []>} : vector<16x32xf32>, vector<32x96xf32>, vector<16x96xf32> -> vector<16x96xf32>
    %c0_10 = arith.constant 0 : index
    %c0_11 = arith.constant 0 : index
    %c0_12 = arith.constant 0 : index
    %13 = vector.load %arg5[%c0_10, %c0_11, %c0_12] : memref<2x1x96xf32, #tpu.memory_space<vmem>>, vector<1x1x96xf32>
    %14 = vector.shape_cast %13 : vector<1x1x96xf32> to vector<1x96xf32>
    %15 = vector.broadcast %14 : vector<1x96xf32> to vector<16x96xf32>
    %16 = arith.addf %12, %15 : vector<16x96xf32>
    %17 = vector.extract_strided_slice %16 {offsets = [0, 0], sizes = [16, 32], strides = [1, 1]} : vector<16x96xf32> to vector<16x32xf32>
    %18 = vector.shape_cast %17 : vector<16x32xf32> to vector<2x8x32xf32>
    %19 = vector.extract_strided_slice %16 {offsets = [0, 32], sizes = [16, 32], strides = [1, 1]} : vector<16x96xf32> to vector<16x32xf32>
    %20 = vector.shape_cast %19 : vector<16x32xf32> to vector<2x8x32xf32>
    %21 = vector.extract_strided_slice %16 {offsets = [0, 64], sizes = [16, 32], strides = [1, 1]} : vector<16x96xf32> to vector<16x32xf32>
    %22 = vector.shape_cast %21 : vector<16x32xf32> to vector<2x8x32xf32>
    %23 = vector.extract_strided_slice %18 {offsets = [0, 0, 0], sizes = [2, 8, 8], strides = [1, 1, 1]} : vector<2x8x32xf32> to vector<2x8x8xf32>
    %24 = vector.extract_strided_slice %20 {offsets = [0, 0, 0], sizes = [2, 8, 8], strides = [1, 1, 1]} : vector<2x8x32xf32> to vector<2x8x8xf32>
    "tpu.trace_start"() <{level = 10 : i32, message = "bqd,bkd->bqk"}> : () -> ()
    %cst_13 = arith.constant dense<0.000000e+00> : vector<2x8x8xf32>
    %25 = tpu.matmul %23, %24, %cst_13 {dimension_numbers = #tpu.dot_dimension_numbers<[2], [2], [1], [1], [0, 0, 0, 1, 1, 1], [0], [0]>} : vector<2x8x8xf32>, vector<2x8x8xf32>, vector<2x8x8xf32> -> vector<2x8x8xf32>
    "tpu.trace_stop"() : () -> ()
    %cst_14 = arith.constant 0.353553385 : f32
    %26 = vector.broadcast %cst_14 : f32 to vector<2x8x8xf32>
    %27 = arith.mulf %25, %26 : vector<2x8x8xf32>
    %28 = arith.addf %27, %5 : vector<2x8x8xf32>
    %cst_15 = arith.constant dense<0xFF800000> : vector<2x8xf32>
    %29 = vector.multi_reduction <maximumf>, %28, %cst_15 [2] : vector<2x8x8xf32> to vector<2x8xf32>
    %30 = vector.shape_cast %29 : vector<2x8xf32> to vector<2x8x1xf32>
    %31 = vector.broadcast %30 : vector<2x8x1xf32> to vector<2x8x8xf32>
    %32 = arith.subf %28, %31 : vector<2x8x8xf32>
    %33 = math.exp %32 : vector<2x8x8xf32>
    %cst_16 = arith.constant dense<0.000000e+00> : vector<2x8xf32>
    %34 = vector.multi_reduction <add>, %33, %cst_16 [2] : vector<2x8x8xf32> to vector<2x8xf32>
    %35 = vector.shape_cast %34 : vector<2x8xf32> to vector<2x8x1xf32>
    %36 = tpu.reciprocal %35 {approx = true} : vector<2x8x1xf32> -> vector<2x8x1xf32>
    %37 = vector.broadcast %36 : vector<2x8x1xf32> to vector<2x8x8xf32>
    %38 = arith.mulf %33, %37 : vector<2x8x8xf32>
    %39 = vector.extract_strided_slice %22 {offsets = [0, 0, 0], sizes = [2, 8, 8], strides = [1, 1, 1]} : vector<2x8x32xf32> to vector<2x8x8xf32>
    "tpu.trace_start"() <{level = 10 : i32, message = "bqk,bkd->bqd"}> : () -> ()
    %cst_17 = arith.constant dense<0.000000e+00> : vector<2x8x8xf32>
    %40 = tpu.matmul %38, %39, %cst_17 {dimension_numbers = #tpu.dot_dimension_numbers<[2], [1], [1], [2], [0, 0, 0, 1, 1, 2], [0], [0]>} : vector<2x8x8xf32>, vector<2x8x8xf32>, vector<2x8x8xf32> -> vector<2x8x8xf32>
    "tpu.trace_stop"() : () -> ()
    %41 = vector.extract_strided_slice %18 {offsets = [0, 0, 8], sizes = [2, 8, 8], strides = [1, 1, 1]} : vector<2x8x32xf32> to vector<2x8x8xf32>
    %42 = vector.extract_strided_slice %20 {offsets = [0, 0, 8], sizes = [2, 8, 8], strides = [1, 1, 1]} : vector<2x8x32xf32> to vector<2x8x8xf32>
    "tpu.trace_start"() <{level = 10 : i32, message = "bqd,bkd->bqk"}> : () -> ()
    %cst_18 = arith.constant dense<0.000000e+00> : vector<2x8x8xf32>
    %43 = tpu.matmul %41, %42, %cst_18 {dimension_numbers = #tpu.dot_dimension_numbers<[2], [2], [1], [1], [0, 0, 0, 1, 1, 1], [0], [0]>} : vector<2x8x8xf32>, vector<2x8x8xf32>, vector<2x8x8xf32> -> vector<2x8x8xf32>
    "tpu.trace_stop"() : () -> ()
    %cst_19 = arith.constant 0.353553385 : f32
    %44 = vector.broadcast %cst_19 : f32 to vector<2x8x8xf32>
    %45 = arith.mulf %43, %44 : vector<2x8x8xf32>
    %46 = arith.addf %45, %5 : vector<2x8x8xf32>
    %cst_20 = arith.constant dense<0xFF800000> : vector<2x8xf32>
    %47 = vector.multi_reduction <maximumf>, %46, %cst_20 [2] : vector<2x8x8xf32> to vector<2x8xf32>
    %48 = vector.shape_cast %47 : vector<2x8xf32> to vector<2x8x1xf32>
    %49 = vector.broadcast %48 : vector<2x8x1xf32> to vector<2x8x8xf32>
    %50 = arith.subf %46, %49 : vector<2x8x8xf32>
    %51 = math.exp %50 : vector<2x8x8xf32>
    %cst_21 = arith.constant dense<0.000000e+00> : vector<2x8xf32>
    %52 = vector.multi_reduction <add>, %51, %cst_21 [2] : vector<2x8x8xf32> to vector<2x8xf32>
    %53 = vector.shape_cast %52 : vector<2x8xf32> to vector<2x8x1xf32>
    %54 = tpu.reciprocal %53 {approx = true} : vector<2x8x1xf32> -> vector<2x8x1xf32>
    %55 = vector.broadcast %54 : vector<2x8x1xf32> to vector<2x8x8xf32>
    %56 = arith.mulf %51, %55 : vector<2x8x8xf32>
    %57 = vector.extract_strided_slice %22 {offsets = [0, 0, 8], sizes = [2, 8, 8], strides = [1, 1, 1]} : vector<2x8x32xf32> to vector<2x8x8xf32>
    "tpu.trace_start"() <{level = 10 : i32, message = "bqk,bkd->bqd"}> : () -> ()
    %cst_22 = arith.constant dense<0.000000e+00> : vector<2x8x8xf32>
    %58 = tpu.matmul %56, %57, %cst_22 {dimension_numbers = #tpu.dot_dimension_numbers<[2], [1], [1], [2], [0, 0, 0, 1, 1, 2], [0], [0]>} : vector<2x8x8xf32>, vector<2x8x8xf32>, vector<2x8x8xf32> -> vector<2x8x8xf32>
    "tpu.trace_stop"() : () -> ()
    %59 = vector.extract_strided_slice %18 {offsets = [0, 0, 16], sizes = [2, 8, 8], strides = [1, 1, 1]} : vector<2x8x32xf32> to vector<2x8x8xf32>
    %60 = vector.extract_strided_slice %20 {offsets = [0, 0, 16], sizes = [2, 8, 8], strides = [1, 1, 1]} : vector<2x8x32xf32> to vector<2x8x8xf32>
    "tpu.trace_start"() <{level = 10 : i32, message = "bqd,bkd->bqk"}> : () -> ()
    %cst_23 = arith.constant dense<0.000000e+00> : vector<2x8x8xf32>
    %61 = tpu.matmul %59, %60, %cst_23 {dimension_numbers = #tpu.dot_dimension_numbers<[2], [2], [1], [1], [0, 0, 0, 1, 1, 1], [0], [0]>} : vector<2x8x8xf32>, vector<2x8x8xf32>, vector<2x8x8xf32> -> vector<2x8x8xf32>
    "tpu.trace_stop"() : () -> ()
    %cst_24 = arith.constant 0.353553385 : f32
    %62 = vector.broadcast %cst_24 : f32 to vector<2x8x8xf32>
    %63 = arith.mulf %61, %62 : vector<2x8x8xf32>
    %64 = arith.addf %63, %5 : vector<2x8x8xf32>
    %cst_25 = arith.constant dense<0xFF800000> : vector<2x8xf32>
    %65 = vector.multi_reduction <maximumf>, %64, %cst_25 [2] : vector<2x8x8xf32> to vector<2x8xf32>
    %66 = vector.shape_cast %65 : vector<2x8xf32> to vector<2x8x1xf32>
    %67 = vector.broadcast %66 : vector<2x8x1xf32> to vector<2x8x8xf32>
    %68 = arith.subf %64, %67 : vector<2x8x8xf32>
    %69 = math.exp %68 : vector<2x8x8xf32>
    %cst_26 = arith.constant dense<0.000000e+00> : vector<2x8xf32>
    %70 = vector.multi_reduction <add>, %69, %cst_26 [2] : vector<2x8x8xf32> to vector<2x8xf32>
    %71 = vector.shape_cast %70 : vector<2x8xf32> to vector<2x8x1xf32>
    %72 = tpu.reciprocal %71 {approx = true} : vector<2x8x1xf32> -> vector<2x8x1xf32>
    %73 = vector.broadcast %72 : vector<2x8x1xf32> to vector<2x8x8xf32>
    %74 = arith.mulf %69, %73 : vector<2x8x8xf32>
    %75 = vector.extract_strided_slice %22 {offsets = [0, 0, 16], sizes = [2, 8, 8], strides = [1, 1, 1]} : vector<2x8x32xf32> to vector<2x8x8xf32>
    "tpu.trace_start"() <{level = 10 : i32, message = "bqk,bkd->bqd"}> : () -> ()
    %cst_27 = arith.constant dense<0.000000e+00> : vector<2x8x8xf32>
    %76 = tpu.matmul %74, %75, %cst_27 {dimension_numbers = #tpu.dot_dimension_numbers<[2], [1], [1], [2], [0, 0, 0, 1, 1, 2], [0], [0]>} : vector<2x8x8xf32>, vector<2x8x8xf32>, vector<2x8x8xf32> -> vector<2x8x8xf32>
    "tpu.trace_stop"() : () -> ()
    %77 = vector.extract_strided_slice %18 {offsets = [0, 0, 24], sizes = [2, 8, 8], strides = [1, 1, 1]} : vector<2x8x32xf32> to vector<2x8x8xf32>
    %78 = vector.extract_strided_slice %20 {offsets = [0, 0, 24], sizes = [2, 8, 8], strides = [1, 1, 1]} : vector<2x8x32xf32> to vector<2x8x8xf32>
    "tpu.trace_start"() <{level = 10 : i32, message = "bqd,bkd->bqk"}> : () -> ()
    %cst_28 = arith.constant dense<0.000000e+00> : vector<2x8x8xf32>
    %79 = tpu.matmul %77, %78, %cst_28 {dimension_numbers = #tpu.dot_dimension_numbers<[2], [2], [1], [1], [0, 0, 0, 1, 1, 1], [0], [0]>} : vector<2x8x8xf32>, vector<2x8x8xf32>, vector<2x8x8xf32> -> vector<2x8x8xf32>
    "tpu.trace_stop"() : () -> ()
    %cst_29 = arith.constant 0.353553385 : f32
    %80 = vector.broadcast %cst_29 : f32 to vector<2x8x8xf32>
    %81 = arith.mulf %79, %80 : vector<2x8x8xf32>
    %82 = arith.addf %81, %5 : vector<2x8x8xf32>
    %cst_30 = arith.constant dense<0xFF800000> : vector<2x8xf32>
    %83 = vector.multi_reduction <maximumf>, %82, %cst_30 [2] : vector<2x8x8xf32> to vector<2x8xf32>
    %84 = vector.shape_cast %83 : vector<2x8xf32> to vector<2x8x1xf32>
    %85 = vector.broadcast %84 : vector<2x8x1xf32> to vector<2x8x8xf32>
    %86 = arith.subf %82, %85 : vector<2x8x8xf32>
    %87 = math.exp %86 : vector<2x8x8xf32>
    %cst_31 = arith.constant dense<0.000000e+00> : vector<2x8xf32>
    %88 = vector.multi_reduction <add>, %87, %cst_31 [2] : vector<2x8x8xf32> to vector<2x8xf32>
    %89 = vector.shape_cast %88 : vector<2x8xf32> to vector<2x8x1xf32>
    %90 = tpu.reciprocal %89 {approx = true} : vector<2x8x1xf32> -> vector<2x8x1xf32>
    %91 = vector.broadcast %90 : vector<2x8x1xf32> to vector<2x8x8xf32>
    %92 = arith.mulf %87, %91 : vector<2x8x8xf32>
    %93 = vector.extract_strided_slice %22 {offsets = [0, 0, 24], sizes = [2, 8, 8], strides = [1, 1, 1]} : vector<2x8x32xf32> to vector<2x8x8xf32>
    "tpu.trace_start"() <{level = 10 : i32, message = "bqk,bkd->bqd"}> : () -> ()
    %cst_32 = arith.constant dense<0.000000e+00> : vector<2x8x8xf32>
    %94 = tpu.matmul %92, %93, %cst_32 {dimension_numbers = #tpu.dot_dimension_numbers<[2], [1], [1], [2], [0, 0, 0, 1, 1, 2], [0], [0]>} : vector<2x8x8xf32>, vector<2x8x8xf32>, vector<2x8x8xf32> -> vector<2x8x8xf32>
    "tpu.trace_stop"() : () -> ()
    %95 = tpu.concatenate %38, %56, %74, %92 in 2 : vector<2x8x8xf32>, vector<2x8x8xf32>, vector<2x8x8xf32>, vector<2x8x8xf32> -> vector<2x8x32xf32>
    %96 = tpu.concatenate %40, %58, %76, %94 in 2 : vector<2x8x8xf32>, vector<2x8x8xf32>, vector<2x8x8xf32>, vector<2x8x8xf32> -> vector<2x8x32xf32>
    %97 = vector.shape_cast %96 : vector<2x8x32xf32> to vector<16x32xf32>
    %c0_33 = arith.constant 0 : index
    %c0_34 = arith.constant 0 : index
    %c0_35 = arith.constant 0 : index
    %98 = vector.load %arg6[%c0_33, %c0_34, %c0_35] : memref<2x32x32xf32, #tpu.memory_space<vmem>>, vector<1x32x32xf32>
    %99 = vector.shape_cast %98 : vector<1x32x32xf32> to vector<32x32xf32>
    %cst_36 = arith.constant dense<0.000000e+00> : vector<16x32xf32>
    %100 = tpu.matmul %97, %99, %cst_36 {dimension_numbers = #tpu.dot_dimension_numbers<[1], [0], [0], [1], [0, 0, 1, 1], [], []>} : vector<16x32xf32>, vector<32x32xf32>, vector<16x32xf32> -> vector<16x32xf32>
    %c0_37 = arith.constant 0 : index
    %c0_38 = arith.constant 0 : index
    %c0_39 = arith.constant 0 : index
    %101 = vector.load %arg7[%c0_37, %c0_38, %c0_39] : memref<2x1x32xf32, #tpu.memory_space<vmem>>, vector<1x1x32xf32>
    %102 = vector.shape_cast %101 : vector<1x1x32xf32> to vector<1x32xf32>
    %103 = vector.broadcast %102 : vector<1x32xf32> to vector<16x32xf32>
    %104 = arith.addf %100, %103 : vector<16x32xf32>
    %105 = arith.addf %104, %0 : vector<16x32xf32>
    %c0_40 = arith.constant 0 : index
    %c0_41 = arith.constant 0 : index
    %c0_42 = arith.constant 0 : index
    %c0_43 = arith.constant 0 : index
    %106 = vector.load %arg18[%c0_40, %c0_41, %c0_42, %c0_43] : memref<2x3x1x32xf32, #tpu.memory_space<vmem>>, vector<1x1x1x32xf32>
    %107 = vector.shape_cast %106 : vector<1x1x1x32xf32> to vector<1x32xf32>
    %c0_44 = arith.constant 0 : index
    %c0_45 = arith.constant 0 : index
    %c0_46 = arith.constant 0 : index
    %c0_47 = arith.constant 0 : index
    %108 = vector.load %arg19[%c0_44, %c0_45, %c0_46, %c0_47] : memref<2x3x1x32xf32, #tpu.memory_space<vmem>>, vector<1x1x1x32xf32>
    %109 = vector.shape_cast %108 : vector<1x1x1x32xf32> to vector<1x32xf32>
    %cst_48 = arith.constant dense<0.000000e+00> : vector<16xf32>
    %110 = vector.multi_reduction <add>, %105, %cst_48 [1] : vector<16x32xf32> to vector<16xf32>
    %111 = vector.shape_cast %110 : vector<16xf32> to vector<16x1xf32>
    %cst_49 = arith.constant 3.200000e+01 : f32
    %112 = vector.broadcast %cst_49 : f32 to vector<16x1xf32>
    %113 = arith.divf %111, %112 : vector<16x1xf32>
    %114 = vector.broadcast %113 : vector<16x1xf32> to vector<16x32xf32>
    %115 = arith.subf %105, %114 : vector<16x32xf32>
    %116 = arith.mulf %115, %115 : vector<16x32xf32>
    %cst_50 = arith.constant dense<0.000000e+00> : vector<16xf32>
    %117 = vector.multi_reduction <add>, %116, %cst_50 [1] : vector<16x32xf32> to vector<16xf32>
    %118 = vector.shape_cast %117 : vector<16xf32> to vector<16x1xf32>
    %cst_51 = arith.constant 3.200000e+01 : f32
    %119 = vector.broadcast %cst_51 : f32 to vector<16x1xf32>
    %120 = arith.divf %118, %119 : vector<16x1xf32>
    %121 = vector.broadcast %113 : vector<16x1xf32> to vector<16x32xf32>
    %122 = arith.subf %105, %121 : vector<16x32xf32>
    %cst_52 = arith.constant 9.99999997E-7 : f32
    %123 = vector.broadcast %cst_52 : f32 to vector<16x1xf32>
    %124 = arith.addf %120, %123 : vector<16x1xf32>
    %125 = math.rsqrt %124 : vector<16x1xf32>
    %126 = vector.broadcast %125 : vector<16x1xf32> to vector<16x32xf32>
    %127 = arith.mulf %122, %126 : vector<16x32xf32>
    %128 = vector.broadcast %107 : vector<1x32xf32> to vector<16x32xf32>
    %129 = arith.mulf %127, %128 : vector<16x32xf32>
    %130 = vector.broadcast %109 : vector<1x32xf32> to vector<16x32xf32>
    %131 = arith.addf %129, %130 : vector<16x32xf32>
    %c0_53 = arith.constant 0 : index
    %c0_54 = arith.constant 0 : index
    %c0_55 = arith.constant 0 : index
    %132 = vector.load %arg8[%c0_53, %c0_54, %c0_55] : memref<2x32x32xf32, #tpu.memory_space<vmem>>, vector<1x32x32xf32>
    %133 = vector.shape_cast %132 : vector<1x32x32xf32> to vector<32x32xf32>
    %cst_56 = arith.constant dense<0.000000e+00> : vector<16x32xf32>
    %134 = tpu.matmul %131, %133, %cst_56 {dimension_numbers = #tpu.dot_dimension_numbers<[1], [0], [0], [1], [0, 0, 1, 1], [], []>} : vector<16x32xf32>, vector<32x32xf32>, vector<16x32xf32> -> vector<16x32xf32>
    %c0_57 = arith.constant 0 : index
    %c0_58 = arith.constant 0 : index
    %c0_59 = arith.constant 0 : index
    %135 = vector.load %arg9[%c0_57, %c0_58, %c0_59] : memref<2x1x32xf32, #tpu.memory_space<vmem>>, vector<1x1x32xf32>
    %136 = vector.shape_cast %135 : vector<1x1x32xf32> to vector<1x32xf32>
    %137 = vector.broadcast %136 : vector<1x32xf32> to vector<16x32xf32>
    %138 = arith.addf %134, %137 : vector<16x32xf32>
    %c0_60 = arith.constant 0 : index
    %c0_61 = arith.constant 0 : index
    %c0_62 = arith.constant 0 : index
    %139 = vector.load %arg10[%c0_60, %c0_61, %c0_62] : memref<2x32x64xf32, #tpu.memory_space<vmem>>, vector<1x32x64xf32>
    %140 = vector.shape_cast %139 : vector<1x32x64xf32> to vector<32x64xf32>
    %cst_63 = arith.constant dense<0.000000e+00> : vector<16x64xf32>
    %141 = tpu.matmul %1, %140, %cst_63 {dimension_numbers = #tpu.dot_dimension_numbers<[1], [0], [0], [1], [0, 0, 1, 1], [], []>} : vector<16x32xf32>, vector<32x64xf32>, vector<16x64xf32> -> vector<16x64xf32>
    %c0_64 = arith.constant 0 : index
    %c0_65 = arith.constant 0 : index
    %c0_66 = arith.constant 0 : index
    %142 = vector.load %arg11[%c0_64, %c0_65, %c0_66] : memref<2x1x64xf32, #tpu.memory_space<vmem>>, vector<1x1x64xf32>
    %143 = vector.shape_cast %142 : vector<1x1x64xf32> to vector<1x64xf32>
    %144 = vector.broadcast %143 : vector<1x64xf32> to vector<16x64xf32>
    %145 = arith.addf %141, %144 : vector<16x64xf32>
    %146 = vector.shape_cast %138 : vector<16x32xf32> to vector<2x8x32xf32>
    %147 = vector.extract_strided_slice %145 {offsets = [0, 0], sizes = [16, 32], strides = [1, 1]} : vector<16x64xf32> to vector<16x32xf32>
    %148 = vector.shape_cast %147 : vector<16x32xf32> to vector<2x8x32xf32>
    %149 = vector.extract_strided_slice %145 {offsets = [0, 32], sizes = [16, 32], strides = [1, 1]} : vector<16x64xf32> to vector<16x32xf32>
    %150 = vector.shape_cast %149 : vector<16x32xf32> to vector<2x8x32xf32>
    %151 = vector.extract_strided_slice %146 {offsets = [0, 0, 0], sizes = [2, 8, 8], strides = [1, 1, 1]} : vector<2x8x32xf32> to vector<2x8x8xf32>
    %152 = vector.extract_strided_slice %148 {offsets = [0, 0, 0], sizes = [2, 8, 8], strides = [1, 1, 1]} : vector<2x8x32xf32> to vector<2x8x8xf32>
    "tpu.trace_start"() <{level = 10 : i32, message = "bqd,bkd->bqk"}> : () -> ()
    %cst_67 = arith.constant dense<0.000000e+00> : vector<2x8x8xf32>
    %153 = tpu.matmul %151, %152, %cst_67 {dimension_numbers = #tpu.dot_dimension_numbers<[2], [2], [1], [1], [0, 0, 0, 1, 1, 1], [0], [0]>} : vector<2x8x8xf32>, vector<2x8x8xf32>, vector<2x8x8xf32> -> vector<2x8x8xf32>
    "tpu.trace_stop"() : () -> ()
    %cst_68 = arith.constant 0.353553385 : f32
    %154 = vector.broadcast %cst_68 : f32 to vector<2x8x8xf32>
    %155 = arith.mulf %153, %154 : vector<2x8x8xf32>
    %156 = arith.addf %155, %9 : vector<2x8x8xf32>
    %cst_69 = arith.constant dense<0xFF800000> : vector<2x8xf32>
    %157 = vector.multi_reduction <maximumf>, %156, %cst_69 [2] : vector<2x8x8xf32> to vector<2x8xf32>
    %158 = vector.shape_cast %157 : vector<2x8xf32> to vector<2x8x1xf32>
    %159 = vector.broadcast %158 : vector<2x8x1xf32> to vector<2x8x8xf32>
    %160 = arith.subf %156, %159 : vector<2x8x8xf32>
    %161 = math.exp %160 : vector<2x8x8xf32>
    %cst_70 = arith.constant dense<0.000000e+00> : vector<2x8xf32>
    %162 = vector.multi_reduction <add>, %161, %cst_70 [2] : vector<2x8x8xf32> to vector<2x8xf32>
    %163 = vector.shape_cast %162 : vector<2x8xf32> to vector<2x8x1xf32>
    %164 = tpu.reciprocal %163 {approx = true} : vector<2x8x1xf32> -> vector<2x8x1xf32>
    %165 = vector.broadcast %164 : vector<2x8x1xf32> to vector<2x8x8xf32>
    %166 = arith.mulf %161, %165 : vector<2x8x8xf32>
    %167 = vector.extract_strided_slice %150 {offsets = [0, 0, 0], sizes = [2, 8, 8], strides = [1, 1, 1]} : vector<2x8x32xf32> to vector<2x8x8xf32>
    "tpu.trace_start"() <{level = 10 : i32, message = "bqk,bkd->bqd"}> : () -> ()
    %cst_71 = arith.constant dense<0.000000e+00> : vector<2x8x8xf32>
    %168 = tpu.matmul %166, %167, %cst_71 {dimension_numbers = #tpu.dot_dimension_numbers<[2], [1], [1], [2], [0, 0, 0, 1, 1, 2], [0], [0]>} : vector<2x8x8xf32>, vector<2x8x8xf32>, vector<2x8x8xf32> -> vector<2x8x8xf32>
    "tpu.trace_stop"() : () -> ()
    %169 = vector.extract_strided_slice %146 {offsets = [0, 0, 8], sizes = [2, 8, 8], strides = [1, 1, 1]} : vector<2x8x32xf32> to vector<2x8x8xf32>
    %170 = vector.extract_strided_slice %148 {offsets = [0, 0, 8], sizes = [2, 8, 8], strides = [1, 1, 1]} : vector<2x8x32xf32> to vector<2x8x8xf32>
    "tpu.trace_start"() <{level = 10 : i32, message = "bqd,bkd->bqk"}> : () -> ()
    %cst_72 = arith.constant dense<0.000000e+00> : vector<2x8x8xf32>
    %171 = tpu.matmul %169, %170, %cst_72 {dimension_numbers = #tpu.dot_dimension_numbers<[2], [2], [1], [1], [0, 0, 0, 1, 1, 1], [0], [0]>} : vector<2x8x8xf32>, vector<2x8x8xf32>, vector<2x8x8xf32> -> vector<2x8x8xf32>
    "tpu.trace_stop"() : () -> ()
    %cst_73 = arith.constant 0.353553385 : f32
    %172 = vector.broadcast %cst_73 : f32 to vector<2x8x8xf32>
    %173 = arith.mulf %171, %172 : vector<2x8x8xf32>
    %174 = arith.addf %173, %9 : vector<2x8x8xf32>
    %cst_74 = arith.constant dense<0xFF800000> : vector<2x8xf32>
    %175 = vector.multi_reduction <maximumf>, %174, %cst_74 [2] : vector<2x8x8xf32> to vector<2x8xf32>
    %176 = vector.shape_cast %175 : vector<2x8xf32> to vector<2x8x1xf32>
    %177 = vector.broadcast %176 : vector<2x8x1xf32> to vector<2x8x8xf32>
    %178 = arith.subf %174, %177 : vector<2x8x8xf32>
    %179 = math.exp %178 : vector<2x8x8xf32>
    %cst_75 = arith.constant dense<0.000000e+00> : vector<2x8xf32>
    %180 = vector.multi_reduction <add>, %179, %cst_75 [2] : vector<2x8x8xf32> to vector<2x8xf32>
    %181 = vector.shape_cast %180 : vector<2x8xf32> to vector<2x8x1xf32>
    %182 = tpu.reciprocal %181 {approx = true} : vector<2x8x1xf32> -> vector<2x8x1xf32>
    %183 = vector.broadcast %182 : vector<2x8x1xf32> to vector<2x8x8xf32>
    %184 = arith.mulf %179, %183 : vector<2x8x8xf32>
    %185 = vector.extract_strided_slice %150 {offsets = [0, 0, 8], sizes = [2, 8, 8], strides = [1, 1, 1]} : vector<2x8x32xf32> to vector<2x8x8xf32>
    "tpu.trace_start"() <{level = 10 : i32, message = "bqk,bkd->bqd"}> : () -> ()
    %cst_76 = arith.constant dense<0.000000e+00> : vector<2x8x8xf32>
    %186 = tpu.matmul %184, %185, %cst_76 {dimension_numbers = #tpu.dot_dimension_numbers<[2], [1], [1], [2], [0, 0, 0, 1, 1, 2], [0], [0]>} : vector<2x8x8xf32>, vector<2x8x8xf32>, vector<2x8x8xf32> -> vector<2x8x8xf32>
    "tpu.trace_stop"() : () -> ()
    %187 = vector.extract_strided_slice %146 {offsets = [0, 0, 16], sizes = [2, 8, 8], strides = [1, 1, 1]} : vector<2x8x32xf32> to vector<2x8x8xf32>
    %188 = vector.extract_strided_slice %148 {offsets = [0, 0, 16], sizes = [2, 8, 8], strides = [1, 1, 1]} : vector<2x8x32xf32> to vector<2x8x8xf32>
    "tpu.trace_start"() <{level = 10 : i32, message = "bqd,bkd->bqk"}> : () -> ()
    %cst_77 = arith.constant dense<0.000000e+00> : vector<2x8x8xf32>
    %189 = tpu.matmul %187, %188, %cst_77 {dimension_numbers = #tpu.dot_dimension_numbers<[2], [2], [1], [1], [0, 0, 0, 1, 1, 1], [0], [0]>} : vector<2x8x8xf32>, vector<2x8x8xf32>, vector<2x8x8xf32> -> vector<2x8x8xf32>
    "tpu.trace_stop"() : () -> ()
    %cst_78 = arith.constant 0.353553385 : f32
    %190 = vector.broadcast %cst_78 : f32 to vector<2x8x8xf32>
    %191 = arith.mulf %189, %190 : vector<2x8x8xf32>
    %192 = arith.addf %191, %9 : vector<2x8x8xf32>
    %cst_79 = arith.constant dense<0xFF800000> : vector<2x8xf32>
    %193 = vector.multi_reduction <maximumf>, %192, %cst_79 [2] : vector<2x8x8xf32> to vector<2x8xf32>
    %194 = vector.shape_cast %193 : vector<2x8xf32> to vector<2x8x1xf32>
    %195 = vector.broadcast %194 : vector<2x8x1xf32> to vector<2x8x8xf32>
    %196 = arith.subf %192, %195 : vector<2x8x8xf32>
    %197 = math.exp %196 : vector<2x8x8xf32>
    %cst_80 = arith.constant dense<0.000000e+00> : vector<2x8xf32>
    %198 = vector.multi_reduction <add>, %197, %cst_80 [2] : vector<2x8x8xf32> to vector<2x8xf32>
    %199 = vector.shape_cast %198 : vector<2x8xf32> to vector<2x8x1xf32>
    %200 = tpu.reciprocal %199 {approx = true} : vector<2x8x1xf32> -> vector<2x8x1xf32>
    %201 = vector.broadcast %200 : vector<2x8x1xf32> to vector<2x8x8xf32>
    %202 = arith.mulf %197, %201 : vector<2x8x8xf32>
    %203 = vector.extract_strided_slice %150 {offsets = [0, 0, 16], sizes = [2, 8, 8], strides = [1, 1, 1]} : vector<2x8x32xf32> to vector<2x8x8xf32>
    "tpu.trace_start"() <{level = 10 : i32, message = "bqk,bkd->bqd"}> : () -> ()
    %cst_81 = arith.constant dense<0.000000e+00> : vector<2x8x8xf32>
    %204 = tpu.matmul %202, %203, %cst_81 {dimension_numbers = #tpu.dot_dimension_numbers<[2], [1], [1], [2], [0, 0, 0, 1, 1, 2], [0], [0]>} : vector<2x8x8xf32>, vector<2x8x8xf32>, vector<2x8x8xf32> -> vector<2x8x8xf32>
    "tpu.trace_stop"() : () -> ()
    %205 = vector.extract_strided_slice %146 {offsets = [0, 0, 24], sizes = [2, 8, 8], strides = [1, 1, 1]} : vector<2x8x32xf32> to vector<2x8x8xf32>
    %206 = vector.extract_strided_slice %148 {offsets = [0, 0, 24], sizes = [2, 8, 8], strides = [1, 1, 1]} : vector<2x8x32xf32> to vector<2x8x8xf32>
    "tpu.trace_start"() <{level = 10 : i32, message = "bqd,bkd->bqk"}> : () -> ()
    %cst_82 = arith.constant dense<0.000000e+00> : vector<2x8x8xf32>
    %207 = tpu.matmul %205, %206, %cst_82 {dimension_numbers = #tpu.dot_dimension_numbers<[2], [2], [1], [1], [0, 0, 0, 1, 1, 1], [0], [0]>} : vector<2x8x8xf32>, vector<2x8x8xf32>, vector<2x8x8xf32> -> vector<2x8x8xf32>
    "tpu.trace_stop"() : () -> ()
    %cst_83 = arith.constant 0.353553385 : f32
    %208 = vector.broadcast %cst_83 : f32 to vector<2x8x8xf32>
    %209 = arith.mulf %207, %208 : vector<2x8x8xf32>
    %210 = arith.addf %209, %9 : vector<2x8x8xf32>
    %cst_84 = arith.constant dense<0xFF800000> : vector<2x8xf32>
    %211 = vector.multi_reduction <maximumf>, %210, %cst_84 [2] : vector<2x8x8xf32> to vector<2x8xf32>
    %212 = vector.shape_cast %211 : vector<2x8xf32> to vector<2x8x1xf32>
    %213 = vector.broadcast %212 : vector<2x8x1xf32> to vector<2x8x8xf32>
    %214 = arith.subf %210, %213 : vector<2x8x8xf32>
    %215 = math.exp %214 : vector<2x8x8xf32>
    %cst_85 = arith.constant dense<0.000000e+00> : vector<2x8xf32>
    %216 = vector.multi_reduction <add>, %215, %cst_85 [2] : vector<2x8x8xf32> to vector<2x8xf32>
    %217 = vector.shape_cast %216 : vector<2x8xf32> to vector<2x8x1xf32>
    %218 = tpu.reciprocal %217 {approx = true} : vector<2x8x1xf32> -> vector<2x8x1xf32>
    %219 = vector.broadcast %218 : vector<2x8x1xf32> to vector<2x8x8xf32>
    %220 = arith.mulf %215, %219 : vector<2x8x8xf32>
    %221 = vector.extract_strided_slice %150 {offsets = [0, 0, 24], sizes = [2, 8, 8], strides = [1, 1, 1]} : vector<2x8x32xf32> to vector<2x8x8xf32>
    "tpu.trace_start"() <{level = 10 : i32, message = "bqk,bkd->bqd"}> : () -> ()
    %cst_86 = arith.constant dense<0.000000e+00> : vector<2x8x8xf32>
    %222 = tpu.matmul %220, %221, %cst_86 {dimension_numbers = #tpu.dot_dimension_numbers<[2], [1], [1], [2], [0, 0, 0, 1, 1, 2], [0], [0]>} : vector<2x8x8xf32>, vector<2x8x8xf32>, vector<2x8x8xf32> -> vector<2x8x8xf32>
    "tpu.trace_stop"() : () -> ()
    %223 = tpu.concatenate %166, %184, %202, %220 in 2 : vector<2x8x8xf32>, vector<2x8x8xf32>, vector<2x8x8xf32>, vector<2x8x8xf32> -> vector<2x8x32xf32>
    %224 = tpu.concatenate %168, %186, %204, %222 in 2 : vector<2x8x8xf32>, vector<2x8x8xf32>, vector<2x8x8xf32>, vector<2x8x8xf32> -> vector<2x8x32xf32>
    %225 = vector.shape_cast %224 : vector<2x8x32xf32> to vector<16x32xf32>
    %c0_87 = arith.constant 0 : index
    %c0_88 = arith.constant 0 : index
    %c0_89 = arith.constant 0 : index
    %226 = vector.load %arg12[%c0_87, %c0_88, %c0_89] : memref<2x32x32xf32, #tpu.memory_space<vmem>>, vector<1x32x32xf32>
    %227 = vector.shape_cast %226 : vector<1x32x32xf32> to vector<32x32xf32>
    %cst_90 = arith.constant dense<0.000000e+00> : vector<16x32xf32>
    %228 = tpu.matmul %225, %227, %cst_90 {dimension_numbers = #tpu.dot_dimension_numbers<[1], [0], [0], [1], [0, 0, 1, 1], [], []>} : vector<16x32xf32>, vector<32x32xf32>, vector<16x32xf32> -> vector<16x32xf32>
    %c0_91 = arith.constant 0 : index
    %c0_92 = arith.constant 0 : index
    %c0_93 = arith.constant 0 : index
    %229 = vector.load %arg13[%c0_91, %c0_92, %c0_93] : memref<2x1x32xf32, #tpu.memory_space<vmem>>, vector<1x1x32xf32>
    %230 = vector.shape_cast %229 : vector<1x1x32xf32> to vector<1x32xf32>
    %231 = vector.broadcast %230 : vector<1x32xf32> to vector<16x32xf32>
    %232 = arith.addf %228, %231 : vector<16x32xf32>
    %233 = arith.addf %232, %131 : vector<16x32xf32>
    %c0_94 = arith.constant 0 : index
    %c1 = arith.constant 1 : index
    %c0_95 = arith.constant 0 : index
    %c0_96 = arith.constant 0 : index
    %234 = vector.load %arg18[%c0_94, %c1, %c0_95, %c0_96] : memref<2x3x1x32xf32, #tpu.memory_space<vmem>>, vector<1x1x1x32xf32>
    %235 = vector.shape_cast %234 : vector<1x1x1x32xf32> to vector<1x32xf32>
    %c0_97 = arith.constant 0 : index
    %c1_98 = arith.constant 1 : index
    %c0_99 = arith.constant 0 : index
    %c0_100 = arith.constant 0 : index
    %236 = vector.load %arg19[%c0_97, %c1_98, %c0_99, %c0_100] : memref<2x3x1x32xf32, #tpu.memory_space<vmem>>, vector<1x1x1x32xf32>
    %237 = vector.shape_cast %236 : vector<1x1x1x32xf32> to vector<1x32xf32>
    %cst_101 = arith.constant dense<0.000000e+00> : vector<16xf32>
    %238 = vector.multi_reduction <add>, %233, %cst_101 [1] : vector<16x32xf32> to vector<16xf32>
    %239 = vector.shape_cast %238 : vector<16xf32> to vector<16x1xf32>
    %cst_102 = arith.constant 3.200000e+01 : f32
    %240 = vector.broadcast %cst_102 : f32 to vector<16x1xf32>
    %241 = arith.divf %239, %240 : vector<16x1xf32>
    %242 = vector.broadcast %241 : vector<16x1xf32> to vector<16x32xf32>
    %243 = arith.subf %233, %242 : vector<16x32xf32>
    %244 = arith.mulf %243, %243 : vector<16x32xf32>
    %cst_103 = arith.constant dense<0.000000e+00> : vector<16xf32>
    %245 = vector.multi_reduction <add>, %244, %cst_103 [1] : vector<16x32xf32> to vector<16xf32>
    %246 = vector.shape_cast %245 : vector<16xf32> to vector<16x1xf32>
    %cst_104 = arith.constant 3.200000e+01 : f32
    %247 = vector.broadcast %cst_104 : f32 to vector<16x1xf32>
    %248 = arith.divf %246, %247 : vector<16x1xf32>
    %249 = vector.broadcast %241 : vector<16x1xf32> to vector<16x32xf32>
    %250 = arith.subf %233, %249 : vector<16x32xf32>
    %cst_105 = arith.constant 9.99999997E-7 : f32
    %251 = vector.broadcast %cst_105 : f32 to vector<16x1xf32>
    %252 = arith.addf %248, %251 : vector<16x1xf32>
    %253 = math.rsqrt %252 : vector<16x1xf32>
    %254 = vector.broadcast %253 : vector<16x1xf32> to vector<16x32xf32>
    %255 = arith.mulf %250, %254 : vector<16x32xf32>
    %256 = vector.broadcast %235 : vector<1x32xf32> to vector<16x32xf32>
    %257 = arith.mulf %255, %256 : vector<16x32xf32>
    %258 = vector.broadcast %237 : vector<1x32xf32> to vector<16x32xf32>
    %259 = arith.addf %257, %258 : vector<16x32xf32>
    %c0_106 = arith.constant 0 : index
    %c0_107 = arith.constant 0 : index
    %c0_108 = arith.constant 0 : index
    %260 = vector.load %arg14[%c0_106, %c0_107, %c0_108] : memref<2x32x64xf32, #tpu.memory_space<vmem>>, vector<1x32x64xf32>
    %261 = vector.shape_cast %260 : vector<1x32x64xf32> to vector<32x64xf32>
    %cst_109 = arith.constant dense<0.000000e+00> : vector<16x64xf32>
    %262 = tpu.matmul %259, %261, %cst_109 {dimension_numbers = #tpu.dot_dimension_numbers<[1], [0], [0], [1], [0, 0, 1, 1], [], []>} : vector<16x32xf32>, vector<32x64xf32>, vector<16x64xf32> -> vector<16x64xf32>
    %c0_110 = arith.constant 0 : index
    %c0_111 = arith.constant 0 : index
    %c0_112 = arith.constant 0 : index
    %263 = vector.load %arg15[%c0_110, %c0_111, %c0_112] : memref<2x1x64xf32, #tpu.memory_space<vmem>>, vector<1x1x64xf32>
    %264 = vector.shape_cast %263 : vector<1x1x64xf32> to vector<1x64xf32>
    %265 = vector.broadcast %264 : vector<1x64xf32> to vector<16x64xf32>
    %266 = arith.addf %262, %265 : vector<16x64xf32>
    %cst_113 = arith.constant 0.000000e+00 : f32
    %267 = vector.broadcast %cst_113 : f32 to vector<16x64xf32>
    %268 = arith.maximumf %266, %267 : vector<16x64xf32>
    %c0_114 = arith.constant 0 : index
    %c0_115 = arith.constant 0 : index
    %c0_116 = arith.constant 0 : index
    %269 = vector.load %arg16[%c0_114, %c0_115, %c0_116] : memref<2x64x32xf32, #tpu.memory_space<vmem>>, vector<1x64x32xf32>
    %270 = vector.shape_cast %269 : vector<1x64x32xf32> to vector<64x32xf32>
    %cst_117 = arith.constant dense<0.000000e+00> : vector<16x32xf32>
    %271 = tpu.matmul %268, %270, %cst_117 {dimension_numbers = #tpu.dot_dimension_numbers<[1], [0], [0], [1], [0, 0, 1, 1], [], []>} : vector<16x64xf32>, vector<64x32xf32>, vector<16x32xf32> -> vector<16x32xf32>
    %c0_118 = arith.constant 0 : index
    %c0_119 = arith.constant 0 : index
    %c0_120 = arith.constant 0 : index
    %272 = vector.load %arg17[%c0_118, %c0_119, %c0_120] : memref<2x1x32xf32, #tpu.memory_space<vmem>>, vector<1x1x32xf32>
    %273 = vector.shape_cast %272 : vector<1x1x32xf32> to vector<1x32xf32>
    %274 = vector.broadcast %273 : vector<1x32xf32> to vector<16x32xf32>
    %275 = arith.addf %271, %274 : vector<16x32xf32>
    %276 = arith.addf %275, %259 : vector<16x32xf32>
    %c0_121 = arith.constant 0 : index
    %c2 = arith.constant 2 : index
    %c0_122 = arith.constant 0 : index
    %c0_123 = arith.constant 0 : index
    %277 = vector.load %arg18[%c0_121, %c2, %c0_122, %c0_123] : memref<2x3x1x32xf32, #tpu.memory_space<vmem>>, vector<1x1x1x32xf32>
    %278 = vector.shape_cast %277 : vector<1x1x1x32xf32> to vector<1x32xf32>
    %c0_124 = arith.constant 0 : index
    %c2_125 = arith.constant 2 : index
    %c0_126 = arith.constant 0 : index
    %c0_127 = arith.constant 0 : index
    %279 = vector.load %arg19[%c0_124, %c2_125, %c0_126, %c0_127] : memref<2x3x1x32xf32, #tpu.memory_space<vmem>>, vector<1x1x1x32xf32>
    %280 = vector.shape_cast %279 : vector<1x1x1x32xf32> to vector<1x32xf32>
    %cst_128 = arith.constant dense<0.000000e+00> : vector<16xf32>
    %281 = vector.multi_reduction <add>, %276, %cst_128 [1] : vector<16x32xf32> to vector<16xf32>
    %282 = vector.shape_cast %281 : vector<16xf32> to vector<16x1xf32>
    %cst_129 = arith.constant 3.200000e+01 : f32
    %283 = vector.broadcast %cst_129 : f32 to vector<16x1xf32>
    %284 = arith.divf %282, %283 : vector<16x1xf32>
    %285 = vector.broadcast %284 : vector<16x1xf32> to vector<16x32xf32>
    %286 = arith.subf %276, %285 : vector<16x32xf32>
    %287 = arith.mulf %286, %286 : vector<16x32xf32>
    %cst_130 = arith.constant dense<0.000000e+00> : vector<16xf32>
    %288 = vector.multi_reduction <add>, %287, %cst_130 [1] : vector<16x32xf32> to vector<16xf32>
    %289 = vector.shape_cast %288 : vector<16xf32> to vector<16x1xf32>
    %cst_131 = arith.constant 3.200000e+01 : f32
    %290 = vector.broadcast %cst_131 : f32 to vector<16x1xf32>
    %291 = arith.divf %289, %290 : vector<16x1xf32>
    %292 = vector.broadcast %284 : vector<16x1xf32> to vector<16x32xf32>
    %293 = arith.subf %276, %292 : vector<16x32xf32>
    %cst_132 = arith.constant 9.99999997E-7 : f32
    %294 = vector.broadcast %cst_132 : f32 to vector<16x1xf32>
    %295 = arith.addf %291, %294 : vector<16x1xf32>
    %296 = math.rsqrt %295 : vector<16x1xf32>
    %297 = vector.broadcast %296 : vector<16x1xf32> to vector<16x32xf32>
    %298 = arith.mulf %293, %297 : vector<16x32xf32>
    %299 = vector.broadcast %278 : vector<1x32xf32> to vector<16x32xf32>
    %300 = arith.mulf %298, %299 : vector<16x32xf32>
    %301 = vector.broadcast %280 : vector<1x32xf32> to vector<16x32xf32>
    %302 = arith.addf %300, %301 : vector<16x32xf32>
    %c1_133 = arith.constant 1 : index
    %c0_134 = arith.constant 0 : index
    %c0_135 = arith.constant 0 : index
    %303 = vector.load %arg4[%c1_133, %c0_134, %c0_135] : memref<2x32x96xf32, #tpu.memory_space<vmem>>, vector<1x32x96xf32>
    %304 = vector.shape_cast %303 : vector<1x32x96xf32> to vector<32x96xf32>
    %cst_136 = arith.constant dense<0.000000e+00> : vector<16x96xf32>
    %305 = tpu.matmul %302, %304, %cst_136 {dimension_numbers = #tpu.dot_dimension_numbers<[1], [0], [0], [1], [0, 0, 1, 1], [], []>} : vector<16x32xf32>, vector<32x96xf32>, vector<16x96xf32> -> vector<16x96xf32>
    %c1_137 = arith.constant 1 : index
    %c0_138 = arith.constant 0 : index
    %c0_139 = arith.constant 0 : index
    %306 = vector.load %arg5[%c1_137, %c0_138, %c0_139] : memref<2x1x96xf32, #tpu.memory_space<vmem>>, vector<1x1x96xf32>
    %307 = vector.shape_cast %306 : vector<1x1x96xf32> to vector<1x96xf32>
    %308 = vector.broadcast %307 : vector<1x96xf32> to vector<16x96xf32>
    %309 = arith.addf %305, %308 : vector<16x96xf32>
    %310 = vector.extract_strided_slice %309 {offsets = [0, 0], sizes = [16, 32], strides = [1, 1]} : vector<16x96xf32> to vector<16x32xf32>
    %311 = vector.shape_cast %310 : vector<16x32xf32> to vector<2x8x32xf32>
    %312 = vector.extract_strided_slice %309 {offsets = [0, 32], sizes = [16, 32], strides = [1, 1]} : vector<16x96xf32> to vector<16x32xf32>
    %313 = vector.shape_cast %312 : vector<16x32xf32> to vector<2x8x32xf32>
    %314 = vector.extract_strided_slice %309 {offsets = [0, 64], sizes = [16, 32], strides = [1, 1]} : vector<16x96xf32> to vector<16x32xf32>
    %315 = vector.shape_cast %314 : vector<16x32xf32> to vector<2x8x32xf32>
    %316 = vector.extract_strided_slice %311 {offsets = [0, 0, 0], sizes = [2, 8, 8], strides = [1, 1, 1]} : vector<2x8x32xf32> to vector<2x8x8xf32>
    %317 = vector.extract_strided_slice %313 {offsets = [0, 0, 0], sizes = [2, 8, 8], strides = [1, 1, 1]} : vector<2x8x32xf32> to vector<2x8x8xf32>
    "tpu.trace_start"() <{level = 10 : i32, message = "bqd,bkd->bqk"}> : () -> ()
    %cst_140 = arith.constant dense<0.000000e+00> : vector<2x8x8xf32>
    %318 = tpu.matmul %316, %317, %cst_140 {dimension_numbers = #tpu.dot_dimension_numbers<[2], [2], [1], [1], [0, 0, 0, 1, 1, 1], [0], [0]>} : vector<2x8x8xf32>, vector<2x8x8xf32>, vector<2x8x8xf32> -> vector<2x8x8xf32>
    "tpu.trace_stop"() : () -> ()
    %cst_141 = arith.constant 0.353553385 : f32
    %319 = vector.broadcast %cst_141 : f32 to vector<2x8x8xf32>
    %320 = arith.mulf %318, %319 : vector<2x8x8xf32>
    %321 = arith.addf %320, %5 : vector<2x8x8xf32>
    %cst_142 = arith.constant dense<0xFF800000> : vector<2x8xf32>
    %322 = vector.multi_reduction <maximumf>, %321, %cst_142 [2] : vector<2x8x8xf32> to vector<2x8xf32>
    %323 = vector.shape_cast %322 : vector<2x8xf32> to vector<2x8x1xf32>
    %324 = vector.broadcast %323 : vector<2x8x1xf32> to vector<2x8x8xf32>
    %325 = arith.subf %321, %324 : vector<2x8x8xf32>
    %326 = math.exp %325 : vector<2x8x8xf32>
    %cst_143 = arith.constant dense<0.000000e+00> : vector<2x8xf32>
    %327 = vector.multi_reduction <add>, %326, %cst_143 [2] : vector<2x8x8xf32> to vector<2x8xf32>
    %328 = vector.shape_cast %327 : vector<2x8xf32> to vector<2x8x1xf32>
    %329 = tpu.reciprocal %328 {approx = true} : vector<2x8x1xf32> -> vector<2x8x1xf32>
    %330 = vector.broadcast %329 : vector<2x8x1xf32> to vector<2x8x8xf32>
    %331 = arith.mulf %326, %330 : vector<2x8x8xf32>
    %332 = vector.extract_strided_slice %315 {offsets = [0, 0, 0], sizes = [2, 8, 8], strides = [1, 1, 1]} : vector<2x8x32xf32> to vector<2x8x8xf32>
    "tpu.trace_start"() <{level = 10 : i32, message = "bqk,bkd->bqd"}> : () -> ()
    %cst_144 = arith.constant dense<0.000000e+00> : vector<2x8x8xf32>
    %333 = tpu.matmul %331, %332, %cst_144 {dimension_numbers = #tpu.dot_dimension_numbers<[2], [1], [1], [2], [0, 0, 0, 1, 1, 2], [0], [0]>} : vector<2x8x8xf32>, vector<2x8x8xf32>, vector<2x8x8xf32> -> vector<2x8x8xf32>
    "tpu.trace_stop"() : () -> ()
    %334 = vector.extract_strided_slice %311 {offsets = [0, 0, 8], sizes = [2, 8, 8], strides = [1, 1, 1]} : vector<2x8x32xf32> to vector<2x8x8xf32>
    %335 = vector.extract_strided_slice %313 {offsets = [0, 0, 8], sizes = [2, 8, 8], strides = [1, 1, 1]} : vector<2x8x32xf32> to vector<2x8x8xf32>
    "tpu.trace_start"() <{level = 10 : i32, message = "bqd,bkd->bqk"}> : () -> ()
    %cst_145 = arith.constant dense<0.000000e+00> : vector<2x8x8xf32>
    %336 = tpu.matmul %334, %335, %cst_145 {dimension_numbers = #tpu.dot_dimension_numbers<[2], [2], [1], [1], [0, 0, 0, 1, 1, 1], [0], [0]>} : vector<2x8x8xf32>, vector<2x8x8xf32>, vector<2x8x8xf32> -> vector<2x8x8xf32>
    "tpu.trace_stop"() : () -> ()
    %cst_146 = arith.constant 0.353553385 : f32
    %337 = vector.broadcast %cst_146 : f32 to vector<2x8x8xf32>
    %338 = arith.mulf %336, %337 : vector<2x8x8xf32>
    %339 = arith.addf %338, %5 : vector<2x8x8xf32>
    %cst_147 = arith.constant dense<0xFF800000> : vector<2x8xf32>
    %340 = vector.multi_reduction <maximumf>, %339, %cst_147 [2] : vector<2x8x8xf32> to vector<2x8xf32>
    %341 = vector.shape_cast %340 : vector<2x8xf32> to vector<2x8x1xf32>
    %342 = vector.broadcast %341 : vector<2x8x1xf32> to vector<2x8x8xf32>
    %343 = arith.subf %339, %342 : vector<2x8x8xf32>
    %344 = math.exp %343 : vector<2x8x8xf32>
    %cst_148 = arith.constant dense<0.000000e+00> : vector<2x8xf32>
    %345 = vector.multi_reduction <add>, %344, %cst_148 [2] : vector<2x8x8xf32> to vector<2x8xf32>
    %346 = vector.shape_cast %345 : vector<2x8xf32> to vector<2x8x1xf32>
    %347 = tpu.reciprocal %346 {approx = true} : vector<2x8x1xf32> -> vector<2x8x1xf32>
    %348 = vector.broadcast %347 : vector<2x8x1xf32> to vector<2x8x8xf32>
    %349 = arith.mulf %344, %348 : vector<2x8x8xf32>
    %350 = vector.extract_strided_slice %315 {offsets = [0, 0, 8], sizes = [2, 8, 8], strides = [1, 1, 1]} : vector<2x8x32xf32> to vector<2x8x8xf32>
    "tpu.trace_start"() <{level = 10 : i32, message = "bqk,bkd->bqd"}> : () -> ()
    %cst_149 = arith.constant dense<0.000000e+00> : vector<2x8x8xf32>
    %351 = tpu.matmul %349, %350, %cst_149 {dimension_numbers = #tpu.dot_dimension_numbers<[2], [1], [1], [2], [0, 0, 0, 1, 1, 2], [0], [0]>} : vector<2x8x8xf32>, vector<2x8x8xf32>, vector<2x8x8xf32> -> vector<2x8x8xf32>
    "tpu.trace_stop"() : () -> ()
    %352 = vector.extract_strided_slice %311 {offsets = [0, 0, 16], sizes = [2, 8, 8], strides = [1, 1, 1]} : vector<2x8x32xf32> to vector<2x8x8xf32>
    %353 = vector.extract_strided_slice %313 {offsets = [0, 0, 16], sizes = [2, 8, 8], strides = [1, 1, 1]} : vector<2x8x32xf32> to vector<2x8x8xf32>
    "tpu.trace_start"() <{level = 10 : i32, message = "bqd,bkd->bqk"}> : () -> ()
    %cst_150 = arith.constant dense<0.000000e+00> : vector<2x8x8xf32>
    %354 = tpu.matmul %352, %353, %cst_150 {dimension_numbers = #tpu.dot_dimension_numbers<[2], [2], [1], [1], [0, 0, 0, 1, 1, 1], [0], [0]>} : vector<2x8x8xf32>, vector<2x8x8xf32>, vector<2x8x8xf32> -> vector<2x8x8xf32>
    "tpu.trace_stop"() : () -> ()
    %cst_151 = arith.constant 0.353553385 : f32
    %355 = vector.broadcast %cst_151 : f32 to vector<2x8x8xf32>
    %356 = arith.mulf %354, %355 : vector<2x8x8xf32>
    %357 = arith.addf %356, %5 : vector<2x8x8xf32>
    %cst_152 = arith.constant dense<0xFF800000> : vector<2x8xf32>
    %358 = vector.multi_reduction <maximumf>, %357, %cst_152 [2] : vector<2x8x8xf32> to vector<2x8xf32>
    %359 = vector.shape_cast %358 : vector<2x8xf32> to vector<2x8x1xf32>
    %360 = vector.broadcast %359 : vector<2x8x1xf32> to vector<2x8x8xf32>
    %361 = arith.subf %357, %360 : vector<2x8x8xf32>
    %362 = math.exp %361 : vector<2x8x8xf32>
    %cst_153 = arith.constant dense<0.000000e+00> : vector<2x8xf32>
    %363 = vector.multi_reduction <add>, %362, %cst_153 [2] : vector<2x8x8xf32> to vector<2x8xf32>
    %364 = vector.shape_cast %363 : vector<2x8xf32> to vector<2x8x1xf32>
    %365 = tpu.reciprocal %364 {approx = true} : vector<2x8x1xf32> -> vector<2x8x1xf32>
    %366 = vector.broadcast %365 : vector<2x8x1xf32> to vector<2x8x8xf32>
    %367 = arith.mulf %362, %366 : vector<2x8x8xf32>
    %368 = vector.extract_strided_slice %315 {offsets = [0, 0, 16], sizes = [2, 8, 8], strides = [1, 1, 1]} : vector<2x8x32xf32> to vector<2x8x8xf32>
    "tpu.trace_start"() <{level = 10 : i32, message = "bqk,bkd->bqd"}> : () -> ()
    %cst_154 = arith.constant dense<0.000000e+00> : vector<2x8x8xf32>
    %369 = tpu.matmul %367, %368, %cst_154 {dimension_numbers = #tpu.dot_dimension_numbers<[2], [1], [1], [2], [0, 0, 0, 1, 1, 2], [0], [0]>} : vector<2x8x8xf32>, vector<2x8x8xf32>, vector<2x8x8xf32> -> vector<2x8x8xf32>
    "tpu.trace_stop"() : () -> ()
    %370 = vector.extract_strided_slice %311 {offsets = [0, 0, 24], sizes = [2, 8, 8], strides = [1, 1, 1]} : vector<2x8x32xf32> to vector<2x8x8xf32>
    %371 = vector.extract_strided_slice %313 {offsets = [0, 0, 24], sizes = [2, 8, 8], strides = [1, 1, 1]} : vector<2x8x32xf32> to vector<2x8x8xf32>
    "tpu.trace_start"() <{level = 10 : i32, message = "bqd,bkd->bqk"}> : () -> ()
    %cst_155 = arith.constant dense<0.000000e+00> : vector<2x8x8xf32>
    %372 = tpu.matmul %370, %371, %cst_155 {dimension_numbers = #tpu.dot_dimension_numbers<[2], [2], [1], [1], [0, 0, 0, 1, 1, 1], [0], [0]>} : vector<2x8x8xf32>, vector<2x8x8xf32>, vector<2x8x8xf32> -> vector<2x8x8xf32>
    "tpu.trace_stop"() : () -> ()
    %cst_156 = arith.constant 0.353553385 : f32
    %373 = vector.broadcast %cst_156 : f32 to vector<2x8x8xf32>
    %374 = arith.mulf %372, %373 : vector<2x8x8xf32>
    %375 = arith.addf %374, %5 : vector<2x8x8xf32>
    %cst_157 = arith.constant dense<0xFF800000> : vector<2x8xf32>
    %376 = vector.multi_reduction <maximumf>, %375, %cst_157 [2] : vector<2x8x8xf32> to vector<2x8xf32>
    %377 = vector.shape_cast %376 : vector<2x8xf32> to vector<2x8x1xf32>
    %378 = vector.broadcast %377 : vector<2x8x1xf32> to vector<2x8x8xf32>
    %379 = arith.subf %375, %378 : vector<2x8x8xf32>
    %380 = math.exp %379 : vector<2x8x8xf32>
    %cst_158 = arith.constant dense<0.000000e+00> : vector<2x8xf32>
    %381 = vector.multi_reduction <add>, %380, %cst_158 [2] : vector<2x8x8xf32> to vector<2x8xf32>
    %382 = vector.shape_cast %381 : vector<2x8xf32> to vector<2x8x1xf32>
    %383 = tpu.reciprocal %382 {approx = true} : vector<2x8x1xf32> -> vector<2x8x1xf32>
    %384 = vector.broadcast %383 : vector<2x8x1xf32> to vector<2x8x8xf32>
    %385 = arith.mulf %380, %384 : vector<2x8x8xf32>
    %386 = vector.extract_strided_slice %315 {offsets = [0, 0, 24], sizes = [2, 8, 8], strides = [1, 1, 1]} : vector<2x8x32xf32> to vector<2x8x8xf32>
    "tpu.trace_start"() <{level = 10 : i32, message = "bqk,bkd->bqd"}> : () -> ()
    %cst_159 = arith.constant dense<0.000000e+00> : vector<2x8x8xf32>
    %387 = tpu.matmul %385, %386, %cst_159 {dimension_numbers = #tpu.dot_dimension_numbers<[2], [1], [1], [2], [0, 0, 0, 1, 1, 2], [0], [0]>} : vector<2x8x8xf32>, vector<2x8x8xf32>, vector<2x8x8xf32> -> vector<2x8x8xf32>
    "tpu.trace_stop"() : () -> ()
    %388 = tpu.concatenate %331, %349, %367, %385 in 2 : vector<2x8x8xf32>, vector<2x8x8xf32>, vector<2x8x8xf32>, vector<2x8x8xf32> -> vector<2x8x32xf32>
    %389 = tpu.concatenate %333, %351, %369, %387 in 2 : vector<2x8x8xf32>, vector<2x8x8xf32>, vector<2x8x8xf32>, vector<2x8x8xf32> -> vector<2x8x32xf32>
    %390 = vector.shape_cast %389 : vector<2x8x32xf32> to vector<16x32xf32>
    %c1_160 = arith.constant 1 : index
    %c0_161 = arith.constant 0 : index
    %c0_162 = arith.constant 0 : index
    %391 = vector.load %arg6[%c1_160, %c0_161, %c0_162] : memref<2x32x32xf32, #tpu.memory_space<vmem>>, vector<1x32x32xf32>
    %392 = vector.shape_cast %391 : vector<1x32x32xf32> to vector<32x32xf32>
    %cst_163 = arith.constant dense<0.000000e+00> : vector<16x32xf32>
    %393 = tpu.matmul %390, %392, %cst_163 {dimension_numbers = #tpu.dot_dimension_numbers<[1], [0], [0], [1], [0, 0, 1, 1], [], []>} : vector<16x32xf32>, vector<32x32xf32>, vector<16x32xf32> -> vector<16x32xf32>
    %c1_164 = arith.constant 1 : index
    %c0_165 = arith.constant 0 : index
    %c0_166 = arith.constant 0 : index
    %394 = vector.load %arg7[%c1_164, %c0_165, %c0_166] : memref<2x1x32xf32, #tpu.memory_space<vmem>>, vector<1x1x32xf32>
    %395 = vector.shape_cast %394 : vector<1x1x32xf32> to vector<1x32xf32>
    %396 = vector.broadcast %395 : vector<1x32xf32> to vector<16x32xf32>
    %397 = arith.addf %393, %396 : vector<16x32xf32>
    %398 = arith.addf %397, %302 : vector<16x32xf32>
    %c1_167 = arith.constant 1 : index
    %c0_168 = arith.constant 0 : index
    %c0_169 = arith.constant 0 : index
    %c0_170 = arith.constant 0 : index
    %399 = vector.load %arg18[%c1_167, %c0_168, %c0_169, %c0_170] : memref<2x3x1x32xf32, #tpu.memory_space<vmem>>, vector<1x1x1x32xf32>
    %400 = vector.shape_cast %399 : vector<1x1x1x32xf32> to vector<1x32xf32>
    %c1_171 = arith.constant 1 : index
    %c0_172 = arith.constant 0 : index
    %c0_173 = arith.constant 0 : index
    %c0_174 = arith.constant 0 : index
    %401 = vector.load %arg19[%c1_171, %c0_172, %c0_173, %c0_174] : memref<2x3x1x32xf32, #tpu.memory_space<vmem>>, vector<1x1x1x32xf32>
    %402 = vector.shape_cast %401 : vector<1x1x1x32xf32> to vector<1x32xf32>
    %cst_175 = arith.constant dense<0.000000e+00> : vector<16xf32>
    %403 = vector.multi_reduction <add>, %398, %cst_175 [1] : vector<16x32xf32> to vector<16xf32>
    %404 = vector.shape_cast %403 : vector<16xf32> to vector<16x1xf32>
    %cst_176 = arith.constant 3.200000e+01 : f32
    %405 = vector.broadcast %cst_176 : f32 to vector<16x1xf32>
    %406 = arith.divf %404, %405 : vector<16x1xf32>
    %407 = vector.broadcast %406 : vector<16x1xf32> to vector<16x32xf32>
    %408 = arith.subf %398, %407 : vector<16x32xf32>
    %409 = arith.mulf %408, %408 : vector<16x32xf32>
    %cst_177 = arith.constant dense<0.000000e+00> : vector<16xf32>
    %410 = vector.multi_reduction <add>, %409, %cst_177 [1] : vector<16x32xf32> to vector<16xf32>
    %411 = vector.shape_cast %410 : vector<16xf32> to vector<16x1xf32>
    %cst_178 = arith.constant 3.200000e+01 : f32
    %412 = vector.broadcast %cst_178 : f32 to vector<16x1xf32>
    %413 = arith.divf %411, %412 : vector<16x1xf32>
    %414 = vector.broadcast %406 : vector<16x1xf32> to vector<16x32xf32>
    %415 = arith.subf %398, %414 : vector<16x32xf32>
    %cst_179 = arith.constant 9.99999997E-7 : f32
    %416 = vector.broadcast %cst_179 : f32 to vector<16x1xf32>
    %417 = arith.addf %413, %416 : vector<16x1xf32>
    %418 = math.rsqrt %417 : vector<16x1xf32>
    %419 = vector.broadcast %418 : vector<16x1xf32> to vector<16x32xf32>
    %420 = arith.mulf %415, %419 : vector<16x32xf32>
    %421 = vector.broadcast %400 : vector<1x32xf32> to vector<16x32xf32>
    %422 = arith.mulf %420, %421 : vector<16x32xf32>
    %423 = vector.broadcast %402 : vector<1x32xf32> to vector<16x32xf32>
    %424 = arith.addf %422, %423 : vector<16x32xf32>
    %c1_180 = arith.constant 1 : index
    %c0_181 = arith.constant 0 : index
    %c0_182 = arith.constant 0 : index
    %425 = vector.load %arg8[%c1_180, %c0_181, %c0_182] : memref<2x32x32xf32, #tpu.memory_space<vmem>>, vector<1x32x32xf32>
    %426 = vector.shape_cast %425 : vector<1x32x32xf32> to vector<32x32xf32>
    %cst_183 = arith.constant dense<0.000000e+00> : vector<16x32xf32>
    %427 = tpu.matmul %424, %426, %cst_183 {dimension_numbers = #tpu.dot_dimension_numbers<[1], [0], [0], [1], [0, 0, 1, 1], [], []>} : vector<16x32xf32>, vector<32x32xf32>, vector<16x32xf32> -> vector<16x32xf32>
    %c1_184 = arith.constant 1 : index
    %c0_185 = arith.constant 0 : index
    %c0_186 = arith.constant 0 : index
    %428 = vector.load %arg9[%c1_184, %c0_185, %c0_186] : memref<2x1x32xf32, #tpu.memory_space<vmem>>, vector<1x1x32xf32>
    %429 = vector.shape_cast %428 : vector<1x1x32xf32> to vector<1x32xf32>
    %430 = vector.broadcast %429 : vector<1x32xf32> to vector<16x32xf32>
    %431 = arith.addf %427, %430 : vector<16x32xf32>
    %c1_187 = arith.constant 1 : index
    %c0_188 = arith.constant 0 : index
    %c0_189 = arith.constant 0 : index
    %432 = vector.load %arg10[%c1_187, %c0_188, %c0_189] : memref<2x32x64xf32, #tpu.memory_space<vmem>>, vector<1x32x64xf32>
    %433 = vector.shape_cast %432 : vector<1x32x64xf32> to vector<32x64xf32>
    %cst_190 = arith.constant dense<0.000000e+00> : vector<16x64xf32>
    %434 = tpu.matmul %1, %433, %cst_190 {dimension_numbers = #tpu.dot_dimension_numbers<[1], [0], [0], [1], [0, 0, 1, 1], [], []>} : vector<16x32xf32>, vector<32x64xf32>, vector<16x64xf32> -> vector<16x64xf32>
    %c1_191 = arith.constant 1 : index
    %c0_192 = arith.constant 0 : index
    %c0_193 = arith.constant 0 : index
    %435 = vector.load %arg11[%c1_191, %c0_192, %c0_193] : memref<2x1x64xf32, #tpu.memory_space<vmem>>, vector<1x1x64xf32>
    %436 = vector.shape_cast %435 : vector<1x1x64xf32> to vector<1x64xf32>
    %437 = vector.broadcast %436 : vector<1x64xf32> to vector<16x64xf32>
    %438 = arith.addf %434, %437 : vector<16x64xf32>
    %439 = vector.shape_cast %431 : vector<16x32xf32> to vector<2x8x32xf32>
    %440 = vector.extract_strided_slice %438 {offsets = [0, 0], sizes = [16, 32], strides = [1, 1]} : vector<16x64xf32> to vector<16x32xf32>
    %441 = vector.shape_cast %440 : vector<16x32xf32> to vector<2x8x32xf32>
    %442 = vector.extract_strided_slice %438 {offsets = [0, 32], sizes = [16, 32], strides = [1, 1]} : vector<16x64xf32> to vector<16x32xf32>
    %443 = vector.shape_cast %442 : vector<16x32xf32> to vector<2x8x32xf32>
    %444 = vector.extract_strided_slice %439 {offsets = [0, 0, 0], sizes = [2, 8, 8], strides = [1, 1, 1]} : vector<2x8x32xf32> to vector<2x8x8xf32>
    %445 = vector.extract_strided_slice %441 {offsets = [0, 0, 0], sizes = [2, 8, 8], strides = [1, 1, 1]} : vector<2x8x32xf32> to vector<2x8x8xf32>
    "tpu.trace_start"() <{level = 10 : i32, message = "bqd,bkd->bqk"}> : () -> ()
    %cst_194 = arith.constant dense<0.000000e+00> : vector<2x8x8xf32>
    %446 = tpu.matmul %444, %445, %cst_194 {dimension_numbers = #tpu.dot_dimension_numbers<[2], [2], [1], [1], [0, 0, 0, 1, 1, 1], [0], [0]>} : vector<2x8x8xf32>, vector<2x8x8xf32>, vector<2x8x8xf32> -> vector<2x8x8xf32>
    "tpu.trace_stop"() : () -> ()
    %cst_195 = arith.constant 0.353553385 : f32
    %447 = vector.broadcast %cst_195 : f32 to vector<2x8x8xf32>
    %448 = arith.mulf %446, %447 : vector<2x8x8xf32>
    %449 = arith.addf %448, %9 : vector<2x8x8xf32>
    %cst_196 = arith.constant dense<0xFF800000> : vector<2x8xf32>
    %450 = vector.multi_reduction <maximumf>, %449, %cst_196 [2] : vector<2x8x8xf32> to vector<2x8xf32>
    %451 = vector.shape_cast %450 : vector<2x8xf32> to vector<2x8x1xf32>
    %452 = vector.broadcast %451 : vector<2x8x1xf32> to vector<2x8x8xf32>
    %453 = arith.subf %449, %452 : vector<2x8x8xf32>
    %454 = math.exp %453 : vector<2x8x8xf32>
    %cst_197 = arith.constant dense<0.000000e+00> : vector<2x8xf32>
    %455 = vector.multi_reduction <add>, %454, %cst_197 [2] : vector<2x8x8xf32> to vector<2x8xf32>
    %456 = vector.shape_cast %455 : vector<2x8xf32> to vector<2x8x1xf32>
    %457 = tpu.reciprocal %456 {approx = true} : vector<2x8x1xf32> -> vector<2x8x1xf32>
    %458 = vector.broadcast %457 : vector<2x8x1xf32> to vector<2x8x8xf32>
    %459 = arith.mulf %454, %458 : vector<2x8x8xf32>
    %460 = vector.extract_strided_slice %443 {offsets = [0, 0, 0], sizes = [2, 8, 8], strides = [1, 1, 1]} : vector<2x8x32xf32> to vector<2x8x8xf32>
    "tpu.trace_start"() <{level = 10 : i32, message = "bqk,bkd->bqd"}> : () -> ()
    %cst_198 = arith.constant dense<0.000000e+00> : vector<2x8x8xf32>
    %461 = tpu.matmul %459, %460, %cst_198 {dimension_numbers = #tpu.dot_dimension_numbers<[2], [1], [1], [2], [0, 0, 0, 1, 1, 2], [0], [0]>} : vector<2x8x8xf32>, vector<2x8x8xf32>, vector<2x8x8xf32> -> vector<2x8x8xf32>
    "tpu.trace_stop"() : () -> ()
    %462 = vector.extract_strided_slice %439 {offsets = [0, 0, 8], sizes = [2, 8, 8], strides = [1, 1, 1]} : vector<2x8x32xf32> to vector<2x8x8xf32>
    %463 = vector.extract_strided_slice %441 {offsets = [0, 0, 8], sizes = [2, 8, 8], strides = [1, 1, 1]} : vector<2x8x32xf32> to vector<2x8x8xf32>
    "tpu.trace_start"() <{level = 10 : i32, message = "bqd,bkd->bqk"}> : () -> ()
    %cst_199 = arith.constant dense<0.000000e+00> : vector<2x8x8xf32>
    %464 = tpu.matmul %462, %463, %cst_199 {dimension_numbers = #tpu.dot_dimension_numbers<[2], [2], [1], [1], [0, 0, 0, 1, 1, 1], [0], [0]>} : vector<2x8x8xf32>, vector<2x8x8xf32>, vector<2x8x8xf32> -> vector<2x8x8xf32>
    "tpu.trace_stop"() : () -> ()
    %cst_200 = arith.constant 0.353553385 : f32
    %465 = vector.broadcast %cst_200 : f32 to vector<2x8x8xf32>
    %466 = arith.mulf %464, %465 : vector<2x8x8xf32>
    %467 = arith.addf %466, %9 : vector<2x8x8xf32>
    %cst_201 = arith.constant dense<0xFF800000> : vector<2x8xf32>
    %468 = vector.multi_reduction <maximumf>, %467, %cst_201 [2] : vector<2x8x8xf32> to vector<2x8xf32>
    %469 = vector.shape_cast %468 : vector<2x8xf32> to vector<2x8x1xf32>
    %470 = vector.broadcast %469 : vector<2x8x1xf32> to vector<2x8x8xf32>
    %471 = arith.subf %467, %470 : vector<2x8x8xf32>
    %472 = math.exp %471 : vector<2x8x8xf32>
    %cst_202 = arith.constant dense<0.000000e+00> : vector<2x8xf32>
    %473 = vector.multi_reduction <add>, %472, %cst_202 [2] : vector<2x8x8xf32> to vector<2x8xf32>
    %474 = vector.shape_cast %473 : vector<2x8xf32> to vector<2x8x1xf32>
    %475 = tpu.reciprocal %474 {approx = true} : vector<2x8x1xf32> -> vector<2x8x1xf32>
    %476 = vector.broadcast %475 : vector<2x8x1xf32> to vector<2x8x8xf32>
    %477 = arith.mulf %472, %476 : vector<2x8x8xf32>
    %478 = vector.extract_strided_slice %443 {offsets = [0, 0, 8], sizes = [2, 8, 8], strides = [1, 1, 1]} : vector<2x8x32xf32> to vector<2x8x8xf32>
    "tpu.trace_start"() <{level = 10 : i32, message = "bqk,bkd->bqd"}> : () -> ()
    %cst_203 = arith.constant dense<0.000000e+00> : vector<2x8x8xf32>
    %479 = tpu.matmul %477, %478, %cst_203 {dimension_numbers = #tpu.dot_dimension_numbers<[2], [1], [1], [2], [0, 0, 0, 1, 1, 2], [0], [0]>} : vector<2x8x8xf32>, vector<2x8x8xf32>, vector<2x8x8xf32> -> vector<2x8x8xf32>
    "tpu.trace_stop"() : () -> ()
    %480 = vector.extract_strided_slice %439 {offsets = [0, 0, 16], sizes = [2, 8, 8], strides = [1, 1, 1]} : vector<2x8x32xf32> to vector<2x8x8xf32>
    %481 = vector.extract_strided_slice %441 {offsets = [0, 0, 16], sizes = [2, 8, 8], strides = [1, 1, 1]} : vector<2x8x32xf32> to vector<2x8x8xf32>
    "tpu.trace_start"() <{level = 10 : i32, message = "bqd,bkd->bqk"}> : () -> ()
    %cst_204 = arith.constant dense<0.000000e+00> : vector<2x8x8xf32>
    %482 = tpu.matmul %480, %481, %cst_204 {dimension_numbers = #tpu.dot_dimension_numbers<[2], [2], [1], [1], [0, 0, 0, 1, 1, 1], [0], [0]>} : vector<2x8x8xf32>, vector<2x8x8xf32>, vector<2x8x8xf32> -> vector<2x8x8xf32>
    "tpu.trace_stop"() : () -> ()
    %cst_205 = arith.constant 0.353553385 : f32
    %483 = vector.broadcast %cst_205 : f32 to vector<2x8x8xf32>
    %484 = arith.mulf %482, %483 : vector<2x8x8xf32>
    %485 = arith.addf %484, %9 : vector<2x8x8xf32>
    %cst_206 = arith.constant dense<0xFF800000> : vector<2x8xf32>
    %486 = vector.multi_reduction <maximumf>, %485, %cst_206 [2] : vector<2x8x8xf32> to vector<2x8xf32>
    %487 = vector.shape_cast %486 : vector<2x8xf32> to vector<2x8x1xf32>
    %488 = vector.broadcast %487 : vector<2x8x1xf32> to vector<2x8x8xf32>
    %489 = arith.subf %485, %488 : vector<2x8x8xf32>
    %490 = math.exp %489 : vector<2x8x8xf32>
    %cst_207 = arith.constant dense<0.000000e+00> : vector<2x8xf32>
    %491 = vector.multi_reduction <add>, %490, %cst_207 [2] : vector<2x8x8xf32> to vector<2x8xf32>
    %492 = vector.shape_cast %491 : vector<2x8xf32> to vector<2x8x1xf32>
    %493 = tpu.reciprocal %492 {approx = true} : vector<2x8x1xf32> -> vector<2x8x1xf32>
    %494 = vector.broadcast %493 : vector<2x8x1xf32> to vector<2x8x8xf32>
    %495 = arith.mulf %490, %494 : vector<2x8x8xf32>
    %496 = vector.extract_strided_slice %443 {offsets = [0, 0, 16], sizes = [2, 8, 8], strides = [1, 1, 1]} : vector<2x8x32xf32> to vector<2x8x8xf32>
    "tpu.trace_start"() <{level = 10 : i32, message = "bqk,bkd->bqd"}> : () -> ()
    %cst_208 = arith.constant dense<0.000000e+00> : vector<2x8x8xf32>
    %497 = tpu.matmul %495, %496, %cst_208 {dimension_numbers = #tpu.dot_dimension_numbers<[2], [1], [1], [2], [0, 0, 0, 1, 1, 2], [0], [0]>} : vector<2x8x8xf32>, vector<2x8x8xf32>, vector<2x8x8xf32> -> vector<2x8x8xf32>
    "tpu.trace_stop"() : () -> ()
    %498 = vector.extract_strided_slice %439 {offsets = [0, 0, 24], sizes = [2, 8, 8], strides = [1, 1, 1]} : vector<2x8x32xf32> to vector<2x8x8xf32>
    %499 = vector.extract_strided_slice %441 {offsets = [0, 0, 24], sizes = [2, 8, 8], strides = [1, 1, 1]} : vector<2x8x32xf32> to vector<2x8x8xf32>
    "tpu.trace_start"() <{level = 10 : i32, message = "bqd,bkd->bqk"}> : () -> ()
    %cst_209 = arith.constant dense<0.000000e+00> : vector<2x8x8xf32>
    %500 = tpu.matmul %498, %499, %cst_209 {dimension_numbers = #tpu.dot_dimension_numbers<[2], [2], [1], [1], [0, 0, 0, 1, 1, 1], [0], [0]>} : vector<2x8x8xf32>, vector<2x8x8xf32>, vector<2x8x8xf32> -> vector<2x8x8xf32>
    "tpu.trace_stop"() : () -> ()
    %cst_210 = arith.constant 0.353553385 : f32
    %501 = vector.broadcast %cst_210 : f32 to vector<2x8x8xf32>
    %502 = arith.mulf %500, %501 : vector<2x8x8xf32>
    %503 = arith.addf %502, %9 : vector<2x8x8xf32>
    %cst_211 = arith.constant dense<0xFF800000> : vector<2x8xf32>
    %504 = vector.multi_reduction <maximumf>, %503, %cst_211 [2] : vector<2x8x8xf32> to vector<2x8xf32>
    %505 = vector.shape_cast %504 : vector<2x8xf32> to vector<2x8x1xf32>
    %506 = vector.broadcast %505 : vector<2x8x1xf32> to vector<2x8x8xf32>
    %507 = arith.subf %503, %506 : vector<2x8x8xf32>
    %508 = math.exp %507 : vector<2x8x8xf32>
    %cst_212 = arith.constant dense<0.000000e+00> : vector<2x8xf32>
    %509 = vector.multi_reduction <add>, %508, %cst_212 [2] : vector<2x8x8xf32> to vector<2x8xf32>
    %510 = vector.shape_cast %509 : vector<2x8xf32> to vector<2x8x1xf32>
    %511 = tpu.reciprocal %510 {approx = true} : vector<2x8x1xf32> -> vector<2x8x1xf32>
    %512 = vector.broadcast %511 : vector<2x8x1xf32> to vector<2x8x8xf32>
    %513 = arith.mulf %508, %512 : vector<2x8x8xf32>
    %514 = vector.extract_strided_slice %443 {offsets = [0, 0, 24], sizes = [2, 8, 8], strides = [1, 1, 1]} : vector<2x8x32xf32> to vector<2x8x8xf32>
    "tpu.trace_start"() <{level = 10 : i32, message = "bqk,bkd->bqd"}> : () -> ()
    %cst_213 = arith.constant dense<0.000000e+00> : vector<2x8x8xf32>
    %515 = tpu.matmul %513, %514, %cst_213 {dimension_numbers = #tpu.dot_dimension_numbers<[2], [1], [1], [2], [0, 0, 0, 1, 1, 2], [0], [0]>} : vector<2x8x8xf32>, vector<2x8x8xf32>, vector<2x8x8xf32> -> vector<2x8x8xf32>
    "tpu.trace_stop"() : () -> ()
    %516 = tpu.concatenate %459, %477, %495, %513 in 2 : vector<2x8x8xf32>, vector<2x8x8xf32>, vector<2x8x8xf32>, vector<2x8x8xf32> -> vector<2x8x32xf32>
    %517 = tpu.concatenate %461, %479, %497, %515 in 2 : vector<2x8x8xf32>, vector<2x8x8xf32>, vector<2x8x8xf32>, vector<2x8x8xf32> -> vector<2x8x32xf32>
    %518 = vector.shape_cast %517 : vector<2x8x32xf32> to vector<16x32xf32>
    %c1_214 = arith.constant 1 : index
    %c0_215 = arith.constant 0 : index
    %c0_216 = arith.constant 0 : index
    %519 = vector.load %arg12[%c1_214, %c0_215, %c0_216] : memref<2x32x32xf32, #tpu.memory_space<vmem>>, vector<1x32x32xf32>
    %520 = vector.shape_cast %519 : vector<1x32x32xf32> to vector<32x32xf32>
    %cst_217 = arith.constant dense<0.000000e+00> : vector<16x32xf32>
    %521 = tpu.matmul %518, %520, %cst_217 {dimension_numbers = #tpu.dot_dimension_numbers<[1], [0], [0], [1], [0, 0, 1, 1], [], []>} : vector<16x32xf32>, vector<32x32xf32>, vector<16x32xf32> -> vector<16x32xf32>
    %c1_218 = arith.constant 1 : index
    %c0_219 = arith.constant 0 : index
    %c0_220 = arith.constant 0 : index
    %522 = vector.load %arg13[%c1_218, %c0_219, %c0_220] : memref<2x1x32xf32, #tpu.memory_space<vmem>>, vector<1x1x32xf32>
    %523 = vector.shape_cast %522 : vector<1x1x32xf32> to vector<1x32xf32>
    %524 = vector.broadcast %523 : vector<1x32xf32> to vector<16x32xf32>
    %525 = arith.addf %521, %524 : vector<16x32xf32>
    %526 = arith.addf %525, %424 : vector<16x32xf32>
    %c1_221 = arith.constant 1 : index
    %c1_222 = arith.constant 1 : index
    %c0_223 = arith.constant 0 : index
    %c0_224 = arith.constant 0 : index
    %527 = vector.load %arg18[%c1_221, %c1_222, %c0_223, %c0_224] : memref<2x3x1x32xf32, #tpu.memory_space<vmem>>, vector<1x1x1x32xf32>
    %528 = vector.shape_cast %527 : vector<1x1x1x32xf32> to vector<1x32xf32>
    %c1_225 = arith.constant 1 : index
    %c1_226 = arith.constant 1 : index
    %c0_227 = arith.constant 0 : index
    %c0_228 = arith.constant 0 : index
    %529 = vector.load %arg19[%c1_225, %c1_226, %c0_227, %c0_228] : memref<2x3x1x32xf32, #tpu.memory_space<vmem>>, vector<1x1x1x32xf32>
    %530 = vector.shape_cast %529 : vector<1x1x1x32xf32> to vector<1x32xf32>
    %cst_229 = arith.constant dense<0.000000e+00> : vector<16xf32>
    %531 = vector.multi_reduction <add>, %526, %cst_229 [1] : vector<16x32xf32> to vector<16xf32>
    %532 = vector.shape_cast %531 : vector<16xf32> to vector<16x1xf32>
    %cst_230 = arith.constant 3.200000e+01 : f32
    %533 = vector.broadcast %cst_230 : f32 to vector<16x1xf32>
    %534 = arith.divf %532, %533 : vector<16x1xf32>
    %535 = vector.broadcast %534 : vector<16x1xf32> to vector<16x32xf32>
    %536 = arith.subf %526, %535 : vector<16x32xf32>
    %537 = arith.mulf %536, %536 : vector<16x32xf32>
    %cst_231 = arith.constant dense<0.000000e+00> : vector<16xf32>
    %538 = vector.multi_reduction <add>, %537, %cst_231 [1] : vector<16x32xf32> to vector<16xf32>
    %539 = vector.shape_cast %538 : vector<16xf32> to vector<16x1xf32>
    %cst_232 = arith.constant 3.200000e+01 : f32
    %540 = vector.broadcast %cst_232 : f32 to vector<16x1xf32>
    %541 = arith.divf %539, %540 : vector<16x1xf32>
    %542 = vector.broadcast %534 : vector<16x1xf32> to vector<16x32xf32>
    %543 = arith.subf %526, %542 : vector<16x32xf32>
    %cst_233 = arith.constant 9.99999997E-7 : f32
    %544 = vector.broadcast %cst_233 : f32 to vector<16x1xf32>
    %545 = arith.addf %541, %544 : vector<16x1xf32>
    %546 = math.rsqrt %545 : vector<16x1xf32>
    %547 = vector.broadcast %546 : vector<16x1xf32> to vector<16x32xf32>
    %548 = arith.mulf %543, %547 : vector<16x32xf32>
    %549 = vector.broadcast %528 : vector<1x32xf32> to vector<16x32xf32>
    %550 = arith.mulf %548, %549 : vector<16x32xf32>
    %551 = vector.broadcast %530 : vector<1x32xf32> to vector<16x32xf32>
    %552 = arith.addf %550, %551 : vector<16x32xf32>
    %c1_234 = arith.constant 1 : index
    %c0_235 = arith.constant 0 : index
    %c0_236 = arith.constant 0 : index
    %553 = vector.load %arg14[%c1_234, %c0_235, %c0_236] : memref<2x32x64xf32, #tpu.memory_space<vmem>>, vector<1x32x64xf32>
    %554 = vector.shape_cast %553 : vector<1x32x64xf32> to vector<32x64xf32>
    %cst_237 = arith.constant dense<0.000000e+00> : vector<16x64xf32>
    %555 = tpu.matmul %552, %554, %cst_237 {dimension_numbers = #tpu.dot_dimension_numbers<[1], [0], [0], [1], [0, 0, 1, 1], [], []>} : vector<16x32xf32>, vector<32x64xf32>, vector<16x64xf32> -> vector<16x64xf32>
    %c1_238 = arith.constant 1 : index
    %c0_239 = arith.constant 0 : index
    %c0_240 = arith.constant 0 : index
    %556 = vector.load %arg15[%c1_238, %c0_239, %c0_240] : memref<2x1x64xf32, #tpu.memory_space<vmem>>, vector<1x1x64xf32>
    %557 = vector.shape_cast %556 : vector<1x1x64xf32> to vector<1x64xf32>
    %558 = vector.broadcast %557 : vector<1x64xf32> to vector<16x64xf32>
    %559 = arith.addf %555, %558 : vector<16x64xf32>
    %cst_241 = arith.constant 0.000000e+00 : f32
    %560 = vector.broadcast %cst_241 : f32 to vector<16x64xf32>
    %561 = arith.maximumf %559, %560 : vector<16x64xf32>
    %c1_242 = arith.constant 1 : index
    %c0_243 = arith.constant 0 : index
    %c0_244 = arith.constant 0 : index
    %562 = vector.load %arg16[%c1_242, %c0_243, %c0_244] : memref<2x64x32xf32, #tpu.memory_space<vmem>>, vector<1x64x32xf32>
    %563 = vector.shape_cast %562 : vector<1x64x32xf32> to vector<64x32xf32>
    %cst_245 = arith.constant dense<0.000000e+00> : vector<16x32xf32>
    %564 = tpu.matmul %561, %563, %cst_245 {dimension_numbers = #tpu.dot_dimension_numbers<[1], [0], [0], [1], [0, 0, 1, 1], [], []>} : vector<16x64xf32>, vector<64x32xf32>, vector<16x32xf32> -> vector<16x32xf32>
    %c1_246 = arith.constant 1 : index
    %c0_247 = arith.constant 0 : index
    %c0_248 = arith.constant 0 : index
    %565 = vector.load %arg17[%c1_246, %c0_247, %c0_248] : memref<2x1x32xf32, #tpu.memory_space<vmem>>, vector<1x1x32xf32>
    %566 = vector.shape_cast %565 : vector<1x1x32xf32> to vector<1x32xf32>
    %567 = vector.broadcast %566 : vector<1x32xf32> to vector<16x32xf32>
    %568 = arith.addf %564, %567 : vector<16x32xf32>
    %569 = arith.addf %568, %552 : vector<16x32xf32>
    %c1_249 = arith.constant 1 : index
    %c2_250 = arith.constant 2 : index
    %c0_251 = arith.constant 0 : index
    %c0_252 = arith.constant 0 : index
    %570 = vector.load %arg18[%c1_249, %c2_250, %c0_251, %c0_252] : memref<2x3x1x32xf32, #tpu.memory_space<vmem>>, vector<1x1x1x32xf32>
    %571 = vector.shape_cast %570 : vector<1x1x1x32xf32> to vector<1x32xf32>
    %c1_253 = arith.constant 1 : index
    %c2_254 = arith.constant 2 : index
    %c0_255 = arith.constant 0 : index
    %c0_256 = arith.constant 0 : index
    %572 = vector.load %arg19[%c1_253, %c2_254, %c0_255, %c0_256] : memref<2x3x1x32xf32, #tpu.memory_space<vmem>>, vector<1x1x1x32xf32>
    %573 = vector.shape_cast %572 : vector<1x1x1x32xf32> to vector<1x32xf32>
    %cst_257 = arith.constant dense<0.000000e+00> : vector<16xf32>
    %574 = vector.multi_reduction <add>, %569, %cst_257 [1] : vector<16x32xf32> to vector<16xf32>
    %575 = vector.shape_cast %574 : vector<16xf32> to vector<16x1xf32>
    %cst_258 = arith.constant 3.200000e+01 : f32
    %576 = vector.broadcast %cst_258 : f32 to vector<16x1xf32>
    %577 = arith.divf %575, %576 : vector<16x1xf32>
    %578 = vector.broadcast %577 : vector<16x1xf32> to vector<16x32xf32>
    %579 = arith.subf %569, %578 : vector<16x32xf32>
    %580 = arith.mulf %579, %579 : vector<16x32xf32>
    %cst_259 = arith.constant dense<0.000000e+00> : vector<16xf32>
    %581 = vector.multi_reduction <add>, %580, %cst_259 [1] : vector<16x32xf32> to vector<16xf32>
    %582 = vector.shape_cast %581 : vector<16xf32> to vector<16x1xf32>
    %cst_260 = arith.constant 3.200000e+01 : f32
    %583 = vector.broadcast %cst_260 : f32 to vector<16x1xf32>
    %584 = arith.divf %582, %583 : vector<16x1xf32>
    %585 = vector.broadcast %577 : vector<16x1xf32> to vector<16x32xf32>
    %586 = arith.subf %569, %585 : vector<16x32xf32>
    %cst_261 = arith.constant 9.99999997E-7 : f32
    %587 = vector.broadcast %cst_261 : f32 to vector<16x1xf32>
    %588 = arith.addf %584, %587 : vector<16x1xf32>
    %589 = math.rsqrt %588 : vector<16x1xf32>
    %590 = vector.broadcast %589 : vector<16x1xf32> to vector<16x32xf32>
    %591 = arith.mulf %586, %590 : vector<16x32xf32>
    %592 = vector.broadcast %571 : vector<1x32xf32> to vector<16x32xf32>
    %593 = arith.mulf %591, %592 : vector<16x32xf32>
    %594 = vector.broadcast %573 : vector<1x32xf32> to vector<16x32xf32>
    %595 = arith.addf %593, %594 : vector<16x32xf32>
    %c0_262 = arith.constant 0 : index
    %c0_263 = arith.constant 0 : index
    %596 = vector.load %arg20[%c0_262, %c0_263] : memref<16x32xf32, #tpu.memory_space<vmem>>, vector<16x32xf32>
    tpu.vector_store %arg20[%c0_262, %c0_263], %595 {strides = array<i32>} : memref<16x32xf32, #tpu.memory_space<vmem>>, vector<16x32xf32>,
    %597 = tpu.concatenate %95, %388, %223, %516 in 2 : vector<2x8x32xf32>, vector<2x8x32xf32>, vector<2x8x32xf32>, vector<2x8x32xf32> -> vector<2x8x128xf32>
    %c0_264 = arith.constant 0 : index
    %c0_265 = arith.constant 0 : index
    %c0_266 = arith.constant 0 : index
    %598 = vector.load %arg21[%c0_264, %c0_265, %c0_266] : memref<2x8x128xf32, #tpu.memory_space<vmem>>, vector<2x8x128xf32>
    tpu.vector_store %arg21[%c0_264, %c0_265, %c0_266], %597 {strides = array<i32>} : memref<2x8x128xf32, #tpu.memory_space<vmem>>, vector<2x8x128xf32>,
    return
  }
}

</mosaic_0001>

<bundles_post_ra>
// kernel: tpu_custom_call.1
= control target key start
LH: loop header
LB: loop body
LE: loop exit
PB: predicated region body
PF: predicated region fallthrough
CT: control target
= control target key end

     0   :  { %s5557_s0 = inlined_call_operand.hbm [shape: f32[16,32], index: 0, kind: input, shape index: {}]   ;;  %s5558_s1 = inlined_call_operand.hbm [shape: f32[16,32], index: 1, kind: input, shape index: {}]   ;;  %s5559_s2 = inlined_call_operand.hbm [shape: f32[8,8], index: 2, kind: input, shape index: {}]   ;;  %s5560_s3 = inlined_call_operand.vmem [shape: f32[2,8], index: 3, kind: input, shape index: {}]   ;;  %s5561_s4 = inlined_call_operand.vmem [shape: f32[2,32,96], index: 4, kind: input, shape index: {}]   ;;  %s5562_s5 = inlined_call_operand.hbm [shape: f32[2,1,96], index: 5, kind: input, shape index: {}]   ;;  %s5563_s6 = inlined_call_operand.vmem [shape: f32[2,32,32], index: 6, kind: input, shape index: {}]   ;;  %s5564_s7 = inlined_call_operand.hbm [shape: f32[2,1,32], index: 7, kind: input, shape index: {}]   ;;  %s5565_s8 = inlined_call_operand.vmem [shape: f32[2,32,32], index: 8, kind: input, shape index: {}]   ;;  %s5566_s9 = inlined_call_operand.hbm [shape: f32[2,1,32], index: 9, kind: input, shape index: {}]   ;;  %s5567_s10 = inlined_call_operand.hbm [shape: f32[2,32,64], index: 10, kind: input, shape index: {}]   ;;  %s5568_s11 = inlined_call_operand.hbm [shape: f32[2,1,64], index: 11, kind: input, shape index: {}]   ;;  %s5569_s12 = inlined_call_operand.hbm [shape: f32[2,32,32], index: 12, kind: input, shape index: {}]   ;;  %s5570_s13 = inlined_call_operand.hbm [shape: f32[2,1,32], index: 13, kind: input, shape index: {}]   ;;  %s5571_s14 = inlined_call_operand.hbm [shape: f32[2,32,64], index: 14, kind: input, shape index: {}]   ;;  %s5572_s15 = inlined_call_operand.hbm [shape: f32[2,1,64], index: 15, kind: input, shape index: {}]   ;;  %s5573_s16 = inlined_call_operand.vmem [shape: f32[2,64,32], index: 16, kind: input, shape index: {}]   ;;  %s5574_s17 = inlined_call_operand.hbm [shape: f32[2,1,32], index: 17, kind: input, shape index: {}]   ;;  %s5575_s18 = inlined_call_operand.vmem [shape: f32[2,3,1,32], index: 18, kind: input, shape index: {}]   ;;  %s5576_s19 = inlined_call_operand.vmem [shape: f32[2,3,1,32], index: 19, kind: input, shape index: {}]   ;;  %s5577_s20 = inlined_call_operand.hbm [shape: f32[16,32], index: 20, kind: output, shape index: {0}]   ;;  %s5578_s21 = inlined_call_operand.hbm [shape: f32[2,8,128], index: 21, kind: output, shape index: {1}]  }
   0x1   :  { %5582 = sst [smem:[#allocation35_spill]] %s5557_s0 }
   0x2   :  { %5583 = sst [smem:[#allocation36_spill]] %s5558_s1 }
   0x3   :  { %5584 = sst [smem:[#allocation37_spill]] %s5559_s2 }
   0x4   :  { %5585 = sst [smem:[#allocation38_spill]] %s5560_s3 }
   0x5   :  { %5586 = sst [smem:[#allocation39_spill]] %s5561_s4 }
   0x6   :  { %5587 = sst [smem:[#allocation40_spill]] %s5562_s5 }
   0x7   :  { %27 = vsyncpa [#allocation3], 0 }
   0x8   :  { %28 = vsyncpa [#allocation6], 0 }
   0x9   :  { %29 = vsyncpa [#allocation9], 0 }
   0xa   :  { %30 = vsyncpa [#allocation12], 0 }
   0xb   :  { %31 = vsyncpa [#allocation15], 0 }
   0xc   :  { %32 = vsyncpa [#allocation18], 0 }
   0xd   :  { %33 = vsyncpa [#allocation21], 0 }
   0xe   :  { %34 = vsyncpa [#allocation4], 0 }
   0xf   :  { %35 = vsyncpa [#allocation25], 0  ;;  %s5588_s26 = sld [smem:[#allocation36_spill]]  ;;  %s4418_s3 = smov [#allocation5]  }
  0x10   :  { %s55_s28 = sshll.u32 %s4418_s3, 4  ;;  %s5589_s4 = sld [smem:[#allocation40_spill]]  ;;  %s56_s28 = int_to_ptr.vmem [resolvable:$true] %s55_s28 }
  0x11   :  { %s5580_s5 = smov 128   ;;  %s4420_s22 = smov 8  }
  0x12   :  { %s4421_s23 = smov [#allocation8]   ;;  %s4422_s24 = smov 16  }
  0x13   :  { %s83_s1 = sshll.u32 %s4421_s23, 4  ;;  %s4423_s2 = smov 1   ;;  %s84_s1 = int_to_ptr.vmem [resolvable:$true] %s83_s1 }
  0x14   :  { %s111_s3 = sshll.u32 %s5566_s9, 4  ;;  %s4424_s29 = smov [#allocation11]   ;;  %s112_s3 = int_to_ptr.hbm [resolvable:$true] %s111_s3 }
  0x15   :  { %s53_s27 = sshll.u32 %s5588_s26, 4  ;;  %s113_s0 = sshll.u32 %s4424_s29, 4  ;;  %s54_s27 = int_to_ptr.hbm [resolvable:$true] %s53_s27  ;;  %s114_s0 = int_to_ptr.vmem [resolvable:$true] %s113_s0 }
  0x16   :  { %s81_s30 = sshll.u32 %s5589_s4, 4  ;;  %s4425_s23 = smov [#allocation14]   ;;  %s82_s30 = int_to_ptr.hbm [resolvable:$true] %s81_s30 }
  0x17   :  { %61 = dma.hbm_to_vmem [thread:$0]  %s54_s27, 256, %s56_s28, [#allocation6], %s5580_s5, %s5580_s5, %s4420_s22  }
  0x18   :  { %89 = dma.hbm_to_vmem [thread:$0]  %s82_s30, 32, %s84_s1, [#allocation9], %s4422_s24, %s4422_s24, %s4423_s2  }
  0x19   :  { %s137_s28 = sshll.u32 %s5568_s11, 4  ;;  %s139_s5 = sshll.u32 %s4425_s23, 4  ;;  %s138_s28 = int_to_ptr.hbm [resolvable:$true] %s137_s28  ;;  %s140_s5 = int_to_ptr.vmem [resolvable:$true] %s139_s5 }
  0x1a   :  { %119 = dma.hbm_to_vmem [thread:$0]  %s112_s3, 32, %s114_s0, [#allocation12], %s4422_s24, %s4422_s24, %s4423_s2  }
  0x1b   :  { %s163_s25 = sshll.u32 %s5570_s13, 4  ;;  %s189_s11 = sshll.u32 %s5572_s15, 4  ;;  %s164_s25 = int_to_ptr.hbm [resolvable:$true] %s163_s25  ;;  %s190_s11 = int_to_ptr.hbm [resolvable:$true] %s189_s11 }
  0x1c   :  { %145 = dma.hbm_to_vmem [thread:$0]  %s138_s28, 32, %s140_s5, [#allocation15], %s4422_s24, %s4422_s24, %s4423_s2  }
  0x1d   :  { %s4426_s29 = smov [#allocation17]   ;;  %s4427_s3 = smov [#allocation20]  }
  0x1e   :  { %s165_s4 = sshll.u32 %s4426_s29, 4  ;;  %s191_s13 = sshll.u32 %s4427_s3, 4  ;;  %s166_s4 = int_to_ptr.vmem [resolvable:$true] %s165_s4  ;;  %s192_s13 = int_to_ptr.vmem [resolvable:$true] %s191_s13 }
  0x1f   :  { %171 = dma.hbm_to_vmem [thread:$0]  %s164_s25, 32, %s166_s4, [#allocation18], %s4422_s24, %s4422_s24, %s4423_s2  }
  0x20   :  { %s5590_s23 = sld [smem:[#allocation35_spill]]  ;;  %s4428_s9 = smov [#allocation2]  }
  0x21   :  { %197 = dma.hbm_to_vmem [thread:$0]  %s190_s11, 32, %s192_s13, [#allocation21], %s4422_s24, %s4422_s24, %s4423_s2  }
  0x22   :  { %s5591_s28 = sld [smem:[#allocation37_spill]]  ;;  %s42_s26 = sshll.u32 %s4428_s9, 4  ;;  %s43_s26 = int_to_ptr.vmem [resolvable:$true] %s42_s26 }
  0x23   :  { %s5592_s25 = smov 128   ;;  %s4429_s29 = smov [#allocation7]  }
  0x24   :  { %s69_s4 = sshll.u32 %s4429_s29, 4  ;;  %s96_s27 = sshll.u32 %s5564_s7, 4  ;;  %s70_s4 = int_to_ptr.vmem [resolvable:$true] %s69_s4  ;;  %s97_s27 = int_to_ptr.hbm [resolvable:$true] %s96_s27 }
  0x25   :  { %s4430_s15 = smov [#allocation10]   ;;  %s150_s7 = sshll.u32 %s5569_s12, 4  ;;  %s151_s7 = int_to_ptr.hbm [resolvable:$true] %s150_s7 }
  0x26   :  { %s40_s30 = sshll.u32 %s5590_s23, 4  ;;  %s124_s23 = sshll.u32 %s5567_s10, 4  ;;  %s41_s30 = int_to_ptr.hbm [resolvable:$true] %s40_s30  ;;  %s125_s23 = int_to_ptr.hbm [resolvable:$true] %s124_s23 }
  0x27   :  { %48 = dma.hbm_to_vmem [thread:$0]  %s41_s30, 256, %s43_s26, [#allocation3], %s5592_s25, %s5592_s25, %s4420_s22  }
  0x28   :  { %s67_s1 = sshll.u32 %s5591_s28, 4  ;;  %s98_s5 = sshll.u32 %s4430_s15, 4  ;;  %s68_s1 = int_to_ptr.hbm [resolvable:$true] %s67_s1  ;;  %s99_s5 = int_to_ptr.vmem [resolvable:$true] %s98_s5 }
  0x29   :  { %72 = dma.hbm_to_vmem [thread:$0]  %s68_s1, 128, %s70_s4, [#allocation6]  }
  0x2a   :  { %104 = dma.hbm_to_vmem [thread:$0]  %s97_s27, 32, %s99_s5, [#allocation9], %s4422_s24, %s4422_s24, %s4423_s2  }
  0x2b   :  { %s4431_s30 = smov [#allocation13]   ;;  %s176_s29 = sshll.u32 %s5571_s14, 4  ;;  %s177_s29 = int_to_ptr.hbm [resolvable:$true] %s176_s29 }
  0x2c   :  { %s126_s28 = sshll.u32 %s4431_s30, 4  ;;  %s4432_s4 = smov [#allocation16]   ;;  %s127_s28 = int_to_ptr.vmem [resolvable:$true] %s126_s28 }
  0x2d   :  { %132 = dma.hbm_to_vmem [thread:$0]  %s125_s23, 1024, %s127_s28, [#allocation12], %s5592_s25, %s5592_s25, %s4420_s22  }
  0x2e   :  { %s152_s3 = sshll.u32 %s4432_s4, 4  ;;  %s4433_s0 = smov [#allocation19]   ;;  %s153_s3 = int_to_ptr.vmem [resolvable:$true] %s152_s3 }
  0x2f   :  { %158 = dma.hbm_to_vmem [thread:$0]  %s151_s7, 1024, %s153_s3, [#allocation15], %s5592_s25, %s5592_s25, %s4420_s22  }
  0x30   :  { %s178_s12 = sshll.u32 %s4433_s0, 4  ;;  %s204_s13 = sshll.u32 %s5574_s17, 4  ;;  %s179_s12 = int_to_ptr.vmem [resolvable:$true] %s178_s12  ;;  %s205_s13 = int_to_ptr.hbm [resolvable:$true] %s204_s13 }
  0x31   :  { %184 = dma.hbm_to_vmem [thread:$0]  %s177_s29, 1024, %s179_s12, [#allocation18], %s5592_s25, %s5592_s25, %s4420_s22  }
  0x32   :  { %s4434_s14 = smov [#allocation22]  }
  0x33   :  { %s206_s23 = sshll.u32 %s4434_s14, 4  ;;  %s207_s23 = int_to_ptr.vmem [resolvable:$true] %s206_s23 }
  0x34   :  { %212 = dma.hbm_to_vmem [thread:$0]  %s205_s13, 32, %s207_s23, [#allocation21], %s4422_s24, %s4422_s24, %s4423_s2  }
  0x35   :  { %4400 = dma.done.wait [#allocation3], 256  }
  0x36   :  { %4401 = vsyncadd [#allocation3], 4294967040 }
  0x37   :  { %4402 = dma.done.wait [#allocation6], 384  }
  0x38   :  { %4403 = vsyncadd [#allocation6], 4294966912 }
  0x39   :  { %4404 = dma.done.wait [#allocation9], 64  }
  0x3a   :  { %4405 = vsyncadd [#allocation9], 4294967232 }
  0x3b   :  { %4406 = dma.done.wait [#allocation12], 1056  }
  0x3c   :  { %4407 = vsyncadd [#allocation12], 4294966240 }
  0x3d   :  { %4408 = dma.done.wait [#allocation15], 1056  }
  0x3e   :  { %4409 = vsyncadd [#allocation15], 4294966240 }
  0x3f   :  { %4410 = dma.done.wait [#allocation18], 1056  }
  0x40   :  { %4411 = vsyncadd [#allocation18], 4294966240 }
  0x41   :  { %4412 = dma.done.wait [#allocation21], 64  }
  0x42   :  { %4413 = vsyncadd [#allocation21], 4294967232  ;;  %s5593_s5 = sld [smem:[#allocation39_spill]]  ;;  %vm289_vm0 = vcmask 261120   ;;  %v4648_v4 = vld [vmem:[#allocation2] sm:$0xff]  ;;  %v4652_v5 = vld [vmem:[#allocation2 + $0x8] sm:$0xff] }
  0x43   :  { %v3857_v6 = vld [vmem:[#allocation8] ss:$0 sm:$0xff]  ;;  %s4435_s10 = smov 88   ;;  %s4436_s1 = smov 96   ;;  %vm322_vm1 = vcmask 64512   ;;  %v273_v30 = vld [vmem:[#allocation7] sm:$0xff] }
  0x44   :  { %s4437_s29 = smov 80   ;;  %s4438_s4 = smov 120   ;;  %vm874_vm2 = vcmask 130048   ;;  %vm877_vm3 = vcmask 195584  }
  0x45   :  { %s4439_s3 = smov 72   ;;  %s4440_s0 = smov 112  }
  0x46   :  { %s4441_s12 = smov 104   ;;  %s4442_s27 = smov 64  }
  0x47   :  { %s4443_s11 = smov 48   ;;  %s4444_s13 = smov 56  }
  0x48   :  { %v284_v0 = vld [vmem:[%s5593_s5 + $0x18] sm:$0xff]  ;;  %v283_v1 = vld [vmem:[%s5593_s5 + $0x10] sm:$0xff]  ;;  %v282_v2 = vld [vmem:[%s5593_s5 + $0x8] sm:$0xff]  ;;  %s4445_s14 = smov 40   ;;  %s4446_s23 = smov 24  }
  0x49   :  { %308 = vmatpush.msra.mxu0 %v284_v0  ;;  %v281_v3 = vld [vmem:[%s5593_s5] sm:$0xff]  ;;  %s5594_s26 = sld [smem:[#allocation38_spill]]  ;;  %s3578_s30 = sshll.u32 %s5577_s20, 4  ;;  %s3579_s30 = int_to_ptr.hbm [resolvable:$true] %s3578_s30 }
  0x4b   :  { %309 = vmatpush.msra.mxu0 %v283_v1 }
  0x4d   :  { %310 = vmatpush.msra.mxu0 %v282_v2 }
  0x4f   :  { %311 = vmatpush.msra.mxu0 %v281_v3 }
  0x50   :  { %3615 = vmatmul.msk.f32.vlgmr.msra.gmra.mxu0 %vm289_vm0, %v4648_v4 }
  0x58   :  { %3616 = vmatmul.msk.f32.gmra.mxu0 %vm289_vm0, %v4652_v5 }
  0xcd   :  { %v313_v7 = vpop.f32.mrf.mxu0 }
  0xce   :  { %v4656_v8 = vadd.f32 %v3857_v6, %v313_v7 }
  0xd0   :  { %454 = vrot.lane.b32.xlu2 %v4656_v8, %s4435_s10  ;;  %320 = vrot.lane.b32.xlu0 %v4656_v8, %s4436_s1 }
  0xd5   :  { %v316_v9 = vpop.f32.mrf.mxu0 }
  0xd6   :  { %v4662_v10 = vadd.f32 %v3857_v6, %v316_v9 }
  0xd8   :  { %482 = vrot.lane.b32.xlu1 %v4662_v10, %s4435_s10  ;;  %588 = vrot.lane.b32.xlu2 %v4656_v8, %s4437_s29  ;;  %v3802_v11 = vpack.i.bf16 %v4662_v10, %v4656_v8 }
  0xd9   :  { %348 = vrot.lane.b32.xlu0 %v4662_v10, %s4436_s1 }
  0xe0   :  { %480 = vrot.lane.b32.xlu1 %v4662_v10, %s4438_s4  ;;  %722 = vrot.lane.b32.xlu2 %v4656_v8, %s4439_s3 }
  0xe1   :  { %452 = vrot.lane.b32.xlu0 %v4656_v8, %s4438_s4 }
  0xe8   :  { %586 = vrot.lane.b32.xlu1 %v4656_v8, %s4440_s0  ;;  %614 = vrot.lane.b32.xlu2 %v4662_v10, %s4440_s0 }
  0xe9   :  { %720 = vrot.lane.b32.xlu0 %v4656_v8, %s4441_s12 }
  0xf0   :  { %616 = vrot.lane.b32.xlu1 %v4662_v10, %s4437_s29  ;;  %3803 = vrot.lane.b32.xlu2 %v3802_v11, %s4442_s27 }
  0xf1   :  { %750 = vrot.lane.b32.xlu0 %v4662_v10, %s4439_s3 }
  0xf8   :  { %748 = vrot.lane.b32.xlu1 %v4662_v10, %s4441_s12 }
 0x12a   :  { %v455_v12 = vpop.permute.xlu2 %454 }
 0x132   :  { %v589_v13 = vpop.permute.xlu2 %588 }
 0x13a   :  { %v723_v14 = vpop.permute.xlu2 %722 }
 0x142   :  { %v615_v15 = vpop.permute.xlu2 %614  ;;  %v321_v16 = vpop.permute.xlu0 %320 }
 0x143   :  { %3617 = vmatpush.xpose.msk.msra.mxu1 %vm322_vm1, %v321_v16 }
 0x146   :  { %3618 = vmatmul.msk.f32.vlgmr.msra.gmra.mxu1 %vm322_vm1, %v4656_v8 }
 0x147   :  { %3623 = vmatpush.xpose.msk.msrb.mxu1 %vm322_vm1, %v455_v12 }
 0x14a   :  { %v483_v17 = vpop.permute.xlu1 %482  ;;  %v3804_v18 = vpop.permute.xlu2 %3803 }
 0x14b   :  { %v349_v19 = vpop.permute.xlu0 %348  ;;  %v3805_v20 = vunpack.i.l.bf16 %v3804_v18  ;;  %v3806_v21 = vunpack.i.h.bf16 %v3804_v18 }
 0x14c   :  { %3619 = vmatpush.xpose.msk.msra.mxu2 %vm322_vm1, %v349_v19 }
 0x14d   :  { %421 = vmatpush.msra.mxu3 %v3805_v20 }
 0x14f   :  { %447 = vmatpush.msrb.mxu3 %v3806_v21  ;;  %3620 = vmatmul.msk.f32.vlgmr.msra.gmra.mxu2 %vm322_vm1, %v4662_v10 }
 0x150   :  { %3625 = vmatpush.xpose.msk.msrb.mxu2 %vm322_vm1, %v483_v17 }
 0x152   :  { %v481_v22 = vpop.permute.xlu1 %480 }
 0x153   :  { %v453_v23 = vpop.permute.xlu0 %452 }
 0x154   :  { %3629 = vmatpush.xpose.msk.msra.mxu2 %vm322_vm1, %v589_v13  ;;  %3624 = vmatmul.msk.f32.vlgmr.msrb.gmra.mxu1 %vm322_vm1, %v453_v23 }
 0x157   :  { %3626 = vmatmul.msk.f32.vlgmr.msrb.gmra.mxu2 %vm322_vm1, %v481_v22 }
 0x158   :  { %3635 = vmatpush.xpose.msk.msrb.mxu2 %vm322_vm1, %v723_v14 }
 0x15a   :  { %v587_v24 = vpop.permute.xlu1 %586 }
 0x15b   :  { %v721_v25 = vpop.permute.xlu0 %720 }
 0x15f   :  { %3630 = vmatmul.msk.f32.vlgmr.msra.gmra.mxu2 %vm322_vm1, %v587_v24 }
 0x162   :  { %v617_v26 = vpop.permute.xlu1 %616 }
 0x163   :  { %v751_v27 = vpop.permute.xlu0 %750  ;;  %3631 = vmatpush.xpose.msk.msrb.mxu0 %vm322_vm1, %v617_v26 }
 0x166   :  { %3632 = vmatmul.msk.f32.vlgmr.msrb.gmra.mxu0 %vm322_vm1, %v615_v15 }
 0x167   :  { %3637 = vmatpush.xpose.msk.msra.mxu0 %vm322_vm1, %v751_v27  ;;  %3636 = vmatmul.msk.f32.vlgmr.msrb.gmra.mxu2 %vm322_vm1, %v721_v25 }
 0x16a   :  { %v749_v28 = vpop.permute.xlu1 %748 }
 0x16e   :  { %3638 = vmatmul.msk.f32.vlgmr.msra.gmra.mxu0 %vm322_vm1, %v749_v28 }
 0x1c3   :  { %v344_v29 = vpop.f32.mrf.mxu1 }
 0x1c4   :  { %v374_v31 = vmul.f32 0.35355338, %v344_v29 }
 0x1c6   :  { %v376_v32 = vadd.f32 %v374_v31, %v273_v30 }
 0x1c8   :  { %v378_v33 = vsel %vm322_vm1, %v376_v32, -inf }
 0x1c9   :  { %379 = vmax.xlane.f32.xlu2 %v378_v33 }
 0x1d1   :  { %v477_v34 = vpop.f32.mrf.mxu1 }
 0x1d2   :  { %v508_v35 = vmul.f32 0.35355338, %v477_v34  ;;  %v371_v36 = vpop.f32.mrf.mxu2 }
 0x1d3   :  { %v375_v37 = vmul.f32 0.35355338, %v371_v36 }
 0x1d4   :  { %v510_v38 = vadd.f32 %v508_v35, %v273_v30 }
 0x1d5   :  { %v377_v39 = vadd.f32 %v375_v37, %v273_v30 }
 0x1d6   :  { %v512_v40 = vsel %vm322_vm1, %v510_v38, -inf }
 0x1d7   :  { %513 = vmax.xlane.f32.xlu1 %v512_v40  ;;  %v381_v41 = vsel %vm322_vm1, %v377_v39, -inf }
 0x1d8   :  { %382 = vmax.xlane.f32.xlu0 %v381_v41 }
 0x1da   :  { %v505_v42 = vpop.f32.mrf.mxu2 }
 0x1db   :  { %v509_v58 = vmul.f32 0.35355338, %v505_v42 }
 0x1dd   :  { %v511_v60 = vadd.f32 %v509_v58, %v273_v30 }
 0x1df   :  { %v515_v61 = vsel %vm322_vm1, %v511_v60, -inf }
 0x1e2   :  { %v611_v43 = vpop.f32.mrf.mxu2 }
 0x1e3   :  { %v642_v44 = vmul.f32 0.35355338, %v611_v43  ;;  %v639_v45 = vpop.f32.mrf.mxu0 }
 0x1e4   :  { %v643_v46 = vmul.f32 0.35355338, %v639_v45 }
 0x1e5   :  { %v644_v47 = vadd.f32 %v642_v44, %v273_v30 }
 0x1e6   :  { %v4712_v48 = vadd.f32 %v643_v46, %v273_v30 }
 0x1e7   :  { %v646_v49 = vsel %vm322_vm1, %v644_v47, -inf }
 0x1e8   :  { %647 = vmax.xlane.f32.xlu2 %v646_v49  ;;  %v649_v50 = vsel %vm322_vm1, %v4712_v48, -inf }
 0x1e9   :  { %650 = vmax.xlane.f32.xlu1 %v649_v50 }
 0x1ea   :  { %v745_v51 = vpop.f32.mrf.mxu2 }
 0x1eb   :  { %v776_v52 = vmul.f32 0.35355338, %v745_v51  ;;  %v773_v53 = vpop.f32.mrf.mxu0 }
 0x1ec   :  { %v777_v54 = vmul.f32 0.35355338, %v773_v53 }
 0x1ed   :  { %v778_v55 = vadd.f32 %v776_v52, %v273_v30 }
 0x1ee   :  { %v4717_v56 = vadd.f32 %v777_v54, %v273_v30 }
 0x1ef   :  { %v780_v57 = vsel %vm322_vm1, %v778_v55, -inf }
 0x1f0   :  { %781 = vmax.xlane.f32.xlu2 %v780_v57  ;;  %v783_v59 = vsel %vm322_vm1, %v4717_v56, -inf }
 0x1f1   :  { %784 = vmax.xlane.f32.xlu0 %v783_v59 }
 0x1f9   :  { %516 = vmax.xlane.f32.xlu0 %v515_v61 }
 0x202   :  { %668 = vrot.lane.b32.xlu1 %v4656_v8, %s4443_s11 }
 0x20d   :  { %534 = vrot.lane.b32.xlu0 %v4656_v8, %s4444_s13 }
 0x23c   :  { %v380_v62 = vpop.xlane.xlu2 %379 }
 0x23d   :  { %v384_v63 = vsub.f32 %v376_v32, %v380_v62 }
 0x23f   :  { %v386_v0 = vmul.f32 1.442695, %v384_v63 }
 0x241   :  { %3883 = vpow2.f32 %v386_v0 }
 0x247   :  { %v3884_v1 = vpop.eup %3883 }
 0x248   :  { %v390_v2 = vsel %vm322_vm1, %v3884_v1, 0.0 }
 0x249   :  { %391 = vadd.xlane.f32.xlu2 %v390_v2 }
 0x24a   :  { %v514_v3 = vpop.xlane.xlu1 %513 }
 0x24b   :  { %v518_v6 = vsub.f32 %v510_v38, %v514_v3  ;;  %v383_v7 = vpop.xlane.xlu0 %382 }
 0x24c   :  { %v385_v9 = vsub.f32 %v377_v39, %v383_v7 }
 0x24d   :  { %v520_v11 = vmul.f32 1.442695, %v518_v6 }
 0x24e   :  { %v388_v12 = vmul.f32 1.442695, %v385_v9 }
 0x24f   :  { %3885 = vpow2.f32 %v520_v11 }
 0x250   :  { %3887 = vpow2.f32 %v388_v12 }
 0x255   :  { %v4728_v13 = vpop.eup %3885 }
 0x256   :  { %v3888_v14 = vpop.eup %3887  ;;  %v524_v15 = vsel %vm322_vm1, %v4728_v13, 0.0 }
 0x257   :  { %525 = vadd.xlane.f32.xlu0 %v524_v15  ;;  %v393_v16 = vsel %vm322_vm1, %v3888_v14, 0.0 }
 0x258   :  { %394 = vadd.xlane.f32.xlu1 %v393_v16 }
 0x25b   :  { %v648_v17 = vpop.xlane.xlu2 %647 }
 0x25c   :  { %v652_v18 = vsub.f32 %v644_v47, %v648_v17  ;;  %v651_v31 = vpop.xlane.xlu1 %650 }
 0x25e   :  { %v654_v19 = vmul.f32 1.442695, %v652_v18  ;;  %v913_v18 = vld [vmem:[%s5563_s6 + $0x18] sm:$0xff] }
 0x25f   :  { %936 = vmatpush.msra.mxu2 %v913_v18 }
 0x260   :  { %3889 = vpow2.f32 %v654_v19  ;;  %v912_v19 = vld [vmem:[%s5563_s6 + $0x10] sm:$0xff] }
 0x261   :  { %802 = vrot.lane.b32.xlu2 %v4656_v8, %s4445_s14  ;;  %v653_v8 = vsub.f32 %v4712_v48, %v651_v31  ;;  %937 = vmatpush.msra.mxu2 %v912_v19 }
 0x263   :  { %v782_v20 = vpop.xlane.xlu2 %781  ;;  %v656_v34 = vmul.f32 1.442695, %v653_v8 }
 0x264   :  { %v786_v21 = vsub.f32 %v778_v55, %v782_v20  ;;  %v785_v22 = vpop.xlane.xlu0 %784  ;;  %v911_v20 = vld [vmem:[%s5563_s6 + $0x8] sm:$0xff] }
 0x265   :  { %v787_v37 = vsub.f32 %v4717_v56, %v785_v22  ;;  %938 = vmatpush.msra.mxu2 %v911_v20 }
 0x266   :  { %v3890_v23 = vpop.eup %3889  ;;  %v788_v24 = vmul.f32 1.442695, %v786_v21  ;;  %v910_v21 = vld [vmem:[%s5563_s6] sm:$0xff] }
 0x267   :  { %v658_v25 = vsel %vm322_vm1, %v3890_v23, 0.0  ;;  %v790_v38 = vmul.f32 1.442695, %v787_v37  ;;  %939 = vmatpush.msra.mxu2 %v910_v21 }
 0x268   :  { %3891 = vpow2.f32 %v788_v24  ;;  %659 = vadd.xlane.f32.xlu1 %v658_v25 }
 0x26c   :  { %v517_v26 = vpop.xlane.xlu0 %516 }
 0x26d   :  { %v519_v27 = vsub.f32 %v511_v60, %v517_v26 }
 0x26e   :  { %v3892_v28 = vpop.eup %3891 }
 0x26f   :  { %v522_v29 = vmul.f32 1.442695, %v519_v27  ;;  %v792_v30 = vsel %vm322_vm1, %v3892_v28, 0.0 }
 0x270   :  { %793 = vadd.xlane.f32.xlu1 %v792_v30 }
 0x271   :  { %3893 = vpow2.f32 %v522_v29 }
 0x272   :  { %3895 = vpow2.f32 %v656_v34 }
 0x273   :  { %3897 = vpow2.f32 %v790_v38 }
 0x274   :  { %v669_v43 = vpop.permute.xlu1 %668 }
 0x277   :  { %v3894_v32 = vpop.eup %3893 }
 0x278   :  { %v527_v33 = vsel %vm322_vm1, %v3894_v32, 0.0  ;;  %v3896_v35 = vpop.eup %3895 }
 0x279   :  { %528 = vadd.xlane.f32.xlu0 %v527_v33  ;;  %v661_v36 = vsel %vm322_vm1, %v3896_v35, 0.0  ;;  %v3898_v39 = vpop.eup %3897  ;;  %v3858_v33 = vld [vmem:[#allocation10] ss:$0 sm:$0xff] }
 0x27a   :  { %v795_v40 = vsel %vm322_vm1, %v3898_v39, 0.0 }
 0x27f   :  { %v535_v45 = vpop.permute.xlu0 %534 }
 0x289   :  { %560 = vrot.lane.b32.xlu1 %v4662_v10, %s4444_s13 }
 0x28a   :  { %662 = vadd.xlane.f32.xlu2 %v661_v36 }
 0x28d   :  { %694 = vrot.lane.b32.xlu0 %v4662_v10, %s4443_s11 }
 0x2a2   :  { %828 = vrot.lane.b32.xlu2 %v4662_v10, %s4445_s14 }
 0x2b3   :  { %796 = vadd.xlane.f32.xlu1 %v795_v40 }
 0x2bc   :  { %v392_v41 = vpop.xlane.xlu2 %391 }
 0x2bd   :  { %3899 = vrcp.f32 %v392_v41 }
 0x2c3   :  { %v3900_v42 = vpop.eup %3899 }
 0x2c4   :  { %v4748_v44 = vmul.f32 %v3900_v42, %v3884_v1  ;;  %v803_v52 = vpop.permute.xlu2 %802  ;;  %v4447_v42 = vmov 32.0  }
 0x2c6   :  { %3621 = vmatmul.msk.f32.vlgmr.msra.gmra.mxu3 %vm322_vm1, %v4748_v44 }
 0x2c7   :  { %555 = vmatpush.msra.mxu3 %v535_v45 }
 0x2ca   :  { %v526_v10 = vpop.xlane.xlu0 %525 }
 0x2cb   :  { %v395_v46 = vpop.xlane.xlu1 %394 }
 0x2cc   :  { %3901 = vrcp.f32 %v395_v46 }
 0x2cd   :  { %3903 = vrcp.f32 %v526_v10 }
 0x2d2   :  { %v3902_v47 = vpop.eup %3901 }
 0x2d3   :  { %v4752_v48 = vmul.f32 %v3902_v47, %v3888_v14  ;;  %v3904_v49 = vpop.eup %3903 }
 0x2d4   :  { %v4757_v50 = vmul.f32 %v3904_v49, %v4728_v13 }
 0x2d5   :  { %3622 = vmatmul.msk.f32.vlgmr.msrb.gmra.mxu3 %vm322_vm1, %v4752_v48 }
 0x2d6   :  { %689 = vmatpush.msrb.mxu3 %v669_v43 }
 0x2db   :  { %v660_v51 = vpop.xlane.xlu1 %659 }
 0x2dc   :  { %3905 = vrcp.f32 %v660_v51 }
 0x2dd   :  { %3627 = vmatmul.msk.f32.vlgmr.msra.gmra.mxu3 %vm322_vm1, %v4757_v50 }
 0x2de   :  { %823 = vmatpush.msra.mxu3 %v803_v52 }
 0x2e2   :  { %v3906_v53 = vpop.eup %3905 }
 0x2e3   :  { %v4761_v54 = vmul.f32 %v3906_v53, %v3890_v23  ;;  %v794_v55 = vpop.xlane.xlu1 %793 }
 0x2e4   :  { %3907 = vrcp.f32 %v794_v55 }
 0x2e5   :  { %3633 = vmatmul.msk.f32.vlgmr.msrb.gmra.mxu3 %vm322_vm1, %v4761_v54 }
 0x2ea   :  { %v3908_v56 = vpop.eup %3907 }
 0x2eb   :  { %v4765_v57 = vmul.f32 %v3908_v56, %v3892_v28 }
 0x2ec   :  { %v529_v58 = vpop.xlane.xlu0 %528 }
 0x2ed   :  { %3639 = vmatmul.msk.f32.vlgmr.msra.gmra.mxu3 %vm322_vm1, %v4765_v57  ;;  %3909 = vrcp.f32 %v529_v58 }
 0x2f3   :  { %v3910_v59 = vpop.eup %3909 }
 0x2f4   :  { %v4769_v60 = vmul.f32 %v3910_v59, %v3894_v32 }
 0x2fb   :  { %v561_v61 = vpop.permute.xlu1 %560 }
 0x2fc   :  { %581 = vmatpush.msra.mxu1 %v561_v61 }
 0x2fd   :  { %3628 = vmatmul.msk.f32.vlgmr.msra.gmra.mxu1 %vm322_vm1, %v4769_v60  ;;  %v663_v62 = vpop.xlane.xlu2 %662 }
 0x2fe   :  { %3911 = vrcp.f32 %v663_v62  ;;  %v1052_v62 = vld [vmem:[#allocation13 + $0x18] sm:$0xff] }
 0x2ff   :  { %v695_v63 = vpop.permute.xlu0 %694  ;;  %1075 = vmatpush.msrb.mxu3 %v1052_v62 }
 0x300   :  { %715 = vmatpush.msrb.mxu1 %v695_v63  ;;  %v1051_v63 = vld [vmem:[#allocation13 + $0x10] sm:$0xff] }
 0x301   :  { %1076 = vmatpush.msrb.mxu3 %v1051_v63 }
 0x304   :  { %v3912_v0 = vpop.eup %3911 }
 0x305   :  { %v4773_v1 = vmul.f32 %v3912_v0, %v3896_v35  ;;  %v829_v2 = vpop.permute.xlu2 %828  ;;  %v1050_v0 = vld [vmem:[#allocation13 + $0x8] sm:$0xff] }
 0x306   :  { %849 = vmatpush.msra.mxu1 %v829_v2  ;;  %1077 = vmatpush.msrb.mxu3 %v1050_v0  ;;  %v1049_v2 = vld [vmem:[#allocation13] sm:$0xff] }
 0x307   :  { %3634 = vmatmul.msk.f32.vlgmr.msrb.gmra.mxu1 %vm322_vm1, %v4773_v1 }
 0x308   :  { %1078 = vmatpush.msrb.mxu3 %v1049_v2 }
 0x326   :  { %v797_v3 = vpop.xlane.xlu1 %796 }
 0x327   :  { %3913 = vrcp.f32 %v797_v3  ;;  %v271_v3 = vld [vmem:[#allocation5] sm:$0xff] }
 0x328   :  { %3915 = vrcp.f32 %v4447_v42  ;;  %3645 = vmatmul.msk.f32.vlgmr.msrb.gmra.mxu3 %vm289_vm0, %v271_v3 }
 0x32d   :  { %v3914_v6 = vpop.eup %3913 }
 0x32e   :  { %v4777_v7 = vmul.f32 %v3914_v6, %v3898_v39  ;;  %v3916_v43 = vpop.eup %3915  ;;  %v1015_v6 = vld [vmem:[%s5565_s8 + $0x18] sm:$0xff] }
 0x32f   :  { %v958_v45 = vmul.f32 32.0, %v3916_v43  ;;  %vm962_vm4 = vweird.f32 %v3916_v43  ;;  %1038 = vmatpush.msrb.mxu0 %v1015_v6 }
 0x330   :  { %3640 = vmatmul.msk.f32.vlgmr.msra.gmra.mxu1 %vm322_vm1, %v4777_v7 }
 0x331   :  { %v959_v46 = vsub.f32 1.0, %v958_v45 }
 0x333   :  { %v960_v10 = vmul.f32 %v3916_v43, %v959_v46 }
 0x335   :  { %v961_v47 = vadd.f32 %v3916_v43, %v960_v10  ;;  %v3862_v10 = vld [vmem:[#allocation11] ss:$0 sm:$0xff] }
 0x337   :  { %v4811_v49 = vsel %vm962_vm4, %v3916_v43, %v961_v47 }
 0x349   :  { %v423_v9 = vpop.f32.mrf.mxu3 }
 0x358   :  { %v449_v11 = vpop.f32.mrf.mxu3 }
 0x360   :  { %v557_v12 = vpop.f32.mrf.mxu3 }
 0x361   :  { %882 = vrot.lane.b32.xlu0 %v557_v12, %s4420_s22  ;;  %v1012_v12 = vld [vmem:[%s5565_s8] sm:$0xff] }
 0x368   :  { %v691_v13 = vpop.f32.mrf.mxu3 }
 0x369   :  { %890 = vrot.lane.b32.xlu1 %v691_v13, %s4422_s24  ;;  %v272_v13 = vld [vmem:[#allocation5 + $0x8] sm:$0xff] }
 0x36a   :  { %3646 = vmatmul.msk.f32.gmra.mxu3 %vm289_vm0, %v272_v13 }
 0x370   :  { %v825_v14 = vpop.f32.mrf.mxu3 }
 0x371   :  { %898 = vrot.lane.b32.xlu2 %v825_v14, %s4446_s23 }
 0x37a   :  { %v583_v15 = vpop.f32.mrf.mxu1 }
 0x37b   :  { %884 = vrot.lane.b32.xlu0 %v583_v15, %s4420_s22 }
 0x384   :  { %v717_v16 = vpop.f32.mrf.mxu1 }
 0x385   :  { %892 = vrot.lane.b32.xlu2 %v717_v16, %s4422_s24 }
 0x3ab   :  { %v1080_v42 = vpop.f32.mrf.mxu3 }
 0x3ad   :  { %v851_v17 = vpop.f32.mrf.mxu1 }
 0x3ae   :  { %900 = vrot.lane.b32.xlu0 %v851_v17, %s4446_s23 }
 0x3cb   :  { %v899_v25 = vpop.permute.xlu2 %898 }
 0x3d3   :  { %v883_v22 = vpop.permute.xlu0 %882 }
 0x3d4   :  { %v904_v23 = vsel %vm322_vm1, %v423_v9, %v883_v22  ;;  %v1014_v9 = vld [vmem:[%s5565_s8 + $0x10] sm:$0xff] }
 0x3d5   :  { %1039 = vmatpush.msrb.mxu0 %v1014_v9 }
 0x3db   :  { %v891_v24 = vpop.permute.xlu1 %890 }
 0x3dc   :  { %v906_v26 = vsel %vm874_vm2, %v904_v23, %v891_v24  ;;  %v3859_v23 = vld [vmem:[%s5575_s18] ss:$0 sm:$0xff] }
 0x3dd   :  { %v908_v27 = vsel %vm877_vm3, %v906_v26, %v899_v25  ;;  %v3860_v26 = vld [vmem:[%s5576_s19] ss:$0 sm:$0xff] }
 0x3de   :  { %3641 = vmatmul.msk.f32.vlgmr.msra.gmra.mxu2 %vm289_vm0, %v908_v27 }
 0x3df   :  { %v893_v30 = vpop.permute.xlu2 %892 }
 0x3ed   :  { %v885_v28 = vpop.permute.xlu0 %884  ;;  %v1083_v45 = vpop.f32.mrf.mxu3 }
 0x3ee   :  { %v905_v29 = vsel %vm322_vm1, %v449_v11, %v885_v28  ;;  %v1013_v11 = vld [vmem:[%s5565_s8 + $0x8] sm:$0xff] }
 0x3ef   :  { %v907_v32 = vsel %vm874_vm2, %v905_v29, %v893_v30  ;;  %1040 = vmatpush.msrb.mxu0 %v1013_v11 }
 0x3f1   :  { %1041 = vmatpush.msrb.mxu0 %v1012_v12 }
 0x420   :  { %v901_v31 = vpop.permute.xlu0 %900 }
 0x421   :  { %v909_v8 = vsel %vm877_vm3, %v907_v32, %v901_v31 }
 0x422   :  { %3642 = vmatmul.msk.f32.gmra.mxu2 %vm289_vm0, %v909_v8 }
 0x461   :  { %v941_v34 = vpop.f32.mrf.mxu2 }
 0x462   :  { %v942_v35 = vadd.f32 %v3858_v33, %v941_v34 }
 0x464   :  { %v947_v36 = vadd.f32 %v942_v35, %v4648_v4 }
 0x466   :  { %v951_v37 = vsel %vm289_vm0, %v947_v36, 0.0 }
 0x467   :  { %952 = vadd.xlane.f32.xlu2 %v951_v37 }
 0x4a5   :  { %v944_v38 = vpop.f32.mrf.mxu2 }
 0x4a6   :  { %v945_v39 = vadd.f32 %v3858_v33, %v944_v38 }
 0x4a8   :  { %v948_v40 = vadd.f32 %v945_v39, %v4652_v5 }
 0x4aa   :  { %v954_v41 = vsel %vm289_vm0, %v948_v40, 0.0 }
 0x4ab   :  { %955 = vadd.xlane.f32.xlu0 %v954_v41  ;;  %v3861_v41 = vld [vmem:[#allocation14] ss:$0 sm:$0xff] }
 0x4ac   :  { %v4847_v43 = vadd.f32 %v3861_v41, %v1080_v42  ;;  %v4855_v46 = vadd.f32 %v3861_v41, %v1083_v45 }
 0x4ae   :  { %3647 = vmatpush.xpose.msk.msrb.mxu1 %vm322_vm1, %v4847_v43 }
 0x4b2   :  { %3649 = vmatpush.xpose.msk.msra.mxu1 %vm322_vm1, %v4855_v46 }
 0x4bf   :  { %1218 = vrot.lane.b32.xlu0 %v4847_v43, %s4438_s4 }
 0x4da   :  { %v953_v4 = vpop.xlane.xlu2 %952 }
 0x4db   :  { %v964_v51 = vmul.f32 %v4811_v49, %v953_v4 }
 0x4dd   :  { %v966_v52 = vsub.f32 %v947_v36, %v964_v51 }
 0x4df   :  { %v968_v53 = vmul.f32 %v966_v52, %v966_v52 }
 0x4e1   :  { %v970_v5 = vsel %vm289_vm0, %v968_v53, 0.0 }
 0x4e2   :  { %971 = vadd.xlane.f32.xlu1 %v970_v5  ;;  %v4878_v5 = vpack.i.bf16 %v4855_v46, %v4847_v43 }
 0x51e   :  { %v956_v55 = vpop.xlane.xlu0 %955 }
 0x51f   :  { %v965_v56 = vmul.f32 %v4811_v49, %v956_v55 }
 0x521   :  { %v967_v58 = vsub.f32 %v948_v40, %v965_v56 }
 0x523   :  { %v969_v59 = vmul.f32 %v967_v58, %v967_v58 }
 0x525   :  { %v973_v61 = vsel %vm289_vm0, %v969_v59, 0.0 }
 0x526   :  { %974 = vadd.xlane.f32.xlu2 %v973_v61  ;;  %v274_v61 = vld [vmem:[%s5594_s26] sm:$0x3] }
 0x527   :  { %v4890_v0 = vperm.slane %v274_v61, 0  ;;  %v276_v13 = vrot.slane %v274_v61, 1 }
 0x531   :  { %v1219_v53 = vpop.permute.xlu0 %1218 }
 0x532   :  { %3653 = vmatpush.xpose.msk.msra.mxu3 %vm322_vm1, %v1219_v53 }
 0x53e   :  { %1352 = vrot.lane.b32.xlu2 %v4847_v43, %s4440_s0 }
 0x546   :  { %1246 = vrot.lane.b32.xlu2 %v4855_v46, %s4438_s4 }
 0x555   :  { %v972_v14 = vpop.xlane.xlu1 %971 }
 0x556   :  { %v976_v15 = vmul.f32 %v972_v14, %v4811_v49 }
 0x558   :  { %v978_v16 = vadd.f32 1e-06, %v976_v15 }
 0x55a   :  { %3917 = vrsqrt.f32 %v978_v16  ;;  %vm986_vm6 = vweird.f32 %v978_v16 }
 0x560   :  { %v3918_v17 = vpop.eup %3917 }
 0x561   :  { %v981_v18 = vmul.f32 %v3918_v17, %v978_v16  ;;  %vm987_vm5 = vweird.f32 %v3918_v17  ;;  %v4899_v16 = vperm.slane %v276_v13, 0 }
 0x562   :  { %vm988_vm7 = vmor %vm986_vm6, %vm987_vm5  ;;  %vm1820_vm5 = vcmask 523264  }
 0x563   :  { %v982_v19 = vmul.f32 %v3918_v17, %v981_v18 }
 0x565   :  { %v983_v20 = vmul.f32 0.5, %v982_v19 }
 0x567   :  { %v984_v21 = vsub.f32 1.5, %v983_v20 }
 0x569   :  { %v985_v22 = vmul.f32 %v3918_v17, %v984_v21 }
 0x56b   :  { %v989_v24 = vsel %vm988_vm7, %v3918_v17, %v985_v22 }
 0x56c   :  { %v1000_v25 = vmul.f32 %v989_v24, %v966_v52 }
 0x56e   :  { %v1005_v27 = vmul.f32 %v3859_v23, %v1000_v25 }
 0x570   :  { %v4838_v28 = vadd.f32 %v3860_v26, %v1005_v27 }
 0x572   :  { %3643 = vmatmul.msk.f32.vlgmr.msrb.gmra.mxu0 %vm289_vm0, %v4838_v28 }
 0x599   :  { %v975_v29 = vpop.xlane.xlu2 %974 }
 0x59a   :  { %v977_v30 = vmul.f32 %v975_v29, %v4811_v49 }
 0x59c   :  { %v979_v31 = vadd.f32 1e-06, %v977_v30 }
 0x59e   :  { %3919 = vrsqrt.f32 %v979_v31  ;;  %vm996_vm9 = vweird.f32 %v979_v31 }
 0x5a1   :  { %v1353_v55 = vpop.permute.xlu2 %1352 }
 0x5a2   :  { %3659 = vmatpush.xpose.msk.msrb.mxu3 %vm322_vm1, %v1353_v55 }
 0x5a4   :  { %v3920_v32 = vpop.eup %3919 }
 0x5a5   :  { %v991_v8 = vmul.f32 %v3920_v32, %v979_v31  ;;  %vm997_vm8 = vweird.f32 %v3920_v32 }
 0x5a6   :  { %vm998_vm10 = vmor %vm996_vm9, %vm997_vm8 }
 0x5a7   :  { %v992_v33 = vmul.f32 %v3920_v32, %v991_v8 }
 0x5a9   :  { %v993_v34 = vmul.f32 0.5, %v992_v33  ;;  %v1247_v56 = vpop.permute.xlu2 %1246 }
 0x5ab   :  { %v994_v35 = vsub.f32 1.5, %v993_v34 }
 0x5ad   :  { %v995_v36 = vmul.f32 %v3920_v32, %v994_v35 }
 0x5af   :  { %v999_v37 = vsel %vm998_vm10, %v3920_v32, %v995_v36 }
 0x5b0   :  { %v1001_v38 = vmul.f32 %v999_v37, %v967_v58 }
 0x5b2   :  { %v1006_v39 = vmul.f32 %v3859_v23, %v1001_v38 }
 0x5b4   :  { %v4843_v40 = vadd.f32 %v3860_v26, %v1006_v39 }
 0x5b6   :  { %3644 = vmatmul.msk.f32.gmra.mxu0 %vm289_vm0, %v4843_v40 }
 0x5ef   :  { %v1043_v47 = vpop.f32.mrf.mxu0 }
 0x5f0   :  { %v1044_v4 = vadd.f32 %v3862_v10, %v1043_v47 }
 0x5f2   :  { %1216 = vrot.lane.b32.xlu1 %v1044_v4, %s4438_s4  ;;  %3648 = vmatmul.msk.f32.vlgmr.msrb.gmra.mxu1 %vm322_vm1, %v1044_v4 }
 0x5f3   :  { %1350 = vrot.lane.b32.xlu0 %v1044_v4, %s4440_s0  ;;  %3655 = vmatpush.xpose.msk.msrb.mxu1 %vm322_vm1, %v1247_v56 }
 0x5fa   :  { %1486 = vrot.lane.b32.xlu1 %v4847_v43, %s4441_s12 }
 0x5fb   :  { %1484 = vrot.lane.b32.xlu0 %v1044_v4, %s4441_s12 }
 0x603   :  { %1380 = vrot.lane.b32.xlu0 %v4855_v46, %s4440_s0 }
 0x633   :  { %v1046_v51 = vpop.f32.mrf.mxu0 }
 0x634   :  { %v1047_v52 = vadd.f32 %v3862_v10, %v1046_v51 }
 0x636   :  { %1512 = vrot.lane.b32.xlu0 %v1047_v52, %s4441_s12  ;;  %1378 = vrot.lane.b32.xlu2 %v1047_v52, %s4440_s0 }
 0x637   :  { %1244 = vrot.lane.b32.xlu1 %v1047_v52, %s4438_s4  ;;  %3650 = vmatmul.msk.f32.vlgmr.msra.gmra.mxu1 %vm322_vm1, %v1047_v52 }
 0x63f   :  { %1514 = vrot.lane.b32.xlu1 %v4855_v46, %s4441_s12 }
 0x647   :  { %3808 = vrot.lane.b32.xlu1 %v4878_v5, %s4436_s1 }
 0x664   :  { %v1217_v58 = vpop.permute.xlu1 %1216 }
 0x665   :  { %v1351_v59 = vpop.permute.xlu0 %1350  ;;  %3654 = vmatmul.msk.f32.vlgmr.msra.gmra.mxu3 %vm322_vm1, %v1217_v58 }
 0x66c   :  { %v1487_v62 = vpop.permute.xlu1 %1486 }
 0x66d   :  { %v1485_v63 = vpop.permute.xlu0 %1484  ;;  %3660 = vmatmul.msk.f32.vlgmr.msrb.gmra.mxu3 %vm322_vm1, %v1351_v59 }
 0x66e   :  { %3665 = vmatpush.xpose.msk.msra.mxu3 %vm322_vm1, %v1487_v62 }
 0x66f   :  { %v1109_v2 = vpop.f32.mrf.mxu1 }
 0x670   :  { %v1138_v3 = vmul.f32 0.35355338, %v1109_v2 }
 0x672   :  { %v1140_v6 = vadd.f32 %v1138_v3, %v4890_v0 }
 0x674   :  { %v1142_v9 = vsel %vm322_vm1, %v1140_v6, -inf }
 0x675   :  { %1143 = vmax.xlane.f32.xlu2 %v1142_v9  ;;  %3666 = vmatmul.msk.f32.vlgmr.msra.gmra.mxu3 %vm322_vm1, %v1485_v63  ;;  %v1381_v11 = vpop.permute.xlu0 %1380 }
 0x676   :  { %3661 = vmatpush.xpose.msk.msra.mxu1 %vm322_vm1, %v1381_v11 }
 0x690   :  { %v1379_v14 = vpop.permute.xlu2 %1378 }
 0x6a8   :  { %v1513_v20 = vpop.permute.xlu0 %1512 }
 0x6a9   :  { %v1245_v12 = vpop.permute.xlu1 %1244 }
 0x6aa   :  { %3656 = vmatmul.msk.f32.vlgmr.msrb.gmra.mxu1 %vm322_vm1, %v1245_v12 }
 0x6b1   :  { %v1515_v15 = vpop.permute.xlu1 %1514 }
 0x6b2   :  { %3662 = vmatmul.msk.f32.vlgmr.msra.gmra.mxu1 %vm322_vm1, %v1379_v14 }
 0x6b3   :  { %3667 = vmatpush.xpose.msk.msrb.mxu1 %vm322_vm1, %v1515_v15 }
 0x6b4   :  { %v1135_v17 = vpop.f32.mrf.mxu1 }
 0x6b5   :  { %v1139_v18 = vmul.f32 0.35355338, %v1135_v17 }
 0x6b7   :  { %v1141_v19 = vadd.f32 %v1139_v18, %v4899_v16 }
 0x6b9   :  { %v3809_v21 = vpop.permute.xlu1 %3808  ;;  %v1145_v22 = vsel %vm322_vm1, %v1141_v19, -inf }
 0x6ba   :  { %v3811_v23 = vunpack.i.h.bf16 %v3809_v21  ;;  %v3810_v24 = vunpack.i.l.bf16 %v3809_v21  ;;  %1146 = vmax.xlane.f32.xlu0 %v1145_v22  ;;  %3668 = vmatmul.msk.f32.vlgmr.msrb.gmra.mxu1 %vm322_vm1, %v1513_v20 }
 0x6bc   :  { %1185 = vmatpush.msrb.mxu2 %v3810_v24  ;;  %1211 = vmatpush.msra.mxu0 %v3811_v23 }
 0x6e8   :  { %v1144_v25 = vpop.xlane.xlu2 %1143  ;;  %v1241_v26 = vpop.f32.mrf.mxu3 }
 0x6e9   :  { %v1148_v27 = vsub.f32 %v1140_v6, %v1144_v25  ;;  %v1272_v29 = vmul.f32 0.35355338, %v1241_v26 }
 0x6eb   :  { %v1150_v30 = vmul.f32 1.442695, %v1148_v27  ;;  %v1274_v31 = vadd.f32 %v1272_v29, %v4890_v0 }
 0x6ed   :  { %3921 = vpow2.f32 %v1150_v30  ;;  %v1276_v32 = vsel %vm322_vm1, %v1274_v31, -inf }
 0x6ee   :  { %1277 = vmax.xlane.f32.xlu1 %v1276_v32 }
 0x6f0   :  { %v1375_v8 = vpop.f32.mrf.mxu3 }
 0x6f1   :  { %v1406_v33 = vmul.f32 0.35355338, %v1375_v8 }
 0x6f3   :  { %v3922_v34 = vpop.eup %3921  ;;  %v1408_v35 = vadd.f32 %v1406_v33, %v4890_v0 }
 0x6f4   :  { %v1154_v36 = vsel %vm322_vm1, %v3922_v34, 0.0 }
 0x6f5   :  { %1155 = vadd.xlane.f32.xlu0 %v1154_v36  ;;  %v1410_v37 = vsel %vm322_vm1, %v1408_v35, -inf }
 0x6f6   :  { %1411 = vmax.xlane.f32.xlu2 %v1410_v37 }
 0x6f8   :  { %v1509_v38 = vpop.f32.mrf.mxu3 }
 0x6f9   :  { %v1540_v39 = vmul.f32 0.35355338, %v1509_v38 }
 0x6fb   :  { %v4910_v41 = vadd.f32 %v1540_v39, %v4890_v0 }
 0x6fd   :  { %v1544_v42 = vsel %vm322_vm1, %v4910_v41, -inf }
 0x6fe   :  { %1545 = vmax.xlane.f32.xlu0 %v1544_v42 }
 0x727   :  { %v1269_v45 = vpop.f32.mrf.mxu1 }
 0x728   :  { %v1273_v10 = vmul.f32 0.35355338, %v1269_v45 }
 0x72a   :  { %v1275_v47 = vadd.f32 %v1273_v10, %v4899_v16 }
 0x72c   :  { %v1279_v4 = vsel %vm322_vm1, %v1275_v47, -inf }
 0x72d   :  { %1280 = vmax.xlane.f32.xlu1 %v1279_v4  ;;  %v1147_v51 = vpop.xlane.xlu0 %1146 }
 0x72e   :  { %v1149_v52 = vsub.f32 %v1141_v19, %v1147_v51 }
 0x72f   :  { %v1403_v53 = vpop.f32.mrf.mxu1 }
 0x730   :  { %v1152_v55 = vmul.f32 1.442695, %v1149_v52  ;;  %v1407_v56 = vmul.f32 0.35355338, %v1403_v53 }
 0x732   :  { %3923 = vpow2.f32 %v1152_v55  ;;  %v1409_v58 = vadd.f32 %v1407_v56, %v4899_v16 }
 0x734   :  { %v1413_v59 = vsel %vm322_vm1, %v1409_v58, -inf }
 0x735   :  { %1414 = vmax.xlane.f32.xlu2 %v1413_v59 }
 0x737   :  { %v1537_v61 = vpop.f32.mrf.mxu1 }
 0x738   :  { %v3924_v62 = vpop.eup %3923  ;;  %v1541_v63 = vmul.f32 0.35355338, %v1537_v61 }
 0x739   :  { %v1157_v2 = vsel %vm322_vm1, %v3924_v62, 0.0 }
 0x73a   :  { %1158 = vadd.xlane.f32.xlu0 %v1157_v2  ;;  %v1543_v3 = vadd.f32 %v1541_v63, %v4899_v16 }
 0x73c   :  { %v1547_v6 = vsel %vm322_vm1, %v1543_v3, -inf }
 0x73d   :  { %1548 = vmax.xlane.f32.xlu1 %v1547_v6 }
 0x74e   :  { %3813 = vrot.lane.b32.xlu0 %v4878_v5, %s4435_s10 }
 0x756   :  { %1432 = vrot.lane.b32.xlu1 %v4847_v43, %s4437_s29  ;;  %1566 = vrot.lane.b32.xlu0 %v4847_v43, %s4439_s3 }
 0x75e   :  { %1592 = vrot.lane.b32.xlu0 %v4855_v46, %s4439_s3 }
 0x761   :  { %v1278_v9 = vpop.xlane.xlu1 %1277 }
 0x762   :  { %v1282_v11 = vsub.f32 %v1274_v31, %v1278_v9 }
 0x764   :  { %v1284_v12 = vmul.f32 1.442695, %v1282_v11 }
 0x766   :  { %3925 = vpow2.f32 %v1284_v12 }
 0x768   :  { %v1156_v13 = vpop.xlane.xlu0 %1155 }
 0x769   :  { %3927 = vrcp.f32 %v1156_v13  ;;  %v1412_v43 = vpop.xlane.xlu2 %1411 }
 0x76a   :  { %v1416_v20 = vsub.f32 %v1408_v35, %v1412_v43 }
 0x76c   :  { %v3926_v14 = vpop.eup %3925  ;;  %v1418_v23 = vmul.f32 1.442695, %v1416_v20 }
 0x76d   :  { %v1288_v15 = vsel %vm322_vm1, %v3926_v14, 0.0 }
 0x76e   :  { %1289 = vadd.xlane.f32.xlu2 %v1288_v15 }
 0x76f   :  { %v3928_v5 = vpop.eup %3927 }
 0x770   :  { %v4930_v17 = vmul.f32 %v3928_v5, %v3922_v34 }
 0x771   :  { %v1546_v22 = vpop.xlane.xlu0 %1545 }
 0x772   :  { %3651 = vmatmul.msk.f32.vlgmr.msrb.gmra.mxu2 %vm322_vm1, %v4930_v17  ;;  %v1550_v33 = vsub.f32 %v4910_v41, %v1546_v22 }
 0x774   :  { %v1552_v38 = vmul.f32 1.442695, %v1550_v33 }
 0x7a0   :  { %v1281_v18 = vpop.xlane.xlu1 %1280 }
 0x7a1   :  { %v1283_v19 = vsub.f32 %v1275_v47, %v1281_v18 }
 0x7a3   :  { %v1286_v21 = vmul.f32 1.442695, %v1283_v19 }
 0x7a5   :  { %3929 = vpow2.f32 %v1286_v21 }
 0x7a6   :  { %3931 = vpow2.f32 %v1418_v23 }
 0x7a8   :  { %v1415_v24 = vpop.xlane.xlu2 %1414 }
 0x7a9   :  { %v1417_v26 = vsub.f32 %v1409_v58, %v1415_v24 }
 0x7ab   :  { %v3930_v25 = vpop.eup %3929  ;;  %v1420_v30 = vmul.f32 1.442695, %v1417_v26 }
 0x7ac   :  { %v1291_v27 = vsel %vm322_vm1, %v3930_v25, 0.0  ;;  %v3932_v32 = vpop.eup %3931 }
 0x7ad   :  { %1292 = vadd.xlane.f32.xlu2 %v1291_v27  ;;  %v1159_v29 = vpop.xlane.xlu0 %1158  ;;  %v1422_v36 = vsel %vm322_vm1, %v3932_v32, 0.0 }
 0x7ae   :  { %3933 = vrcp.f32 %v1159_v29  ;;  %v1675_v29 = vld [vmem:[#allocation16 + $0x18] sm:$0xff] }
 0x7af   :  { %3935 = vpow2.f32 %v1420_v30  ;;  %v1674_v30 = vld [vmem:[#allocation16 + $0x10] sm:$0xff]  ;;  %1698 = vmatpush.msrb.mxu3 %v1675_v29  ;;  %v1815_v29 = vld [vmem:[%s5573_s16 + $0x38] sm:$0xff] }
 0x7b0   :  { %v1549_v31 = vpop.xlane.xlu1 %1548 }
 0x7b1   :  { %v1551_v8 = vsub.f32 %v1543_v3, %v1549_v31  ;;  %v1673_v31 = vld [vmem:[#allocation16 + $0x8] sm:$0xff]  ;;  %1699 = vmatpush.msrb.mxu3 %v1674_v30  ;;  %v1814_v30 = vld [vmem:[%s5573_s16 + $0x30] sm:$0xff] }
 0x7b3   :  { %v1554_v34 = vmul.f32 1.442695, %v1551_v8  ;;  %1700 = vmatpush.msrb.mxu3 %v1673_v31 }
 0x7b4   :  { %v3934_v35 = vpop.eup %3933 }
 0x7b5   :  { %v4937_v37 = vmul.f32 %v3934_v35, %v3924_v62  ;;  %3937 = vpow2.f32 %v1554_v34  ;;  %1423 = vadd.xlane.f32.xlu2 %v1422_v36  ;;  %v3936_v39 = vpop.eup %3935 }
 0x7b6   :  { %3939 = vpow2.f32 %v1552_v38  ;;  %v1425_v45 = vsel %vm322_vm1, %v3936_v39, 0.0 }
 0x7b7   :  { %3652 = vmatmul.msk.f32.vlgmr.msra.gmra.mxu0 %vm322_vm1, %v4937_v37 }
 0x7bb   :  { %v3938_v42 = vpop.eup %3937 }
 0x7bc   :  { %v1559_v41 = vsel %vm322_vm1, %v3938_v42, 0.0  ;;  %v3940_v47 = vpop.eup %3939 }
 0x7bd   :  { %1426 = vadd.xlane.f32.xlu2 %v1425_v45  ;;  %1560 = vadd.xlane.f32.xlu1 %v1559_v41  ;;  %v1556_v52 = vsel %vm322_vm1, %v3940_v47, 0.0 }
 0x7c0   :  { %v3814_v10 = vpop.permute.xlu0 %3813 }
 0x7c1   :  { %v3816_v4 = vunpack.i.h.bf16 %v3814_v10  ;;  %v3815_v51 = vunpack.i.l.bf16 %v3814_v10 }
 0x7c3   :  { %1319 = vmatpush.msra.mxu2 %v3815_v51  ;;  %1345 = vmatpush.msrb.mxu0 %v3816_v4  ;;  %v3863_v4 = vld [vmem:[#allocation17] ss:$0 sm:$0xff] }
 0x7c5   :  { %1557 = vadd.xlane.f32.xlu2 %v1556_v52 }
 0x7c8   :  { %v1433_v53 = vpop.permute.xlu1 %1432  ;;  %v1567_v59 = vpop.permute.xlu0 %1566 }
 0x7c9   :  { %1453 = vmatpush.msrb.mxu2 %v1433_v53 }
 0x7d0   :  { %v1593_v43 = vpop.permute.xlu0 %1592 }
 0x7dd   :  { %1458 = vrot.lane.b32.xlu2 %v4855_v46, %s4437_s29 }
 0x7e1   :  { %v1290_v55 = vpop.xlane.xlu2 %1289 }
 0x7e2   :  { %3941 = vrcp.f32 %v1290_v55 }
 0x7e8   :  { %v3942_v56 = vpop.eup %3941 }
 0x7e9   :  { %v4946_v58 = vmul.f32 %v3942_v56, %v3926_v14 }
 0x7eb   :  { %3657 = vmatmul.msk.f32.vlgmr.msra.gmra.mxu2 %vm322_vm1, %v4946_v58 }
 0x7ec   :  { %1587 = vmatpush.msra.mxu2 %v1567_v59 }
 0x7f5   :  { %v1187_v20 = vpop.f32.mrf.mxu2 }
 0x820   :  { %v1293_v61 = vpop.xlane.xlu2 %1292 }
 0x821   :  { %3943 = vrcp.f32 %v1293_v61 }
 0x827   :  { %v3944_v62 = vpop.eup %3943 }
 0x828   :  { %v4950_v63 = vmul.f32 %v3944_v62, %v3930_v25  ;;  %v1424_v2 = vpop.xlane.xlu2 %1423 }
 0x829   :  { %3945 = vrcp.f32 %v1424_v2 }
 0x82a   :  { %3658 = vmatmul.msk.f32.vlgmr.msrb.gmra.mxu0 %vm322_vm1, %v4950_v63 }
 0x82f   :  { %v3946_v46 = vpop.eup %3945 }
 0x830   :  { %v4954_v3 = vmul.f32 %v3946_v46, %v3932_v32  ;;  %v1427_v6 = vpop.xlane.xlu2 %1426  ;;  %v1561_v11 = vpop.xlane.xlu1 %1560  ;;  %v1672_v32 = vld [vmem:[#allocation16] sm:$0xff] }
 0x831   :  { %3947 = vrcp.f32 %v1427_v6  ;;  %1701 = vmatpush.msrb.mxu3 %v1672_v32  ;;  %v1813_v32 = vld [vmem:[%s5573_s16 + $0x28] sm:$0xff] }
 0x832   :  { %3663 = vmatmul.msk.f32.vlgmr.msrb.gmra.mxu2 %vm322_vm1, %v4954_v3 }
 0x834   :  { %v1213_v22 = vpop.f32.mrf.mxu0 }
 0x837   :  { %v3948_v12 = vpop.eup %3947 }
 0x838   :  { %v1558_v9 = vpop.xlane.xlu2 %1557  ;;  %v4958_v14 = vmul.f32 %v3948_v12, %v3936_v39 }
 0x839   :  { %3949 = vrcp.f32 %v1558_v9 }
 0x83a   :  { %3951 = vrcp.f32 %v1561_v11 }
 0x83f   :  { %v3950_v13 = vpop.eup %3949 }
 0x840   :  { %v4960_v15 = vmul.f32 %v3950_v13, %v3940_v47  ;;  %v1459_v5 = vpop.permute.xlu2 %1458  ;;  %v3952_v18 = vpop.eup %3951 }
 0x841   :  { %1479 = vmatpush.msra.mxu0 %v1459_v5  ;;  %v4966_v19 = vmul.f32 %v3952_v18, %v3938_v42  ;;  %v1771_v18 = vld [vmem:[#allocation19 + $0x10] sm:$0xff] }
 0x842   :  { %3664 = vmatmul.msk.f32.vlgmr.msra.gmra.mxu0 %vm322_vm1, %v4958_v14  ;;  %3669 = vmatmul.msk.f32.vlgmr.msra.gmra.mxu2 %vm322_vm1, %v4960_v15 }
 0x843   :  { %1613 = vmatpush.msrb.mxu0 %v1593_v43 }
 0x84a   :  { %3670 = vmatmul.msk.f32.vlgmr.msrb.gmra.mxu0 %vm322_vm1, %v4966_v19 }
 0x86e   :  { %v1321_v21 = vpop.f32.mrf.mxu2 }
 0x86f   :  { %1644 = vrot.lane.b32.xlu0 %v1321_v21, %s4420_s22  ;;  %v1769_v21 = vld [vmem:[#allocation19] sm:$0xff] }
 0x8a7   :  { %v1347_v24 = vpop.f32.mrf.mxu0 }
 0x8b5   :  { %v1455_v23 = vpop.f32.mrf.mxu2 }
 0x8b6   :  { %1652 = vrot.lane.b32.xlu0 %v1455_v23, %s4422_s24 }
 0x8be   :  { %1646 = vrot.lane.b32.xlu0 %v1347_v24, %s4420_s22 }
 0x8bf   :  { %v1481_v25 = vpop.f32.mrf.mxu0 }
 0x8c5   :  { %v1589_v26 = vpop.f32.mrf.mxu2 }
 0x8c6   :  { %1660 = vrot.lane.b32.xlu2 %v1589_v26, %s4446_s23 }
 0x8c7   :  { %v1615_v27 = vpop.f32.mrf.mxu0 }
 0x8c8   :  { %1662 = vrot.lane.b32.xlu0 %v1615_v27, %s4446_s23 }
 0x8ce   :  { %1654 = vrot.lane.b32.xlu2 %v1481_v25, %s4422_s24 }
 0x8e1   :  { %v1645_v8 = vpop.permute.xlu0 %1644 }
 0x8e2   :  { %v1666_v33 = vsel %vm322_vm1, %v1187_v20, %v1645_v8  ;;  %v1770_v20 = vld [vmem:[#allocation19 + $0x8] sm:$0xff] }
 0x920   :  { %v1661_v35 = vpop.permute.xlu2 %1660 }
 0x928   :  { %v1653_v34 = vpop.permute.xlu0 %1652  ;;  %v1655_v45 = vpop.permute.xlu2 %1654 }
 0x929   :  { %v1668_v36 = vsel %vm874_vm2, %v1666_v33, %v1653_v34 }
 0x92a   :  { %v1670_v38 = vsel %vm877_vm3, %v1668_v36, %v1661_v35  ;;  %v1812_v35 = vld [vmem:[%s5573_s16 + $0x20] sm:$0xff] }
 0x92b   :  { %3671 = vmatmul.msk.f32.vlgmr.msrb.gmra.mxu3 %vm289_vm0, %v1670_v38 }
 0x930   :  { %v1647_v39 = vpop.permute.xlu0 %1646 }
 0x931   :  { %v1667_v42 = vsel %vm322_vm1, %v1213_v22, %v1647_v39  ;;  %v1811_v39 = vld [vmem:[%s5573_s16 + $0x18] sm:$0xff] }
 0x932   :  { %v1669_v10 = vsel %vm874_vm2, %v1667_v42, %v1655_v45  ;;  %v3864_v42 = vld [vmem:[%s5575_s18 + $0x1] ss:$0 sm:$0xff] }
 0x93a   :  { %v1663_v41 = vpop.permute.xlu0 %1662 }
 0x93b   :  { %v1671_v47 = vsel %vm877_vm3, %v1669_v10, %v1663_v41  ;;  %v3865_v10 = vld [vmem:[%s5576_s19 + $0x1] ss:$0 sm:$0xff] }
 0x93c   :  { %3672 = vmatmul.msk.f32.gmra.mxu3 %vm289_vm0, %v1671_v47 }
 0x9ae   :  { %v1703_v51 = vpop.f32.mrf.mxu3 }
 0x9af   :  { %v1704_v52 = vadd.f32 %v3863_v4, %v1703_v51 }
 0x9b1   :  { %v1709_v53 = vadd.f32 %v1704_v52, %v4838_v28 }
 0x9b3   :  { %v1715_v55 = vsel %vm289_vm0, %v1709_v53, 0.0 }
 0x9b4   :  { %1716 = vadd.xlane.f32.xlu2 %v1715_v55 }
 0x9bf   :  { %v1706_v56 = vpop.f32.mrf.mxu3 }
 0x9c0   :  { %v1707_v59 = vadd.f32 %v3863_v4, %v1706_v56 }
 0x9c2   :  { %v1710_v61 = vadd.f32 %v1707_v59, %v4843_v40  ;;  %v1772_v40 = vld [vmem:[#allocation19 + $0x18] sm:$0xff] }
 0x9c3   :  { %1795 = vmatpush.msrb.mxu2 %v1772_v40 }
 0x9c4   :  { %v1718_v62 = vsel %vm289_vm0, %v1710_v61, 0.0 }
 0x9c5   :  { %1719 = vadd.xlane.f32.xlu1 %v1718_v62  ;;  %1796 = vmatpush.msrb.mxu2 %v1771_v18 }
 0x9c7   :  { %1797 = vmatpush.msrb.mxu2 %v1770_v20  ;;  %v3867_v20 = vld [vmem:[#allocation22] ss:$0 sm:$0xff] }
 0x9c9   :  { %1798 = vmatpush.msrb.mxu2 %v1769_v21 }
 0x9cb   :  { %1835 = vmatpush.msra.mxu2 %v1815_v29 }
 0x9cd   :  { %1836 = vmatpush.msra.mxu2 %v1814_v30 }
 0x9cf   :  { %1837 = vmatpush.msra.mxu2 %v1813_v32 }
 0x9d1   :  { %1838 = vmatpush.msra.mxu2 %v1812_v35 }
 0x9d3   :  { %1839 = vmatpush.msra.mxu2 %v1811_v39 }
 0xa27   :  { %v1717_v2 = vpop.xlane.xlu2 %1716 }
 0xa28   :  { %v1721_v46 = vmul.f32 %v1717_v2, %v4811_v49 }
 0xa2a   :  { %v1723_v6 = vsub.f32 %v1709_v53, %v1721_v46 }
 0xa2c   :  { %v1725_v9 = vmul.f32 %v1723_v6, %v1723_v6 }
 0xa2e   :  { %v1727_v11 = vsel %vm289_vm0, %v1725_v9, 0.0  ;;  %v1809_v9 = vld [vmem:[%s5573_s16 + $0x8] sm:$0xff] }
 0xa2f   :  { %1728 = vadd.xlane.f32.xlu0 %v1727_v11  ;;  %v1808_v11 = vld [vmem:[%s5573_s16] sm:$0xff] }
 0xa38   :  { %v1720_v12 = vpop.xlane.xlu1 %1719 }
 0xa39   :  { %v1722_v28 = vmul.f32 %v1720_v12, %v4811_v49  ;;  %v3866_v12 = vld [vmem:[#allocation20] ss:$0 sm:$0xff] }
 0xa3b   :  { %v1724_v13 = vsub.f32 %v1710_v61, %v1722_v28 }
 0xa3d   :  { %v1726_v5 = vmul.f32 %v1724_v13, %v1724_v13 }
 0xa3f   :  { %v1730_v43 = vsel %vm289_vm0, %v1726_v5, 0.0 }
 0xa40   :  { %1731 = vadd.xlane.f32.xlu1 %v1730_v43 }
 0xaa2   :  { %v1729_v22 = vpop.xlane.xlu0 %1728 }
 0xaa3   :  { %v1733_v23 = vmul.f32 %v1729_v22, %v4811_v49 }
 0xaa5   :  { %v1735_v24 = vadd.f32 1e-06, %v1733_v23 }
 0xaa7   :  { %3953 = vrsqrt.f32 %v1735_v24  ;;  %vm1743_vm12 = vweird.f32 %v1735_v24 }
 0xaad   :  { %v3954_v25 = vpop.eup %3953 }
 0xaae   :  { %v1738_v26 = vmul.f32 %v3954_v25, %v1735_v24  ;;  %vm1744_vm11 = vweird.f32 %v3954_v25 }
 0xaaf   :  { %vm1745_vm13 = vmor %vm1743_vm12, %vm1744_vm11 }
 0xab0   :  { %v1739_v27 = vmul.f32 %v3954_v25, %v1738_v26 }
 0xab2   :  { %v1740_v31 = vmul.f32 0.5, %v1739_v27 }
 0xab3   :  { %v1732_v8 = vpop.xlane.xlu1 %1731 }
 0xab4   :  { %v1741_v33 = vsub.f32 1.5, %v1740_v31  ;;  %v1734_v34 = vmul.f32 %v1732_v8, %v4811_v49 }
 0xab6   :  { %v1742_v36 = vmul.f32 %v3954_v25, %v1741_v33  ;;  %v1736_v38 = vadd.f32 1e-06, %v1734_v34 }
 0xab8   :  { %v1746_v45 = vsel %vm1745_vm13, %v3954_v25, %v1742_v36  ;;  %3955 = vrsqrt.f32 %v1736_v38  ;;  %vm1753_vm15 = vweird.f32 %v1736_v38 }
 0xab9   :  { %v1757_v41 = vmul.f32 %v1746_v45, %v1723_v6  ;;  %v1810_v6 = vld [vmem:[%s5573_s16 + $0x10] sm:$0xff] }
 0xaba   :  { %1840 = vmatpush.msra.mxu2 %v1810_v6  ;;  %v3683_v45 = vld [vmem:[%s5593_s5 + $0x30] sm:$0xff]  ;;  %v3868_v6 = vld [vmem:[%s5575_s18 + $0x2] ss:$0 sm:$0xff] }
 0xabb   :  { %v1762_v47 = vmul.f32 %v3864_v42, %v1757_v41  ;;  %v3682_v41 = vld [vmem:[%s5593_s5 + $0x28] sm:$0xff] }
 0xabc   :  { %1841 = vmatpush.msra.mxu2 %v1809_v9 }
 0xabd   :  { %v1767_v4 = vadd.f32 %v3865_v10, %v1762_v47 }
 0xabe   :  { %v3956_v51 = vpop.eup %3955  ;;  %1842 = vmatpush.msra.mxu2 %v1808_v11 }
 0xabf   :  { %v1748_v52 = vmul.f32 %v3956_v51, %v1736_v38  ;;  %3675 = vmatmul.msk.f32.vlgmr.msrb.gmra.mxu2 %vm289_vm0, %v1767_v4  ;;  %vm1754_vm14 = vweird.f32 %v3956_v51 }
 0xac0   :  { %vm1755_vm4 = vmor %vm1753_vm15, %vm1754_vm14 }
 0xac1   :  { %v1749_v53 = vmul.f32 %v3956_v51, %v1748_v52 }
 0xac3   :  { %v1750_v55 = vmul.f32 0.5, %v1749_v53 }
 0xac5   :  { %v1751_v56 = vsub.f32 1.5, %v1750_v55 }
 0xac7   :  { %v1752_v59 = vmul.f32 %v3956_v51, %v1751_v56 }
 0xac9   :  { %v1756_v61 = vsel %vm1755_vm4, %v3956_v51, %v1752_v59 }
 0xaca   :  { %v1758_v62 = vmul.f32 %v1756_v61, %v1724_v13 }
 0xacc   :  { %v1763_v2 = vmul.f32 %v3864_v42, %v1758_v62  ;;  %v3684_v42 = vld [vmem:[%s5593_s5 + $0x38] sm:$0xff] }
 0xacd   :  { %1938 = vmatpush.msra.mxu0 %v3684_v42 }
 0xace   :  { %v1768_v46 = vadd.f32 %v3865_v10, %v1763_v2  ;;  %v3681_v10 = vld [vmem:[%s5593_s5 + $0x20] sm:$0xff] }
 0xacf   :  { %1939 = vmatpush.msra.mxu0 %v3683_v45 }
 0xad0   :  { %3676 = vmatmul.msk.f32.gmra.mxu2 %vm289_vm0, %v1768_v46 }
 0xad1   :  { %1940 = vmatpush.msra.mxu0 %v3682_v41 }
 0xad3   :  { %1941 = vmatpush.msra.mxu0 %v3681_v10 }
 0xb42   :  { %v1800_v28 = vpop.f32.mrf.mxu2 }
 0xb43   :  { %v1801_v13 = vadd.f32 %v3866_v12, %v1800_v28 }
 0xb45   :  { %v1806_v5 = vmax.f32 %v1801_v13, 0.0 }
 0xb47   :  { %3677 = vmatmul.msk.f32.vlgmr.msra.gmra.mxu2 %vm1820_vm5, %v1806_v5 }
 0xb53   :  { %v1803_v43 = vpop.f32.mrf.mxu2 }
 0xb54   :  { %v1804_v40 = vadd.f32 %v3866_v12, %v1803_v43  ;;  %v3869_v12 = vld [vmem:[%s5576_s19 + $0x2] ss:$0 sm:$0xff] }
 0xb56   :  { %v1807_v18 = vmax.f32 %v1804_v40, 0.0 }
 0xb58   :  { %3678 = vmatmul.msk.f32.gmra.mxu2 %vm1820_vm5, %v1807_v18 }
 0xbca   :  { %v1844_v21 = vpop.f32.mrf.mxu2 }
 0xbcb   :  { %v1845_v22 = vadd.f32 %v3867_v20, %v1844_v21 }
 0xbcd   :  { %v1850_v23 = vadd.f32 %v1845_v22, %v1767_v4 }
 0xbcf   :  { %v1856_v24 = vsel %vm289_vm0, %v1850_v23, 0.0 }
 0xbd0   :  { %1857 = vadd.xlane.f32.xlu1 %v1856_v24 }
 0xbdb   :  { %v1847_v25 = vpop.f32.mrf.mxu2 }
 0xbdc   :  { %v1848_v26 = vadd.f32 %v3867_v20, %v1847_v25 }
 0xbde   :  { %v1851_v27 = vadd.f32 %v1848_v26, %v1768_v46  ;;  %v3870_v26 = vld [vmem:[#allocation8 + $0x1] ss:$0 sm:$0xff] }
 0xbe0   :  { %v1859_v29 = vsel %vm289_vm0, %v1851_v27, 0.0 }
 0xbe1   :  { %1860 = vadd.xlane.f32.xlu1 %v1859_v29 }
 0xc43   :  { %v1858_v30 = vpop.xlane.xlu1 %1857 }
 0xc44   :  { %v1862_v31 = vmul.f32 %v1858_v30, %v4811_v49 }
 0xc46   :  { %v1864_v32 = vsub.f32 %v1850_v23, %v1862_v31 }
 0xc48   :  { %v1866_v8 = vmul.f32 %v1864_v32, %v1864_v32 }
 0xc4a   :  { %v1868_v33 = vsel %vm289_vm0, %v1866_v8, 0.0 }
 0xc4b   :  { %1869 = vadd.xlane.f32.xlu1 %v1868_v33 }
 0xc54   :  { %v1861_v34 = vpop.xlane.xlu1 %1860 }
 0xc55   :  { %v1863_v35 = vmul.f32 %v1861_v34, %v4811_v49 }
 0xc57   :  { %v1865_v36 = vsub.f32 %v1851_v27, %v1863_v35 }
 0xc59   :  { %v1867_v38 = vmul.f32 %v1865_v36, %v1865_v36 }
 0xc5b   :  { %v1871_v39 = vsel %vm289_vm0, %v1867_v38, 0.0 }
 0xc5c   :  { %1872 = vadd.xlane.f32.xlu2 %v1871_v39 }
 0xcbe   :  { %v1870_v47 = vpop.xlane.xlu1 %1869 }
 0xcbf   :  { %v1874_v4 = vmul.f32 %v1870_v47, %v4811_v49 }
 0xcc1   :  { %v1876_v51 = vadd.f32 1e-06, %v1874_v4 }
 0xcc3   :  { %3957 = vrsqrt.f32 %v1876_v51  ;;  %vm1884_vm7 = vweird.f32 %v1876_v51 }
 0xcc9   :  { %v3958_v52 = vpop.eup %3957 }
 0xcca   :  { %v1879_v53 = vmul.f32 %v3958_v52, %v1876_v51  ;;  %vm1885_vm6 = vweird.f32 %v3958_v52 }
 0xccb   :  { %vm1886_vm8 = vmor %vm1884_vm7, %vm1885_vm6 }
 0xccc   :  { %v1880_v55 = vmul.f32 %v3958_v52, %v1879_v53  ;;  %v4037_v53 = vld [vmem:[#allocation7] sm:$0xff] }
 0xcce   :  { %v1881_v56 = vmul.f32 0.5, %v1880_v55 }
 0xccf   :  { %v1873_v59 = vpop.xlane.xlu2 %1872 }
 0xcd0   :  { %v1882_v61 = vsub.f32 1.5, %v1881_v56  ;;  %v1875_v62 = vmul.f32 %v1873_v59, %v4811_v49 }
 0xcd2   :  { %v1883_v2 = vmul.f32 %v3958_v52, %v1882_v61  ;;  %v1877_v46 = vadd.f32 1e-06, %v1875_v62 }
 0xcd4   :  { %v1887_v9 = vsel %vm1886_vm8, %v3958_v52, %v1883_v2  ;;  %3959 = vrsqrt.f32 %v1877_v46  ;;  %vm1894_vm10 = vweird.f32 %v1877_v46 }
 0xcd5   :  { %v1898_v11 = vmul.f32 %v1887_v9, %v1864_v32 }
 0xcd7   :  { %v1903_v28 = vmul.f32 %v3868_v6, %v1898_v11 }
 0xcd9   :  { %v5054_v13 = vadd.f32 %v3869_v12, %v1903_v28 }
 0xcda   :  { %v3960_v5 = vpop.eup %3959 }
 0xcdb   :  { %v1889_v43 = vmul.f32 %v3960_v5, %v1877_v46  ;;  %3685 = vmatmul.msk.f32.vlgmr.msra.gmra.mxu0 %vm289_vm0, %v5054_v13  ;;  %vm1895_vm9 = vweird.f32 %v3960_v5 }
 0xcdc   :  { %vm1896_vm11 = vmor %vm1894_vm10, %vm1895_vm9 }
 0xcdd   :  { %v1890_v40 = vmul.f32 %v3960_v5, %v1889_v43 }
 0xcdf   :  { %v1891_v18 = vmul.f32 0.5, %v1890_v40 }
 0xce1   :  { %v1892_v20 = vsub.f32 1.5, %v1891_v18 }
 0xce3   :  { %v1893_v21 = vmul.f32 %v3960_v5, %v1892_v20 }
 0xce5   :  { %v1897_v22 = vsel %vm1896_vm11, %v3960_v5, %v1893_v21 }
 0xce6   :  { %v1899_v23 = vmul.f32 %v1897_v22, %v1865_v36 }
 0xce8   :  { %v1904_v24 = vmul.f32 %v3868_v6, %v1899_v23 }
 0xcea   :  { %v5058_v25 = vadd.f32 %v3869_v12, %v1904_v24 }
 0xcec   :  { %3686 = vmatmul.msk.f32.gmra.mxu0 %vm289_vm0, %v5058_v25 }
 0xd58   :  { %v1943_v27 = vpop.f32.mrf.mxu0 }
 0xd59   :  { %v5062_v29 = vadd.f32 %v3870_v26, %v1943_v27 }
 0xd5b   :  { %1950 = vrot.lane.b32.xlu1 %v5062_v29, %s4436_s1 }
 0xd63   :  { %2083 = vrot.lane.b32.xlu1 %v5062_v29, %s4435_s10 }
 0xd69   :  { %v1946_v30 = vpop.f32.mrf.mxu0 }
 0xd6a   :  { %v5068_v31 = vadd.f32 %v3870_v26, %v1946_v30 }
 0xd6c   :  { %2111 = vrot.lane.b32.xlu2 %v5068_v31, %s4435_s10  ;;  %1977 = vrot.lane.b32.xlu0 %v5068_v31, %s4436_s1 }
 0xd6d   :  { %2243 = vrot.lane.b32.xlu1 %v5068_v31, %s4440_s0 }
 0xd74   :  { %2109 = vrot.lane.b32.xlu0 %v5068_v31, %s4438_s4  ;;  %2081 = vrot.lane.b32.xlu2 %v5062_v29, %s4438_s4 }
 0xd75   :  { %2379 = vrot.lane.b32.xlu1 %v5068_v31, %s4439_s3 }
 0xd7c   :  { %2245 = vrot.lane.b32.xlu0 %v5068_v31, %s4437_s29  ;;  %2217 = vrot.lane.b32.xlu2 %v5062_v29, %s4437_s29 }
 0xd7d   :  { %2349 = vrot.lane.b32.xlu1 %v5062_v29, %s4441_s12 }
 0xd84   :  { %2215 = vrot.lane.b32.xlu0 %v5062_v29, %s4440_s0  ;;  %2377 = vrot.lane.b32.xlu2 %v5068_v31, %s4441_s12 }
 0xd8c   :  { %2351 = vrot.lane.b32.xlu0 %v5062_v29, %s4439_s3 }
 0xdc6   :  { %v2112_v32 = vpop.permute.xlu2 %2111 }
 0xdc7   :  { %3695 = vmatpush.xpose.msk.msrb.mxu2 %vm322_vm1, %v2112_v32 }
 0xdcd   :  { %v1951_v8 = vpop.permute.xlu1 %1950 }
 0xdce   :  { %3687 = vmatpush.xpose.msk.msra.mxu3 %vm322_vm1, %v1951_v8  ;;  %v2082_v33 = vpop.permute.xlu2 %2081 }
 0xdd1   :  { %3688 = vmatmul.msk.f32.vlgmr.msra.gmra.mxu3 %vm322_vm1, %v5062_v29 }
 0xdd5   :  { %v2084_v34 = vpop.permute.xlu1 %2083 }
 0xdd6   :  { %v2218_v36 = vpop.permute.xlu2 %2217 }
 0xdde   :  { %v1978_v35 = vpop.permute.xlu0 %1977  ;;  %v2378_v10 = vpop.permute.xlu2 %2377 }
 0xddf   :  { %3689 = vmatpush.xpose.msk.msra.mxu1 %vm322_vm1, %v1978_v35  ;;  %v2244_v38 = vpop.permute.xlu1 %2243 }
 0xde2   :  { %3690 = vmatmul.msk.f32.vlgmr.msra.gmra.mxu1 %vm322_vm1, %v5068_v31 }
 0xde3   :  { %3693 = vmatpush.xpose.msk.msrb.mxu1 %vm322_vm1, %v2084_v34 }
 0xde6   :  { %v2110_v39 = vpop.permute.xlu0 %2109 }
 0xde7   :  { %3699 = vmatpush.xpose.msk.msra.mxu1 %vm322_vm1, %v2218_v36  ;;  %3696 = vmatmul.msk.f32.vlgmr.msrb.gmra.mxu2 %vm322_vm1, %v2110_v39  ;;  %v2380_v45 = vpop.permute.xlu1 %2379 }
 0xdea   :  { %3694 = vmatmul.msk.f32.vlgmr.msrb.gmra.mxu1 %vm322_vm1, %v2082_v33 }
 0xdee   :  { %v2246_v42 = vpop.permute.xlu0 %2245 }
 0xdef   :  { %3701 = vmatpush.xpose.msk.msra.mxu2 %vm322_vm1, %v2246_v42  ;;  %v2350_v4 = vpop.permute.xlu1 %2349 }
 0xdf2   :  { %3702 = vmatmul.msk.f32.vlgmr.msra.gmra.mxu2 %vm322_vm1, %v2244_v38  ;;  %v3817_v38 = vpack.i.bf16 %v5068_v31, %v5062_v29 }
 0xdf3   :  { %3707 = vmatpush.xpose.msk.msrb.mxu2 %vm322_vm1, %v2380_v45 }
 0xdf6   :  { %v2216_v41 = vpop.permute.xlu0 %2215 }
 0xdf7   :  { %3700 = vmatmul.msk.f32.vlgmr.msra.gmra.mxu1 %vm322_vm1, %v2216_v41 }
 0xdfa   :  { %3708 = vmatmul.msk.f32.vlgmr.msrb.gmra.mxu2 %vm322_vm1, %v2378_v10 }
 0xdfe   :  { %v2352_v47 = vpop.permute.xlu0 %2351 }
 0xdff   :  { %3705 = vmatpush.xpose.msk.msrb.mxu1 %vm322_vm1, %v2352_v47 }
 0xe02   :  { %3706 = vmatmul.msk.f32.vlgmr.msrb.gmra.mxu1 %vm322_vm1, %v2350_v4 }
 0xe54   :  { %v1973_v51 = vpop.f32.mrf.mxu3 }
 0xe55   :  { %v2003_v52 = vmul.f32 0.35355338, %v1973_v51 }
 0xe57   :  { %v2005_v55 = vadd.f32 %v4037_v53, %v2003_v52 }
 0xe59   :  { %v2007_v56 = vsel %vm322_vm1, %v2005_v55, -inf }
 0xe5a   :  { %2008 = vmax.xlane.f32.xlu2 %v2007_v56 }
 0xe5f   :  { %v2000_v59 = vpop.f32.mrf.mxu1 }
 0xe60   :  { %v2004_v61 = vmul.f32 0.35355338, %v2000_v59 }
 0xe62   :  { %v2006_v62 = vadd.f32 %v4037_v53, %v2004_v61 }
 0xe64   :  { %v2010_v2 = vsel %vm322_vm1, %v2006_v62, -inf }
 0xe65   :  { %2011 = vmax.xlane.f32.xlu0 %v2010_v2 }
 0xe67   :  { %v2106_v46 = vpop.f32.mrf.mxu1 }
 0xe68   :  { %v2137_v6 = vmul.f32 0.35355338, %v2106_v46 }
 0xe6a   :  { %v2134_v9 = vpop.f32.mrf.mxu2  ;;  %v2139_v11 = vadd.f32 %v4037_v53, %v2137_v6 }
 0xe6b   :  { %v2138_v12 = vmul.f32 0.35355338, %v2134_v9 }
 0xe6c   :  { %v2141_v28 = vsel %vm322_vm1, %v2139_v11, -inf }
 0xe6d   :  { %2142 = vmax.xlane.f32.xlu1 %v2141_v28  ;;  %v2140_v5 = vadd.f32 %v4037_v53, %v2138_v12 }
 0xe6f   :  { %v2144_v43 = vsel %vm322_vm1, %v2140_v5, -inf }
 0xe70   :  { %2145 = vmax.xlane.f32.xlu2 %v2144_v43 }
 0xe74   :  { %v2240_v40 = vpop.f32.mrf.mxu1 }
 0xe75   :  { %v2271_v18 = vmul.f32 0.35355338, %v2240_v40  ;;  %v2268_v20 = vpop.f32.mrf.mxu2 }
 0xe76   :  { %v2272_v21 = vmul.f32 0.35355338, %v2268_v20 }
 0xe77   :  { %v2273_v22 = vadd.f32 %v4037_v53, %v2271_v18 }
 0xe78   :  { %v2274_v23 = vadd.f32 %v4037_v53, %v2272_v21 }
 0xe79   :  { %v2275_v24 = vsel %vm322_vm1, %v2273_v22, -inf }
 0xe7a   :  { %2276 = vmax.xlane.f32.xlu0 %v2275_v24  ;;  %v2278_v26 = vsel %vm322_vm1, %v2274_v23, -inf }
 0xe7b   :  { %2279 = vmax.xlane.f32.xlu1 %v2278_v26 }
 0xe7d   :  { %v2402_v27 = vpop.f32.mrf.mxu2 }
 0xe7e   :  { %v2406_v30 = vmul.f32 0.35355338, %v2402_v27 }
 0xe7f   :  { %v2374_v32 = vpop.f32.mrf.mxu1 }
 0xe80   :  { %v2405_v8 = vmul.f32 0.35355338, %v2374_v32  ;;  %v2408_v33 = vadd.f32 %v4037_v53, %v2406_v30 }
 0xe82   :  { %v2412_v34 = vsel %vm322_vm1, %v2408_v33, -inf  ;;  %v2407_v35 = vadd.f32 %v4037_v53, %v2405_v8 }
 0xe83   :  { %2413 = vmax.xlane.f32.xlu0 %v2412_v34 }
 0xe84   :  { %v2409_v36 = vsel %vm322_vm1, %v2407_v35, -inf }
 0xe85   :  { %2410 = vmax.xlane.f32.xlu2 %v2409_v36 }
 0xe94   :  { %3818 = vrot.lane.b32.xlu1 %v3817_v38, %s4442_s27 }
 0xecd   :  { %v2009_v39 = vpop.xlane.xlu2 %2008 }
 0xece   :  { %v2013_v42 = vsub.f32 %v2005_v55, %v2009_v39 }
 0xed0   :  { %v2015_v45 = vmul.f32 1.442695, %v2013_v42 }
 0xed2   :  { %3961 = vpow2.f32 %v2015_v45 }
 0xed8   :  { %v5123_v41 = vpop.eup %3961  ;;  %v2012_v10 = vpop.xlane.xlu0 %2011 }
 0xed9   :  { %v2014_v47 = vsub.f32 %v2006_v62, %v2012_v10  ;;  %v2019_v4 = vsel %vm322_vm1, %v5123_v41, 0.0 }
 0xeda   :  { %2020 = vadd.xlane.f32.xlu1 %v2019_v4 }
 0xedb   :  { %v2017_v51 = vmul.f32 1.442695, %v2014_v47 }
 0xedd   :  { %3963 = vpow2.f32 %v2017_v51 }
 0xee0   :  { %v2143_v52 = vpop.xlane.xlu1 %2142 }
 0xee1   :  { %v2147_v53 = vsub.f32 %v2139_v11, %v2143_v52 }
 0xee3   :  { %v3964_v56 = vpop.eup %3963  ;;  %v2149_v29 = vmul.f32 1.442695, %v2147_v53  ;;  %v2146_v31 = vpop.xlane.xlu2 %2145 }
 0xee4   :  { %v2148_v59 = vsub.f32 %v2140_v5, %v2146_v31  ;;  %v2022_v55 = vsel %vm322_vm1, %v3964_v56, 0.0 }
 0xee5   :  { %3965 = vpow2.f32 %v2149_v29  ;;  %2023 = vadd.xlane.f32.xlu2 %v2022_v55 }
 0xee6   :  { %v2151_v61 = vmul.f32 1.442695, %v2148_v59 }
 0xee8   :  { %3967 = vpow2.f32 %v2151_v61 }
 0xeeb   :  { %v3966_v2 = vpop.eup %3965 }
 0xeec   :  { %v2153_v62 = vsel %vm322_vm1, %v3966_v2, 0.0 }
 0xeed   :  { %2154 = vadd.xlane.f32.xlu0 %v2153_v62  ;;  %v2277_v6 = vpop.xlane.xlu0 %2276 }
 0xeee   :  { %v3968_v46 = vpop.eup %3967  ;;  %v2280_v9 = vpop.xlane.xlu1 %2279  ;;  %v2281_v28 = vsub.f32 %v2273_v22, %v2277_v6 }
 0xeef   :  { %v2282_v12 = vsub.f32 %v2274_v23, %v2280_v9  ;;  %v2156_v11 = vsel %vm322_vm1, %v3968_v46, 0.0 }
 0xef0   :  { %2157 = vadd.xlane.f32.xlu2 %v2156_v11  ;;  %v2283_v5 = vmul.f32 1.442695, %v2281_v28 }
 0xef1   :  { %v2285_v43 = vmul.f32 1.442695, %v2282_v12 }
 0xef3   :  { %3969 = vpow2.f32 %v2285_v43  ;;  %3828 = vrot.lane.b32.xlu1 %v3817_v38, %s4443_s11 }
 0xef4   :  { %3971 = vpow2.f32 %v2283_v5 }
 0xef6   :  { %v2414_v24 = vpop.xlane.xlu0 %2413 }
 0xef7   :  { %v2416_v22 = vsub.f32 %v2408_v33, %v2414_v24 }
 0xef8   :  { %v2411_v40 = vpop.xlane.xlu2 %2410 }
 0xef9   :  { %v5131_v18 = vpop.eup %3969  ;;  %v2415_v20 = vsub.f32 %v2407_v35, %v2411_v40  ;;  %v2419_v30 = vmul.f32 1.442695, %v2416_v22 }
 0xefa   :  { %v2290_v21 = vsel %vm322_vm1, %v5131_v18, 0.0  ;;  %v3972_v26 = vpop.eup %3971 }
 0xefb   :  { %3833 = vrot.lane.b32.xlu1 %v3817_v38, %s4445_s14  ;;  %2291 = vadd.xlane.f32.xlu0 %v2290_v21  ;;  %v2417_v23 = vmul.f32 1.442695, %v2415_v20  ;;  %v2287_v27 = vsel %vm322_vm1, %v3972_v26, 0.0 }
 0xefd   :  { %3973 = vpow2.f32 %v2417_v23 }
 0xefe   :  { %3975 = vpow2.f32 %v2419_v30 }
 0xf03   :  { %2288 = vadd.xlane.f32.xlu0 %v2287_v27  ;;  %v3974_v8 = vpop.eup %3973 }
 0xf04   :  { %v2421_v35 = vsel %vm322_vm1, %v3974_v8, 0.0  ;;  %v3976_v39 = vpop.eup %3975 }
 0xf05   :  { %v2424_v33 = vsel %vm322_vm1, %v3976_v39, 0.0 }
 0xf06   :  { %v3819_v32 = vpop.permute.xlu1 %3818 }
 0xf07   :  { %v3821_v34 = vunpack.i.h.bf16 %v3819_v32  ;;  %v3820_v36 = vunpack.i.l.bf16 %v3819_v32 }
 0xf08   :  { %3823 = vrot.lane.b32.xlu2 %v3817_v38, %s4444_s13 }
 0xf09   :  { %2050 = vmatpush.msrb.mxu0 %v3820_v36  ;;  %2076 = vmatpush.msrb.mxu3 %v3821_v34 }
 0xf0b   :  { %2422 = vadd.xlane.f32.xlu0 %v2421_v35 }
 0xf13   :  { %2425 = vadd.xlane.f32.xlu0 %v2424_v33  ;;  %v3713_v33 = vld [vmem:[%s5563_s6 + $0x30] sm:$0xff] }
 0xf4d   :  { %v2021_v42 = vpop.xlane.xlu1 %2020 }
 0xf4e   :  { %3977 = vrcp.f32 %v2021_v42  ;;  %v3712_v42 = vld [vmem:[%s5563_s6 + $0x28] sm:$0xff] }
 0xf54   :  { %v3978_v45 = vpop.eup %3977 }
 0xf55   :  { %v5141_v10 = vmul.f32 %v3978_v45, %v5123_v41  ;;  %v3711_v45 = vld [vmem:[%s5563_s6 + $0x20] sm:$0xff] }
 0xf57   :  { %3691 = vmatmul.msk.f32.vlgmr.msrb.gmra.mxu0 %vm322_vm1, %v5141_v10 }
 0xf58   :  { %v2024_v38 = vpop.xlane.xlu2 %2023 }
 0xf59   :  { %3979 = vrcp.f32 %v2024_v38 }
 0xf5f   :  { %v3980_v47 = vpop.eup %3979 }
 0xf60   :  { %v5145_v4 = vmul.f32 %v3980_v47, %v3964_v56  ;;  %v2155_v51 = vpop.xlane.xlu0 %2154 }
 0xf61   :  { %3981 = vrcp.f32 %v2155_v51 }
 0xf62   :  { %3692 = vmatmul.msk.f32.vlgmr.msrb.gmra.mxu3 %vm322_vm1, %v5145_v4 }
 0xf63   :  { %v2158_v52 = vpop.xlane.xlu2 %2157 }
 0xf64   :  { %3983 = vrcp.f32 %v2158_v52 }
 0xf65   :  { %v3829_v53 = vpop.permute.xlu1 %3828 }
 0xf66   :  { %v3831_v56 = vunpack.i.h.bf16 %v3829_v53  ;;  %v3830_v9 = vunpack.i.l.bf16 %v3829_v53 }
 0xf67   :  { %v3982_v29 = vpop.eup %3981 }
 0xf68   :  { %v5149_v61 = vmul.f32 %v3982_v29, %v3966_v2 }
 0xf6a   :  { %v3984_v31 = vpop.eup %3983 }
 0xf6b   :  { %v3824_v41 = vpop.permute.xlu2 %3823  ;;  %v5151_v62 = vmul.f32 %v3984_v31, %v3968_v46 }
 0xf6c   :  { %v3826_v59 = vunpack.i.h.bf16 %v3824_v41  ;;  %v3825_v55 = vunpack.i.l.bf16 %v3824_v41 }
 0xf6d   :  { %v3834_v6 = vpop.permute.xlu1 %3833 }
 0xf6e   :  { %v3836_v12 = vunpack.i.h.bf16 %v3834_v6  ;;  %v3835_v11 = vunpack.i.l.bf16 %v3834_v6  ;;  %v2292_v28 = vpop.xlane.xlu0 %2291  ;;  %2184 = vmatpush.msra.mxu0 %v3825_v55  ;;  %2210 = vmatpush.msra.mxu3 %v3826_v59 }
 0xf6f   :  { %3985 = vrcp.f32 %v2292_v28  ;;  %3697 = vmatmul.msk.f32.vlgmr.msra.gmra.mxu0 %vm322_vm1, %v5149_v61  ;;  %3698 = vmatmul.msk.f32.vlgmr.msra.gmra.mxu3 %vm322_vm1, %v5151_v62 }
 0xf70   :  { %2318 = vmatpush.msrb.mxu0 %v3830_v9  ;;  %2344 = vmatpush.msrb.mxu3 %v3831_v56  ;;  %v3871_v9 = vld [vmem:[#allocation10 + $0x1] ss:$0 sm:$0xff] }
 0xf72   :  { %2452 = vmatpush.msra.mxu0 %v3835_v11  ;;  %2478 = vmatpush.msra.mxu3 %v3836_v12 }
 0xf75   :  { %v3986_v2 = vpop.eup %3985 }
 0xf76   :  { %v5158_v46 = vmul.f32 %v3986_v2, %v5131_v18  ;;  %v2289_v43 = vpop.xlane.xlu0 %2288 }
 0xf77   :  { %3987 = vrcp.f32 %v2289_v43 }
 0xf78   :  { %3704 = vmatmul.msk.f32.vlgmr.msrb.gmra.mxu3 %vm322_vm1, %v5158_v46 }
 0xf7d   :  { %v3988_v5 = vpop.eup %3987 }
 0xf7e   :  { %v5162_v40 = vmul.f32 %v3988_v5, %v3972_v26  ;;  %v2423_v20 = vpop.xlane.xlu0 %2422 }
 0xf7f   :  { %3989 = vrcp.f32 %v2423_v20 }
 0xf80   :  { %3703 = vmatmul.msk.f32.vlgmr.msrb.gmra.mxu0 %vm322_vm1, %v5162_v40 }
 0xf85   :  { %v3990_v21 = vpop.eup %3989 }
 0xf86   :  { %v5166_v23 = vmul.f32 %v3990_v21, %v3974_v8  ;;  %v2426_v24 = vpop.xlane.xlu0 %2425 }
 0xf87   :  { %3991 = vrcp.f32 %v2426_v24 }
 0xf88   :  { %3709 = vmatmul.msk.f32.vlgmr.msra.gmra.mxu0 %vm322_vm1, %v5166_v23 }
 0xf8d   :  { %v3992_v18 = vpop.eup %3991 }
 0xf8e   :  { %v5170_v22 = vmul.f32 %v3992_v18, %v3976_v39  ;;  %v3714_v39 = vld [vmem:[%s5563_s6 + $0x38] sm:$0xff]  ;;  %s4448_s6 = smov 32  }
 0xf8f   :  { %2565 = vmatpush.msra.mxu1 %v3714_v39  ;;  %v2677_v39 = vld [vmem:[#allocation13 + $0x28] sm:$0xff] }
 0xf90   :  { %3710 = vmatmul.msk.f32.vlgmr.msra.gmra.mxu3 %vm322_vm1, %v5170_v22 }
 0xf91   :  { %2566 = vmatpush.msra.mxu1 %v3713_v33  ;;  %v2676_v33 = vld [vmem:[#allocation13 + $0x20] sm:$0xff] }
 0xf93   :  { %2567 = vmatpush.msra.mxu1 %v3712_v42  ;;  %v4038_v42 = vld [vmem:[#allocation5] sm:$0xff] }
 0xf95   :  { %2568 = vmatpush.msra.mxu1 %v3711_v45  ;;  %v4039_v45 = vld [vmem:[#allocation5 + $0x8] sm:$0xff] }
 0xfd4   :  { %v2052_v26 = vpop.f32.mrf.mxu0 }
 0xfe5   :  { %v2078_v27 = vpop.f32.mrf.mxu3 }
 0xfec   :  { %v2186_v30 = vpop.f32.mrf.mxu0 }
 0xfed   :  { %2509 = vrot.lane.b32.xlu2 %v2186_v30, %s4420_s22 }
 0xff2   :  { %v2212_v32 = vpop.f32.mrf.mxu3 }
 0xff5   :  { %2511 = vrot.lane.b32.xlu2 %v2212_v32, %s4420_s22 }
 0xffb   :  { %v2346_v36 = vpop.f32.mrf.mxu3 }
 0xffd   :  { %v2320_v8 = vpop.f32.mrf.mxu0 }
 0xffe   :  { %2517 = vrot.lane.b32.xlu0 %v2320_v8, %s4422_s24 }
0x1005   :  { %v2454_v34 = vpop.f32.mrf.mxu0 }
0x1006   :  { %2525 = vrot.lane.b32.xlu1 %v2454_v34, %s4446_s23 }
0x100e   :  { %2519 = vrot.lane.b32.xlu1 %v2346_v36, %s4422_s24 }
0x1013   :  { %v2480_v35 = vpop.f32.mrf.mxu3 }
0x1014   :  { %2527 = vrot.lane.b32.xlu2 %v2480_v35, %s4446_s23  ;;  %v2678_v35 = vld [vmem:[#allocation13 + $0x30] sm:$0xff] }
0x1047   :  { %v2510_v38 = vpop.permute.xlu2 %2509 }
0x1048   :  { %v2531_v51 = vsel %vm322_vm1, %v2052_v26, %v2510_v38  ;;  %v3722_v38 = vld [vmem:[%s5565_s8 + $0x38] sm:$0xff] }
0x1049   :  { %2664 = vmatpush.msra.mxu2 %v3722_v38 }
0x104f   :  { %v2512_v29 = vpop.permute.xlu2 %2511 }
0x1050   :  { %v2532_v41 = vsel %vm322_vm1, %v2078_v27, %v2512_v29 }
0x106e   :  { %v2528_v55 = vpop.permute.xlu2 %2527 }
0x1070   :  { %v2518_v47 = vpop.permute.xlu0 %2517 }
0x1071   :  { %v2533_v52 = vsel %vm874_vm2, %v2531_v51, %v2518_v47  ;;  %v3721_v47 = vld [vmem:[%s5565_s8 + $0x30] sm:$0xff]  ;;  %v3720_v51 = vld [vmem:[%s5565_s8 + $0x28] sm:$0xff] }
0x1072   :  { %2665 = vmatpush.msra.mxu2 %v3721_v47 }
0x1074   :  { %2666 = vmatpush.msra.mxu2 %v3720_v51 }
0x1078   :  { %v2526_v53 = vpop.permute.xlu1 %2525 }
0x1079   :  { %v2535_v31 = vsel %vm877_vm3, %v2533_v52, %v2526_v53  ;;  %v3719_v52 = vld [vmem:[%s5565_s8 + $0x20] sm:$0xff] }
0x107a   :  { %3715 = vmatmul.msk.f32.vlgmr.msra.gmra.mxu1 %vm289_vm0, %v2535_v31  ;;  %2667 = vmatpush.msra.mxu2 %v3719_v52 }
0x1080   :  { %v2520_v59 = vpop.permute.xlu1 %2519 }
0x1081   :  { %v2534_v6 = vsel %vm874_vm2, %v2532_v41, %v2520_v59 }
0x1082   :  { %v2536_v56 = vsel %vm877_vm3, %v2534_v6, %v2528_v55 }
0x1083   :  { %3716 = vmatmul.msk.f32.gmra.mxu1 %vm289_vm0, %v2536_v56 }
0x10f7   :  { %v2570_v12 = vpop.f32.mrf.mxu1 }
0x10f8   :  { %v2571_v11 = vadd.f32 %v3871_v9, %v2570_v12 }
0x10fa   :  { %v2576_v28 = vadd.f32 %v2571_v11, %v5054_v13 }
0x10fc   :  { %v2582_v2 = vsel %vm289_vm0, %v2576_v28, 0.0 }
0x10fd   :  { %2583 = vadd.xlane.f32.xlu1 %v2582_v2 }
0x1100   :  { %v2573_v43 = vpop.f32.mrf.mxu1 }
0x1101   :  { %v2574_v5 = vadd.f32 %v3871_v9, %v2573_v43  ;;  %v3872_v43 = vld [vmem:[%s5575_s18 + $0x3] ss:$0 sm:$0xff] }
0x1103   :  { %v2577_v20 = vadd.f32 %v2574_v5, %v5058_v25  ;;  %v2679_v25 = vld [vmem:[#allocation13 + $0x38] sm:$0xff] }
0x1104   :  { %2697 = vmatpush.msrb.mxu0 %v2679_v25 }
0x1105   :  { %v2585_v21 = vsel %vm289_vm0, %v2577_v20, 0.0 }
0x1106   :  { %2586 = vadd.xlane.f32.xlu0 %v2585_v21  ;;  %2698 = vmatpush.msrb.mxu0 %v2678_v35 }
0x1108   :  { %2699 = vmatpush.msrb.mxu0 %v2677_v39  ;;  %v3874_v39 = vld [vmem:[#allocation14 + $0x1] ss:$0 sm:$0xff] }
0x110a   :  { %2700 = vmatpush.msrb.mxu0 %v2676_v33 }
0x110b   :  { %3725 = vmatmul.msk.f32.vlgmr.msrb.gmra.mxu0 %vm289_vm0, %v4038_v42 }
0x1113   :  { %3726 = vmatmul.msk.f32.gmra.mxu0 %vm289_vm0, %v4039_v45 }
0x1170   :  { %v2584_v24 = vpop.xlane.xlu1 %2583 }
0x1171   :  { %v2588_v18 = vmul.f32 %v2584_v24, %v4811_v49 }
0x1173   :  { %v2590_v26 = vsub.f32 %v2576_v28, %v2588_v18  ;;  %v3873_v18 = vld [vmem:[%s5576_s19 + $0x3] ss:$0 sm:$0xff] }
0x1175   :  { %v2592_v27 = vmul.f32 %v2590_v26, %v2590_v26 }
0x1177   :  { %v2594_v30 = vsel %vm289_vm0, %v2592_v27, 0.0 }
0x1178   :  { %2595 = vadd.xlane.f32.xlu2 %v2594_v30 }
0x1179   :  { %v2587_v32 = vpop.xlane.xlu0 %2586 }
0x117a   :  { %v2589_v13 = vmul.f32 %v2587_v32, %v4811_v49 }
0x117c   :  { %v2591_v8 = vsub.f32 %v2577_v20, %v2589_v13 }
0x117e   :  { %v2593_v34 = vmul.f32 %v2591_v8, %v2591_v8 }
0x1180   :  { %v2597_v36 = vsel %vm289_vm0, %v2593_v34, 0.0 }
0x1181   :  { %2598 = vadd.xlane.f32.xlu1 %v2597_v36 }
0x1188   :  { %v2702_v33 = vpop.f32.mrf.mxu0 }
0x1189   :  { %v5238_v42 = vadd.f32 %v3874_v39, %v2702_v33 }
0x118b   :  { %3727 = vmatpush.xpose.msk.msrb.mxu3 %vm322_vm1, %v5238_v42 }
0x1190   :  { %v2705_v45 = vpop.f32.mrf.mxu0 }
0x1191   :  { %v5244_v38 = vadd.f32 %v3874_v39, %v2705_v45 }
0x1193   :  { %2868 = vrot.lane.b32.xlu0 %v5244_v38, %s4438_s4  ;;  %3729 = vmatpush.xpose.msk.msra.mxu3 %vm322_vm1, %v5244_v38 }
0x119a   :  { %2840 = vrot.lane.b32.xlu1 %v5238_v42, %s4438_s4 }
0x11a2   :  { %2974 = vrot.lane.b32.xlu1 %v5238_v42, %s4440_s0 }
0x11eb   :  { %v2596_v53 = vpop.xlane.xlu2 %2595 }
0x11ec   :  { %v2600_v29 = vmul.f32 %v2596_v53, %v4811_v49 }
0x11ee   :  { %v2602_v31 = vadd.f32 1e-06, %v2600_v29 }
0x11f0   :  { %3993 = vrsqrt.f32 %v2602_v31  ;;  %vm2610_vm13 = vweird.f32 %v2602_v31 }
0x11f4   :  { %v2599_v41 = vpop.xlane.xlu1 %2598 }
0x11f5   :  { %v2601_v59 = vmul.f32 %v2599_v41, %v4811_v49 }
0x11f6   :  { %v3994_v55 = vpop.eup %3993 }
0x11f7   :  { %v2605_v6 = vmul.f32 %v3994_v55, %v2602_v31  ;;  %v2603_v56 = vadd.f32 1e-06, %v2601_v59  ;;  %vm2611_vm12 = vweird.f32 %v3994_v55 }
0x11f8   :  { %vm2612_vm14 = vmor %vm2610_vm13, %vm2611_vm12  ;;  %vm3567_vm13 = vcmask 785408  }
0x11f9   :  { %v2606_v9 = vmul.f32 %v3994_v55, %v2605_v6  ;;  %3995 = vrsqrt.f32 %v2603_v56  ;;  %vm2620_vm4 = vweird.f32 %v2603_v56 }
0x11fb   :  { %v2607_v12 = vmul.f32 0.5, %v2606_v9 }
0x11fd   :  { %v2608_v11 = vsub.f32 1.5, %v2607_v12 }
0x11ff   :  { %v3996_v28 = vpop.eup %3995  ;;  %v2609_v2 = vmul.f32 %v3994_v55, %v2608_v11 }
0x1200   :  { %v2615_v5 = vmul.f32 %v3996_v28, %v2603_v56  ;;  %vm2621_vm15 = vweird.f32 %v3996_v28 }
0x1201   :  { %v2613_v20 = vsel %vm2612_vm14, %v3994_v55, %v2609_v2  ;;  %vm2622_vm6 = vmor %vm2620_vm4, %vm2621_vm15 }
0x1202   :  { %v2624_v21 = vmul.f32 %v2613_v20, %v2590_v26  ;;  %v2616_v24 = vmul.f32 %v3996_v28, %v2615_v5 }
0x1204   :  { %v2629_v27 = vmul.f32 %v3872_v43, %v2624_v21  ;;  %v2617_v30 = vmul.f32 0.5, %v2616_v24 }
0x1205   :  { %v2869_v31 = vpop.permute.xlu0 %2868 }
0x1206   :  { %v2618_v32 = vsub.f32 1.5, %v2617_v30  ;;  %v5230_v13 = vadd.f32 %v3873_v18, %v2629_v27 }
0x1208   :  { %v2619_v34 = vmul.f32 %v3996_v28, %v2618_v32  ;;  %3723 = vmatmul.msk.f32.vlgmr.msra.gmra.mxu2 %vm289_vm0, %v5230_v13 }
0x120a   :  { %v2623_v36 = vsel %vm2622_vm6, %v3996_v28, %v2619_v34 }
0x120b   :  { %v2625_v25 = vmul.f32 %v2623_v36, %v2591_v8  ;;  %v3875_v8 = vld [vmem:[#allocation11 + $0x1] ss:$0 sm:$0xff] }
0x120c   :  { %v2841_v29 = vpop.permute.xlu1 %2840 }
0x120d   :  { %v2630_v26 = vmul.f32 %v3872_v43, %v2625_v25  ;;  %3733 = vmatpush.xpose.msk.msra.mxu0 %vm322_vm1, %v2841_v29 }
0x120f   :  { %v5234_v35 = vadd.f32 %v3873_v18, %v2630_v26 }
0x1211   :  { %3724 = vmatmul.msk.f32.gmra.mxu2 %vm289_vm0, %v5234_v35 }
0x1214   :  { %v2975_v41 = vpop.permute.xlu1 %2974 }
0x1215   :  { %3739 = vmatpush.xpose.msk.msrb.mxu0 %vm322_vm1, %v2975_v41 }
0x128b   :  { %v2669_v47 = vpop.f32.mrf.mxu2 }
0x128c   :  { %v2670_v51 = vadd.f32 %v3875_v8, %v2669_v47 }
0x128e   :  { %2838 = vrot.lane.b32.xlu0 %v2670_v51, %s4438_s4  ;;  %3728 = vmatmul.msk.f32.vlgmr.msrb.gmra.mxu3 %vm322_vm1, %v2670_v51 }
0x128f   :  { %3735 = vmatpush.xpose.msk.msrb.mxu3 %vm322_vm1, %v2869_v31 }
0x1294   :  { %v2672_v52 = vpop.f32.mrf.mxu2 }
0x1295   :  { %v2673_v53 = vadd.f32 %v3875_v8, %v2672_v52 }
0x1297   :  { %2866 = vrot.lane.b32.xlu2 %v2673_v53, %s4438_s4  ;;  %3000 = vrot.lane.b32.xlu0 %v2673_v53, %s4440_s0  ;;  %s3591_s4 = sshll.u32 %s5578_s21, 4  ;;  %s3592_s4 = int_to_ptr.hbm [resolvable:$true] %s3591_s4 }
0x1298   :  { %3134 = vrot.lane.b32.xlu1 %v2673_v53, %s4441_s12  ;;  %3730 = vmatmul.msk.f32.vlgmr.msra.gmra.mxu3 %vm322_vm1, %v2673_v53 }
0x129f   :  { %3002 = vrot.lane.b32.xlu2 %v5244_v38, %s4440_s0  ;;  %3136 = vrot.lane.b32.xlu0 %v5244_v38, %s4441_s12 }
0x12a7   :  { %2972 = vrot.lane.b32.xlu2 %v2670_v51, %s4440_s0  ;;  %3106 = vrot.lane.b32.xlu0 %v2670_v51, %s4441_s12 }
0x12af   :  { %3108 = vrot.lane.b32.xlu2 %v5238_v42, %s4441_s12 }
0x12f1   :  { %v2867_v59 = vpop.permute.xlu2 %2866 }
0x12f2   :  { %3736 = vmatmul.msk.f32.vlgmr.msrb.gmra.mxu3 %vm322_vm1, %v2867_v59 }
0x12f9   :  { %v3003_v55 = vpop.permute.xlu2 %3002 }
0x12fa   :  { %3741 = vmatpush.xpose.msk.msra.mxu3 %vm322_vm1, %v3003_v55 }
0x1300   :  { %v2839_v6 = vpop.permute.xlu0 %2838 }
0x1301   :  { %v2973_v56 = vpop.permute.xlu2 %2972  ;;  %3734 = vmatmul.msk.f32.vlgmr.msra.gmra.mxu0 %vm322_vm1, %v2839_v6 }
0x1309   :  { %v3001_v9 = vpop.permute.xlu0 %3000  ;;  %v3109_v12 = vpop.permute.xlu2 %3108  ;;  %3740 = vmatmul.msk.f32.vlgmr.msrb.gmra.mxu0 %vm322_vm1, %v2973_v56 }
0x130a   :  { %3742 = vmatmul.msk.f32.vlgmr.msra.gmra.mxu3 %vm322_vm1, %v3001_v9  ;;  %3745 = vmatpush.xpose.msk.msra.mxu0 %vm322_vm1, %v3109_v12  ;;  %v3135_v43 = vpop.permute.xlu1 %3134 }
0x1311   :  { %v3137_v11 = vpop.permute.xlu0 %3136  ;;  %v2731_v28 = vpop.f32.mrf.mxu3 }
0x1312   :  { %v2760_v2 = vmul.f32 0.35355338, %v2731_v28  ;;  %3747 = vmatpush.xpose.msk.msrb.mxu3 %vm322_vm1, %v3137_v11 }
0x1314   :  { %v2762_v5 = vadd.f32 %v2760_v2, %v4890_v0 }
0x1315   :  { %3748 = vmatmul.msk.f32.vlgmr.msrb.gmra.mxu3 %vm322_vm1, %v3135_v43 }
0x1316   :  { %v2764_v20 = vsel %vm322_vm1, %v2762_v5, -inf }
0x1317   :  { %2765 = vmax.xlane.f32.xlu1 %v2764_v20 }
0x1319   :  { %v3107_v21 = vpop.permute.xlu0 %3106 }
0x131a   :  { %3746 = vmatmul.msk.f32.vlgmr.msra.gmra.mxu0 %vm322_vm1, %v3107_v21 }
0x131b   :  { %v2757_v24 = vpop.f32.mrf.mxu3 }
0x131c   :  { %v2761_v18 = vmul.f32 0.35355338, %v2757_v24 }
0x131e   :  { %v2763_v27 = vadd.f32 %v2761_v18, %v4899_v16 }
0x1320   :  { %v2767_v30 = vsel %vm322_vm1, %v2763_v27, -inf }
0x1321   :  { %2768 = vmax.xlane.f32.xlu2 %v2767_v30 }
0x1375   :  { %v2891_v32 = vpop.f32.mrf.mxu3 }
0x1376   :  { %v2895_v34 = vmul.f32 0.35355338, %v2891_v32 }
0x1378   :  { %v2897_v36 = vadd.f32 %v2895_v34, %v4899_v16 }
0x137a   :  { %v2901_v25 = vsel %vm322_vm1, %v2897_v36, -inf }
0x137b   :  { %2902 = vmax.xlane.f32.xlu1 %v2901_v25 }
0x137e   :  { %v2863_v26 = vpop.f32.mrf.mxu0 }
0x137f   :  { %v2894_v39 = vmul.f32 0.35355338, %v2863_v26 }
0x1381   :  { %v2896_v33 = vadd.f32 %v2894_v39, %v4890_v0 }
0x1383   :  { %v2898_v45 = vsel %vm322_vm1, %v2896_v33, -inf }
0x1384   :  { %2899 = vmax.xlane.f32.xlu0 %v2898_v45 }
0x1386   :  { %v2997_v8 = vpop.f32.mrf.mxu0 }
0x1387   :  { %v3028_v47 = vmul.f32 0.35355338, %v2997_v8 }
0x1389   :  { %v3030_v51 = vadd.f32 %v3028_v47, %v4890_v0 }
0x138a   :  { %v2766_v52 = vpop.xlane.xlu1 %2765 }
0x138b   :  { %v2770_v53 = vsub.f32 %v2762_v5, %v2766_v52  ;;  %v3032_v29 = vsel %vm322_vm1, %v3030_v51, -inf }
0x138c   :  { %3033 = vmax.xlane.f32.xlu2 %v3032_v29 }
0x138d   :  { %v2772_v31 = vmul.f32 1.442695, %v2770_v53  ;;  %v3025_v41 = vpop.f32.mrf.mxu3 }
0x138e   :  { %v3029_v56 = vmul.f32 0.35355338, %v3025_v41 }
0x138f   :  { %3997 = vpow2.f32 %v2772_v31 }
0x1390   :  { %v5293_v5 = vadd.f32 %v3029_v56, %v4899_v16 }
0x1394   :  { %v2769_v59 = vpop.xlane.xlu2 %2768 }
0x1395   :  { %v5288_v55 = vpop.eup %3997  ;;  %v2771_v6 = vsub.f32 %v2763_v27, %v2769_v59  ;;  %v3035_v27 = vsel %vm322_vm1, %v5293_v5, -inf }
0x1396   :  { %v2776_v9 = vsel %vm322_vm1, %v5288_v55, 0.0 }
0x1397   :  { %v2774_v12 = vmul.f32 1.442695, %v2771_v6  ;;  %v3131_v11 = vpop.f32.mrf.mxu0  ;;  %2777 = vadd.xlane.f32.xlu0 %v2776_v9 }
0x1398   :  { %v3162_v28 = vmul.f32 0.35355338, %v3131_v11  ;;  %v3159_v2 = vpop.f32.mrf.mxu3 }
0x1399   :  { %v3163_v43 = vmul.f32 0.35355338, %v3159_v2  ;;  %3999 = vpow2.f32 %v2774_v12 }
0x139a   :  { %v3164_v20 = vadd.f32 %v3162_v28, %v4890_v0  ;;  %v3837_v0 = vpack.i.bf16 %v5244_v38, %v5238_v42 }
0x139b   :  { %v3165_v21 = vadd.f32 %v3163_v43, %v4899_v16 }
0x139c   :  { %v3166_v24 = vsel %vm322_vm1, %v3164_v20, -inf }
0x139d   :  { %3167 = vmax.xlane.f32.xlu1 %v3166_v24  ;;  %v3169_v18 = vsel %vm322_vm1, %v3165_v21, -inf }
0x139e   :  { %3170 = vmax.xlane.f32.xlu2 %v3169_v18 }
0x139f   :  { %3036 = vmax.xlane.f32.xlu0 %v3035_v27  ;;  %v4000_v30 = vpop.eup %3999 }
0x13a0   :  { %v2779_v32 = vsel %vm322_vm1, %v4000_v30, 0.0 }
0x13a5   :  { %2780 = vadd.xlane.f32.xlu1 %v2779_v32 }
0x13b3   :  { %3838 = vrot.lane.b32.xlu0 %v3837_v0, %s4436_s1 }
0x13ee   :  { %v2903_v16 = vpop.xlane.xlu1 %2902 }
0x13ef   :  { %v2905_v34 = vsub.f32 %v2897_v36, %v2903_v16 }
0x13f1   :  { %v2908_v25 = vmul.f32 1.442695, %v2905_v34 }
0x13f3   :  { %4001 = vpow2.f32 %v2908_v25 }
0x13f7   :  { %v2900_v26 = vpop.xlane.xlu0 %2899 }
0x13f8   :  { %v2904_v39 = vsub.f32 %v2896_v33, %v2900_v26 }
0x13f9   :  { %v5305_v45 = vpop.eup %4001 }
0x13fa   :  { %v2906_v8 = vmul.f32 1.442695, %v2904_v39  ;;  %v2913_v47 = vsel %vm322_vm1, %v5305_v45, 0.0 }
0x13fb   :  { %2914 = vadd.xlane.f32.xlu1 %v2913_v47 }
0x13fc   :  { %4003 = vpow2.f32 %v2906_v8 }
0x13ff   :  { %v3034_v52 = vpop.xlane.xlu2 %3033 }
0x1400   :  { %v3038_v53 = vsub.f32 %v3030_v51, %v3034_v52 }
0x1402   :  { %v4004_v29 = vpop.eup %4003  ;;  %v3040_v42 = vmul.f32 1.442695, %v3038_v53 }
0x1403   :  { %v2910_v38 = vsel %vm322_vm1, %v4004_v29, 0.0 }
0x1404   :  { %4005 = vpow2.f32 %v3040_v42  ;;  %2911 = vadd.xlane.f32.xlu2 %v2910_v38 }
0x140a   :  { %v5310_v36 = vpop.eup %4005  ;;  %v2778_v59 = vpop.xlane.xlu0 %2777 }
0x140b   :  { %v3044_v33 = vsel %vm322_vm1, %v5310_v36, 0.0 }
0x140c   :  { %3045 = vadd.xlane.f32.xlu2 %v3044_v33 }
0x1410   :  { %v3168_v31 = vpop.xlane.xlu1 %3167 }
0x1411   :  { %v3172_v41 = vsub.f32 %v3164_v20, %v3168_v31  ;;  %v3171_v27 = vpop.xlane.xlu2 %3170 }
0x1412   :  { %v3037_v12 = vpop.xlane.xlu0 %3036  ;;  %v3173_v32 = vsub.f32 %v3165_v21, %v3171_v27 }
0x1413   :  { %v3174_v6 = vmul.f32 1.442695, %v3172_v41  ;;  %v3039_v25 = vsub.f32 %v5293_v5, %v3037_v12 }
0x1414   :  { %3843 = vrot.lane.b32.xlu1 %v3837_v0, %s4435_s10  ;;  %v3176_v16 = vmul.f32 1.442695, %v3173_v32 }
0x1415   :  { %4007 = vpow2.f32 %v3174_v6 }
0x1416   :  { %4009 = vrcp.f32 %v2778_v59 }
0x1418   :  { %v2781_v56 = vpop.xlane.xlu1 %2780 }
0x1419   :  { %4011 = vrcp.f32 %v2781_v56 }
0x141a   :  { %4013 = vpow2.f32 %v3176_v16 }
0x141b   :  { %v5315_v51 = vpop.eup %4007 }
0x141c   :  { %v3178_v9 = vsel %vm322_vm1, %v5315_v51, 0.0  ;;  %v4010_v11 = vpop.eup %4009 }
0x141d   :  { %3179 = vadd.xlane.f32.xlu0 %v3178_v9  ;;  %v5321_v24 = vmul.f32 %v4010_v11, %v5288_v55 }
0x141f   :  { %v4012_v28 = vpop.eup %4011 }
0x1420   :  { %v5323_v18 = vmul.f32 %v4012_v28, %v4000_v30  ;;  %v4014_v34 = vpop.eup %4013  ;;  %v3042_v30 = vmul.f32 1.442695, %v3039_v25 }
0x1421   :  { %v3181_v55 = vsel %vm322_vm1, %v4014_v34, 0.0 }
0x1422   :  { %4015 = vpow2.f32 %v3042_v30 }
0x1424   :  { %3848 = vrot.lane.b32.xlu2 %v3837_v0, %s4437_s29 }
0x1425   :  { %v3839_v2 = vpop.permute.xlu0 %3838 }
0x1426   :  { %v3841_v43 = vunpack.i.h.bf16 %v3839_v2  ;;  %v3840_v20 = vunpack.i.l.bf16 %v3839_v2 }
0x1428   :  { %2807 = vmatpush.msrb.mxu1 %v3840_v20  ;;  %2833 = vmatpush.msrb.mxu2 %v3841_v43  ;;  %v4016_v26 = vpop.eup %4015 }
0x1429   :  { %3731 = vmatmul.msk.f32.vlgmr.msrb.gmra.mxu1 %vm322_vm1, %v5321_v24  ;;  %3732 = vmatmul.msk.f32.vlgmr.msrb.gmra.mxu2 %vm322_vm1, %v5323_v18  ;;  %v3047_v39 = vsel %vm322_vm1, %v4016_v26, 0.0 }
0x143e   :  { %3182 = vadd.xlane.f32.xlu1 %v3181_v55 }
0x144d   :  { %3048 = vadd.xlane.f32.xlu2 %v3047_v39 }
0x1465   :  { %3853 = vrot.lane.b32.xlu2 %v3837_v0, %s4439_s3  ;;  %s4450_s3 = smov [#allocation23]  }
0x1466   :  { %s3576_s0 = sshll.u32 %s4450_s3, 4  ;;  %s3577_s0 = int_to_ptr.vmem [resolvable:$true] %s3576_s0 }
0x146e   :  { %v2915_v47 = vpop.xlane.xlu1 %2914 }
0x146f   :  { %4017 = vrcp.f32 %v2915_v47  ;;  %v3297_v47 = vld [vmem:[#allocation16 + $0x30] sm:$0xff] }
0x1475   :  { %v4018_v52 = vpop.eup %4017 }
0x1476   :  { %v5334_v31 = vmul.f32 %v4018_v52, %v5305_v45  ;;  %v3295_v52 = vld [vmem:[#allocation16 + $0x20] sm:$0xff] }
0x1477   :  { %v2912_v8 = vpop.xlane.xlu2 %2911 }
0x1478   :  { %4019 = vrcp.f32 %v2912_v8  ;;  %v3298_v8 = vld [vmem:[#allocation16 + $0x38] sm:$0xff] }
0x1479   :  { %3322 = vmatpush.msrb.mxu0 %v3298_v8 }
0x147b   :  { %3323 = vmatpush.msrb.mxu0 %v3297_v47 }
0x147e   :  { %v4020_v53 = vpop.eup %4019 }
0x147f   :  { %v3046_v21 = vpop.xlane.xlu2 %3045  ;;  %v5336_v41 = vmul.f32 %v4020_v53, %v4004_v29 }
0x1480   :  { %4021 = vrcp.f32 %v3046_v21  ;;  %v3296_v21 = vld [vmem:[#allocation16 + $0x28] sm:$0xff] }
0x1481   :  { %3324 = vmatpush.msrb.mxu0 %v3296_v21  ;;  %v3877_v21 = vld [vmem:[%s5575_s18 + $0x4] ss:$0 sm:$0xff] }
0x1483   :  { %3325 = vmatpush.msrb.mxu0 %v3295_v52 }
0x1486   :  { %v3844_v42 = vpop.permute.xlu1 %3843  ;;  %v4022_v0 = vpop.eup %4021 }
0x1487   :  { %v3846_v5 = vunpack.i.h.bf16 %v3844_v42  ;;  %v3845_v38 = vunpack.i.l.bf16 %v3844_v42  ;;  %v3849_v33 = vpop.permute.xlu2 %3848  ;;  %v5343_v56 = vmul.f32 %v4022_v0, %v5310_v36 }
0x1488   :  { %v3851_v59 = vunpack.i.h.bf16 %v3849_v33  ;;  %v3850_v6 = vunpack.i.l.bf16 %v3849_v33 }
0x1489   :  { %2941 = vmatpush.msra.mxu1 %v3845_v38  ;;  %2967 = vmatpush.msra.mxu2 %v3846_v5 }
0x148a   :  { %3737 = vmatmul.msk.f32.vlgmr.msra.gmra.mxu1 %vm322_vm1, %v5336_v41  ;;  %3738 = vmatmul.msk.f32.vlgmr.msra.gmra.mxu2 %vm322_vm1, %v5334_v31 }
0x148b   :  { %3075 = vmatpush.msrb.mxu1 %v3850_v6  ;;  %3101 = vmatpush.msrb.mxu2 %v3851_v59 }
0x1490   :  { %v3180_v45 = vpop.xlane.xlu0 %3179 }
0x1491   :  { %4023 = vrcp.f32 %v3180_v45 }
0x1492   :  { %3743 = vmatmul.msk.f32.vlgmr.msrb.gmra.mxu1 %vm322_vm1, %v5343_v56 }
0x1497   :  { %v4024_v12 = vpop.eup %4023 }
0x1498   :  { %v5350_v27 = vmul.f32 %v4024_v12, %v5315_v51 }
0x14a6   :  { %v2809_v16 = vpop.f32.mrf.mxu1 }
0x14ac   :  { %v2835_v55 = vpop.f32.mrf.mxu2 }
0x14b1   :  { %v3183_v9 = vpop.xlane.xlu1 %3182 }
0x14c0   :  { %v3049_v29 = vpop.xlane.xlu2 %3048 }
0x14c1   :  { %4025 = vrcp.f32 %v3049_v29 }
0x14c2   :  { %4027 = vrcp.f32 %v3183_v9 }
0x14c7   :  { %v4026_v11 = vpop.eup %4025 }
0x14c8   :  { %v5347_v28 = vmul.f32 %v4026_v11, %v4016_v26  ;;  %v3854_v2 = vpop.permute.xlu2 %3853  ;;  %v4028_v36 = vpop.eup %4027  ;;  %v3876_v11 = vld [vmem:[#allocation17 + $0x1] ss:$0 sm:$0xff] }
0x14c9   :  { %v3856_v43 = vunpack.i.h.bf16 %v3854_v2  ;;  %v3855_v20 = vunpack.i.l.bf16 %v3854_v2  ;;  %v3187_v32 = vmul.f32 %v4028_v36, %v4014_v34 }
0x14ca   :  { %3744 = vmatmul.msk.f32.vlgmr.msrb.gmra.mxu2 %vm322_vm1, %v5347_v28 }
0x14cb   :  { %3209 = vmatpush.msra.mxu1 %v3855_v20  ;;  %3235 = vmatpush.msra.mxu2 %v3856_v43 }
0x14cc   :  { %3749 = vmatmul.msk.f32.vlgmr.msra.gmra.mxu1 %vm322_vm1, %v5350_v27 }
0x14d2   :  { %3750 = vmatmul.msk.f32.vlgmr.msra.gmra.mxu2 %vm322_vm1, %v3187_v32 }
0x1507   :  { %v2943_v25 = vpop.f32.mrf.mxu1 }
0x1508   :  { %3266 = vrot.lane.b32.xlu2 %v2943_v25, %s4420_s22 }
0x150d   :  { %v2969_v51 = vpop.f32.mrf.mxu2 }
0x150f   :  { %v3077_v30 = vpop.f32.mrf.mxu1 }
0x1510   :  { %3274 = vrot.lane.b32.xlu2 %v3077_v30, %s4422_s24 }
0x1518   :  { %3268 = vrot.lane.b32.xlu2 %v2969_v51, %s4420_s22 }
0x1549   :  { %v3211_v26 = vpop.f32.mrf.mxu1 }
0x154a   :  { %3282 = vrot.lane.b32.xlu0 %v3211_v26, %s4446_s23 }
0x154d   :  { %v3103_v39 = vpop.f32.mrf.mxu2 }
0x154e   :  { %3276 = vrot.lane.b32.xlu2 %v3103_v39, %s4422_s24 }
0x1555   :  { %v3237_v34 = vpop.f32.mrf.mxu2 }
0x1556   :  { %3284 = vrot.lane.b32.xlu1 %v3237_v34, %s4446_s23 }
0x1562   :  { %v3267_v53 = vpop.permute.xlu2 %3266 }
0x1563   :  { %v3288_v5 = vsel %vm322_vm1, %v2809_v16, %v3267_v53 }
0x156a   :  { %v3275_v42 = vpop.permute.xlu2 %3274 }
0x156b   :  { %v3290_v38 = vsel %vm874_vm2, %v3288_v5, %v3275_v42  ;;  %v3878_v5 = vld [vmem:[%s5576_s19 + $0x4] ss:$0 sm:$0xff] }
0x1572   :  { %v3269_v59 = vpop.permute.xlu2 %3268 }
0x1573   :  { %v3289_v45 = vsel %vm322_vm1, %v2835_v55, %v3269_v59 }
0x15a8   :  { %v3277_v0 = vpop.permute.xlu2 %3276 }
0x15a9   :  { %v3291_v29 = vsel %vm874_vm2, %v3289_v45, %v3277_v0 }
0x15bc   :  { %v3283_v33 = vpop.permute.xlu0 %3282 }
0x15bd   :  { %v3292_v6 = vsel %vm877_vm3, %v3290_v38, %v3283_v33 }
0x15be   :  { %3751 = vmatmul.msk.f32.vlgmr.msrb.gmra.mxu0 %vm289_vm0, %v3292_v6 }
0x15c8   :  { %v3285_v9 = vpop.permute.xlu1 %3284 }
0x15c9   :  { %v3293_v12 = vsel %vm877_vm3, %v3291_v29, %v3285_v9 }
0x15ca   :  { %3752 = vmatmul.msk.f32.gmra.mxu0 %vm289_vm0, %v3293_v12 }
0x163b   :  { %v3327_v2 = vpop.f32.mrf.mxu0 }
0x163c   :  { %v3328_v43 = vadd.f32 %v3876_v11, %v3327_v2 }
0x163e   :  { %v3333_v20 = vadd.f32 %v3328_v43, %v5230_v13 }
0x1640   :  { %v3339_v36 = vsel %vm289_vm0, %v3333_v20, 0.0 }
0x1641   :  { %3340 = vadd.xlane.f32.xlu0 %v3339_v36 }
0x1647   :  { %v3330_v16 = vpop.f32.mrf.mxu0 }
0x1648   :  { %v3331_v25 = vadd.f32 %v3876_v11, %v3330_v16 }
0x164a   :  { %v3334_v30 = vadd.f32 %v3331_v25, %v5234_v35 }
0x164c   :  { %v3342_v55 = vsel %vm289_vm0, %v3334_v30, 0.0 }
0x164d   :  { %3343 = vadd.xlane.f32.xlu2 %v3342_v55  ;;  %v3764_v55 = vld [vmem:[%s5573_s16 + $0x78] sm:$0xff] }
0x164e   :  { %3462 = vmatpush.msrb.mxu1 %v3764_v55 }
0x1665   :  { %2483 = vrot.lane.b32.xlu2 %v5149_v61, %s4420_s22 }
0x166d   :  { %1620 = vrot.lane.b32.xlu2 %v4950_v63, %s4420_s22 }
0x1675   :  { %2491 = vrot.lane.b32.xlu2 %v5158_v46, %s4422_s24 }
0x167d   :  { %2495 = vrot.lane.b32.xlu2 %v5166_v23, %s4446_s23 }
0x1685   :  { %3242 = vrot.lane.b32.xlu2 %v5334_v31, %s4420_s22 }
0x168d   :  { %3246 = vrot.lane.b32.xlu2 %v5343_v56, %s4422_s24 }
0x1695   :  { %3254 = vrot.lane.b32.xlu2 %v3187_v32, %s4446_s23 }
0x169d   :  { %854 = vrot.lane.b32.xlu2 %v4757_v50, %s4420_s22  ;;  %v3397_v50 = vld [vmem:[#allocation19 + $0x38] sm:$0xff] }
0x169e   :  { %3421 = vmatpush.msra.mxu3 %v3397_v50 }
0x16a5   :  { %856 = vrot.lane.b32.xlu2 %v4769_v60, %s4420_s22  ;;  %v3396_v60 = vld [vmem:[#allocation19 + $0x30] sm:$0xff] }
0x16a6   :  { %3422 = vmatpush.msra.mxu3 %v3396_v60 }
0x16b4   :  { %v3341_v63 = vpop.xlane.xlu0 %3340 }
0x16b5   :  { %v3345_v61 = vmul.f32 %v3341_v63, %v4811_v49  ;;  %v3763_v63 = vld [vmem:[%s5573_s16 + $0x70] sm:$0xff] }
0x16b6   :  { %3463 = vmatpush.msrb.mxu1 %v3763_v63 }
0x16b7   :  { %v3347_v46 = vsub.f32 %v3333_v20, %v3345_v61 }
0x16b9   :  { %v3349_v13 = vmul.f32 %v3347_v46, %v3347_v46 }
0x16bb   :  { %v3351_v23 = vsel %vm289_vm0, %v3349_v13, 0.0 }
0x16bc   :  { %3352 = vadd.xlane.f32.xlu1 %v3351_v23 }
0x16c0   :  { %v3344_v35 = vpop.xlane.xlu2 %3343 }
0x16c1   :  { %v3346_v31 = vmul.f32 %v3344_v35, %v4811_v49 }
0x16c3   :  { %v3348_v56 = vsub.f32 %v3334_v30, %v3346_v31 }
0x16c5   :  { %v3350_v51 = vmul.f32 %v3348_v56, %v3348_v56 }
0x16c7   :  { %v3354_v32 = vsel %vm289_vm0, %v3350_v51, 0.0 }
0x16c8   :  { %3355 = vadd.xlane.f32.xlu0 %v3354_v32 }
0x16d5   :  { %1618 = vrot.lane.b32.xlu1 %v4946_v58, %s4420_s22  ;;  %v3395_v58 = vld [vmem:[#allocation19 + $0x28] sm:$0xff] }
0x16d6   :  { %3423 = vmatpush.msra.mxu3 %v3395_v58 }
0x16dc   :  { %2485 = vrot.lane.b32.xlu0 %v5151_v62, %s4420_s22 }
0x16dd   :  { %1626 = vrot.lane.b32.xlu1 %v4958_v14, %s4422_s24 }
0x16e4   :  { %2489 = vrot.lane.b32.xlu0 %v5162_v40, %s4422_s24  ;;  %v2484_v40 = vpop.permute.xlu2 %2483 }
0x16e5   :  { %3240 = vrot.lane.b32.xlu1 %v5336_v41, %s4420_s22  ;;  %v2501_v20 = vsel %vm322_vm1, %v5141_v10, %v2484_v40  ;;  %v3762_v10 = vld [vmem:[%s5573_s16 + $0x68] sm:$0xff] }
0x16e6   :  { %3464 = vmatpush.msrb.mxu1 %v3762_v10 }
0x16ec   :  { %1624 = vrot.lane.b32.xlu0 %v4954_v3, %s4422_s24  ;;  %v3394_v3 = vld [vmem:[#allocation19 + $0x20] sm:$0xff]  ;;  %v5420_v8 = vpop.permute.xlu2 %1620 }
0x16ed   :  { %1632 = vrot.lane.b32.xlu1 %v4966_v19, %s4446_s23  ;;  %3424 = vmatpush.msra.mxu3 %v3394_v3  ;;  %v3760_v3 = vld [vmem:[%s5573_s16 + $0x58] sm:$0xff] }
0x16f4   :  { %2497 = vrot.lane.b32.xlu0 %v5170_v22, %s4446_s23  ;;  %v5429_v45 = vpop.permute.xlu2 %2491 }
0x16f5   :  { %3252 = vrot.lane.b32.xlu1 %v5350_v27, %s4446_s23 }
0x16fc   :  { %1630 = vrot.lane.b32.xlu0 %v4960_v15, %s4446_s23  ;;  %v2496_v25 = vpop.permute.xlu2 %2495 }
0x1704   :  { %3248 = vrot.lane.b32.xlu0 %v5347_v28, %s4422_s24  ;;  %v3243_v23 = vpop.permute.xlu2 %3242 }
0x1705   :  { %v3259_v51 = vsel %vm322_vm1, %v5323_v18, %v3243_v23  ;;  %v3758_v18 = vld [vmem:[%s5573_s16 + $0x48] sm:$0xff] }
0x170c   :  { %v5451_v31 = vpop.permute.xlu2 %3246 }
0x1714   :  { %v3255_v50 = vpop.permute.xlu2 %3254 }
0x172f   :  { %v3353_v14 = vpop.xlane.xlu1 %3352 }
0x1730   :  { %v3357_v19 = vmul.f32 %v3353_v14, %v4811_v49  ;;  %v3759_v14 = vld [vmem:[%s5573_s16 + $0x50] sm:$0xff] }
0x1732   :  { %v3359_v62 = vadd.f32 1e-06, %v3357_v19  ;;  %v3757_v19 = vld [vmem:[%s5573_s16 + $0x40] sm:$0xff] }
0x1734   :  { %4029 = vrsqrt.f32 %v3359_v62  ;;  %vm3367_vm8 = vweird.f32 %v3359_v62 }
0x173a   :  { %v4030_v22 = vpop.eup %4029 }
0x173b   :  { %v3362_v41 = vmul.f32 %v4030_v22, %v3359_v62  ;;  %v3356_v15 = vpop.xlane.xlu0 %3355  ;;  %vm3368_vm7 = vweird.f32 %v4030_v22  ;;  %v3879_v62 = vld [vmem:[#allocation20 + $0x1] ss:$0 sm:$0xff] }
0x173c   :  { %v3358_v27 = vmul.f32 %v3356_v15, %v4811_v49  ;;  %vm3369_vm9 = vmor %vm3367_vm8, %vm3368_vm7 }
0x173d   :  { %v3363_v28 = vmul.f32 %v4030_v22, %v3362_v41 }
0x173e   :  { %v3360_v26 = vadd.f32 1e-06, %v3358_v27 }
0x173f   :  { %v3364_v39 = vmul.f32 0.5, %v3363_v28 }
0x1740   :  { %4031 = vrsqrt.f32 %v3360_v26  ;;  %vm3377_vm11 = vweird.f32 %v3360_v26 }
0x1741   :  { %v3365_v34 = vsub.f32 1.5, %v3364_v39 }
0x1743   :  { %v3366_v47 = vmul.f32 %v4030_v22, %v3365_v34 }
0x1745   :  { %v3370_v52 = vsel %vm3369_vm9, %v4030_v22, %v3366_v47 }
0x1746   :  { %v4032_v53 = vpop.eup %4031  ;;  %v3381_v42 = vmul.f32 %v3370_v52, %v3347_v46  ;;  %v3761_v46 = vld [vmem:[%s5573_s16 + $0x60] sm:$0xff] }
0x1747   :  { %v3372_v38 = vmul.f32 %v4032_v53, %v3360_v26  ;;  %vm3378_vm10 = vweird.f32 %v4032_v53  ;;  %3465 = vmatpush.msrb.mxu1 %v3761_v46  ;;  %v3880_v26 = vld [vmem:[#allocation22 + $0x1] ss:$0 sm:$0xff] }
0x1748   :  { %v3386_v33 = vmul.f32 %v3877_v21, %v3381_v42  ;;  %vm3379_vm12 = vmor %vm3377_vm11, %vm3378_vm10 }
0x1749   :  { %v3373_v59 = vmul.f32 %v4032_v53, %v3372_v38  ;;  %3466 = vmatpush.msrb.mxu1 %v3760_v3  ;;  %v1619_v38 = vpop.permute.xlu1 %1618 }
0x174a   :  { %v3391_v6 = vadd.f32 %v3878_v5, %v3386_v33 }
0x174b   :  { %v3374_v0 = vmul.f32 0.5, %v3373_v59  ;;  %3467 = vmatpush.msrb.mxu1 %v3759_v14 }
0x174c   :  { %3755 = vmatmul.msk.f32.vlgmr.msra.gmra.mxu3 %vm289_vm0, %v3391_v6 }
0x174d   :  { %v3375_v29 = vsub.f32 1.5, %v3374_v0  ;;  %3468 = vmatpush.msrb.mxu1 %v3758_v18 }
0x174e   :  { %v5431_v9 = vpop.permute.xlu0 %2485 }
0x174f   :  { %v3376_v12 = vmul.f32 %v4032_v53, %v3375_v29  ;;  %3469 = vmatpush.msrb.mxu1 %v3757_v19  ;;  %v2502_v59 = vsel %vm322_vm1, %v5145_v4, %v5431_v9  ;;  %v1637_v4 = vsel %vm322_vm1, %v4937_v37, %v5420_v8 }
0x1751   :  { %v3380_v11 = vsel %vm3379_vm12, %v4032_v53, %v3376_v12  ;;  %v1627_v33 = vpop.permute.xlu1 %1626  ;;  %v855_v12 = vpop.permute.xlu2 %854 }
0x1752   :  { %v3382_v2 = vmul.f32 %v3380_v11, %v3348_v56  ;;  %v872_v14 = vsel %vm322_vm1, %v4748_v44, %v855_v12 }
0x1754   :  { %v3387_v43 = vmul.f32 %v3877_v21, %v3382_v2 }
0x1756   :  { %v2490_v36 = vpop.permute.xlu0 %2489  ;;  %v3392_v16 = vadd.f32 %v3878_v5, %v3387_v43 }
0x1757   :  { %v2503_v30 = vsel %vm874_vm2, %v2501_v20, %v2490_v36 }
0x1758   :  { %3756 = vmatmul.msk.f32.gmra.mxu3 %vm289_vm0, %v3392_v16  ;;  %v2505_v61 = vsel %vm877_vm3, %v2503_v30, %v2496_v25 }
0x1759   :  { %3541 = vrot.lane.b32.xlu1 %v2505_v61, %s4448_s6  ;;  %v3241_v0 = vpop.permute.xlu1 %3240  ;;  %v5501_v11 = vpop.permute.xlu2 %856 }
0x175a   :  { %v3258_v55 = vsel %vm322_vm1, %v5321_v24, %v3241_v0 }
0x175b   :  { %v3260_v61 = vsel %vm874_vm2, %v3258_v55, %v5451_v31 }
0x175e   :  { %v1625_v13 = vpop.permute.xlu0 %1624 }
0x1766   :  { %v2498_v35 = vpop.permute.xlu0 %2497 }
0x176e   :  { %v1631_v56 = vpop.permute.xlu0 %1630 }
0x1776   :  { %v3249_v32 = vpop.permute.xlu0 %3248 }
0x1777   :  { %v3261_v60 = vsel %vm874_vm2, %v3259_v51, %v3249_v32 }
0x1778   :  { %v5457_v58 = vsel %vm877_vm3, %v3261_v60, %v3255_v50 }
0x17cf   :  { %v3426_v40 = vpop.f32.mrf.mxu3 }
0x17d0   :  { %v3427_v22 = vadd.f32 %v3879_v62, %v3426_v40 }
0x17d2   :  { %v3432_v41 = vmax.f32 %v3427_v22, 0.0 }
0x17d4   :  { %3765 = vmatmul.msk.f32.vlgmr.msrb.gmra.mxu1 %vm1820_vm5, %v3432_v41 }
0x17db   :  { %v3429_v15 = vpop.f32.mrf.mxu3 }
0x17dc   :  { %v3430_v27 = vadd.f32 %v3879_v62, %v3429_v15 }
0x17de   :  { %v3433_v28 = vmax.f32 %v3430_v27, 0.0 }
0x17e0   :  { %3766 = vmatmul.msk.f32.gmra.mxu1 %vm1820_vm5, %v3433_v28 }
0x1851   :  { %v3471_v39 = vpop.f32.mrf.mxu1 }
0x1852   :  { %v3472_v34 = vadd.f32 %v3880_v26, %v3471_v39  ;;  %v3881_v39 = vld [vmem:[%s5575_s18 + $0x5] ss:$0 sm:$0xff]  ;;  %s4449_s18 = smov [#allocation24]  }
0x1854   :  { %v3477_v47 = vadd.f32 %v3472_v34, %v3391_v6  ;;  %v2504_v6 = vsel %vm874_vm2, %v2502_v59, %v5429_v45  ;;  %v1639_v45 = vsel %vm874_vm2, %v1637_v4, %v1627_v33  ;;  %v873_v59 = vsel %vm322_vm1, %v4752_v48, %v5501_v11 }
0x1856   :  { %v3483_v21 = vsel %vm289_vm0, %v3477_v47, 0.0 }
0x1857   :  { %3484 = vadd.xlane.f32.xlu2 %v3483_v21 }
0x185d   :  { %v3474_v52 = vpop.f32.mrf.mxu1 }
0x185e   :  { %v3475_v53 = vadd.f32 %v3880_v26, %v3474_v52  ;;  %v3882_v52 = vld [vmem:[%s5576_s19 + $0x5] ss:$0 sm:$0xff]  ;;  %s3589_s19 = sshll.u32 %s4449_s18, 4  ;;  %s3590_s19 = int_to_ptr.vmem [resolvable:$true] %s3589_s19 }
0x1860   :  { %v3478_v42 = vadd.f32 %v3475_v53, %v3392_v16 }
0x1862   :  { %v3486_v5 = vsel %vm289_vm0, %v3478_v42, 0.0 }
0x1863   :  { %3487 = vadd.xlane.f32.xlu0 %v3486_v5 }
0x186f   :  { %860 = vrot.lane.b32.xlu2 %v4761_v54, %s4422_s24  ;;  %v2506_v54 = vsel %vm877_vm3, %v2504_v6, %v2498_v35 }
0x1877   :  { %862 = vrot.lane.b32.xlu2 %v4773_v1, %s4422_s24  ;;  %868 = vrot.lane.b32.xlu0 %v4777_v7, %s4446_s23  ;;  %v1636_v1 = vsel %vm322_vm1, %v4930_v17, %v1619_v38 }
0x1878   :  { %v1638_v7 = vsel %vm874_vm2, %v1636_v1, %v1625_v13 }
0x1879   :  { %v1640_v29 = vsel %vm877_vm3, %v1638_v7, %v1631_v56 }
0x187f   :  { %866 = vrot.lane.b32.xlu2 %v4765_v57, %s4446_s23  ;;  %v1633_v57 = vpop.permute.xlu1 %1632 }
0x1880   :  { %v1641_v9 = vsel %vm877_vm3, %v1639_v45, %v1633_v57 }
0x1887   :  { %3543 = vrot.lane.b32.xlu2 %v2506_v54, %s4448_s6  ;;  %v3253_v63 = vpop.permute.xlu1 %3252 }
0x1888   :  { %v3262_v10 = vsel %vm877_vm3, %v3260_v61, %v3253_v63 }
0x188f   :  { %3549 = vrot.lane.b32.xlu2 %v1640_v29, %s4442_s27  ;;  %v3542_v24 = vpop.permute.xlu1 %3541 }
0x1897   :  { %3551 = vrot.lane.b32.xlu2 %v1641_v9, %s4442_s27 }
0x18ca   :  { %v3485_v17 = vpop.xlane.xlu2 %3484 }
0x18cb   :  { %v3489_v2 = vmul.f32 %v3485_v17, %v4811_v49 }
0x18cd   :  { %v3491_v43 = vsub.f32 %v3477_v47, %v3489_v2 }
0x18cf   :  { %v3493_v20 = vmul.f32 %v3491_v43, %v3491_v43 }
0x18d1   :  { %v3495_v36 = vsel %vm289_vm0, %v3493_v20, 0.0 }
0x18d2   :  { %3496 = vadd.xlane.f32.xlu0 %v3495_v36  ;;  %v861_v46 = vpop.permute.xlu2 %860 }
0x18d6   :  { %v3488_v16 = vpop.xlane.xlu0 %3487 }
0x18d7   :  { %v3490_v37 = vmul.f32 %v3488_v16, %v4811_v49 }
0x18d9   :  { %v5506_v8 = vsub.f32 %v3478_v42, %v3490_v37 }
0x18da   :  { %v863_v13 = vpop.permute.xlu2 %862 }
0x18db   :  { %v3494_v25 = vmul.f32 %v5506_v8, %v5506_v8  ;;  %v876_v54 = vsel %vm874_vm2, %v873_v59, %v863_v13 }
0x18dd   :  { %v3498_v30 = vsel %vm289_vm0, %v3494_v25, 0.0 }
0x18de   :  { %3499 = vadd.xlane.f32.xlu1 %v3498_v30 }
0x18e2   :  { %v867_v35 = vpop.permute.xlu2 %866 }
0x18e6   :  { %3557 = vrot.lane.b32.xlu0 %v3262_v10, %s4436_s1 }
0x18e9   :  { %v869_v23 = vpop.permute.xlu0 %868 }
0x18ea   :  { %v3544_v50 = vpop.permute.xlu2 %3543  ;;  %v879_v0 = vsel %vm877_vm3, %v876_v54, %v869_v23 }
0x18eb   :  { %v3564_v57 = vsel %vm289_vm0, %v879_v0, %v3544_v50 }
0x18f2   :  { %v3550_v22 = vpop.permute.xlu2 %3549 }
0x18f7   :  { %3559 = vrot.lane.b32.xlu1 %v5457_v58, %s4436_s1  ;;  %v875_v58 = vsel %vm874_vm2, %v872_v14, %v861_v46 }
0x18f8   :  { %v878_v62 = vsel %vm877_vm3, %v875_v58, %v867_v35 }
0x18f9   :  { %v3563_v15 = vsel %vm289_vm0, %v878_v62, %v3542_v24 }
0x18fa   :  { %v3565_v28 = vsel %vm1820_vm5, %v3563_v15, %v3550_v22  ;;  %v3552_v7 = vpop.permute.xlu2 %3551 }
0x18fb   :  { %v3566_v4 = vsel %vm1820_vm5, %v3564_v57, %v3552_v7 }
0x1945   :  { %v3497_v56 = vpop.xlane.xlu0 %3496 }
0x1946   :  { %v3501_v51 = vmul.f32 %v3497_v56, %v4811_v49 }
0x1948   :  { %v3503_v32 = vadd.f32 1e-06, %v3501_v51 }
0x194a   :  { %4033 = vrsqrt.f32 %v3503_v32  ;;  %vm3511_vm15 = vweird.f32 %v3503_v32 }
0x1950   :  { %v4034_v60 = vpop.eup %4033 }
0x1951   :  { %v3506_v31 = vmul.f32 %v4034_v60, %v3503_v32  ;;  %v3500_v3 = vpop.xlane.xlu1 %3499  ;;  %vm3512_vm14 = vweird.f32 %v4034_v60 }
0x1952   :  { %v3502_v18 = vmul.f32 %v3500_v3, %v4811_v49  ;;  %vm3513_vm4 = vmor %vm3511_vm15, %vm3512_vm14 }
0x1953   :  { %v3507_v19 = vmul.f32 %v4034_v60, %v3506_v31 }
0x1954   :  { %v3504_v40 = vadd.f32 1e-06, %v3502_v18 }
0x1955   :  { %v3508_v41 = vmul.f32 0.5, %v3507_v19 }
0x1956   :  { %4035 = vrsqrt.f32 %v3504_v40  ;;  %vm3521_vm7 = vweird.f32 %v3504_v40 }
0x1957   :  { %v3509_v27 = vsub.f32 1.5, %v3508_v41 }
0x1958   :  { %v3558_v26 = vpop.permute.xlu0 %3557 }
0x1959   :  { %v3510_v44 = vmul.f32 %v4034_v60, %v3509_v27  ;;  %v3568_v49 = vsel %vm3567_vm13, %v3565_v28, %v3558_v26 }
0x195a   :  { %3570 = vst [vmem:[#allocation24] sm:$0xff] %v3568_v49 }
0x195b   :  { %v3514_v34 = vsel %vm3513_vm4, %v4034_v60, %v3510_v44 }
0x195c   :  { %v4036_v47 = vpop.eup %4035  ;;  %v3525_v21 = vmul.f32 %v3514_v34, %v3491_v43 }
0x195d   :  { %v3516_v53 = vmul.f32 %v4036_v47, %v3504_v40  ;;  %vm3522_vm6 = vweird.f32 %v4036_v47 }
0x195e   :  { %v3530_v42 = vmul.f32 %v3881_v39, %v3525_v21  ;;  %vm3523_vm8 = vmor %vm3521_vm7, %vm3522_vm6 }
0x195f   :  { %v3517_v5 = vmul.f32 %v4036_v47, %v3516_v53 }
0x1960   :  { %v3535_v38 = vadd.f32 %v3882_v52, %v3530_v42 }
0x1961   :  { %v3518_v33 = vmul.f32 0.5, %v3517_v5 }
0x1962   :  { %3537 = vst.msk [vmem:[#allocation23] sm:$0xff] %vm289_vm0, %v3535_v38 }
0x1963   :  { %v3519_v6 = vsub.f32 1.5, %v3518_v33 }
0x1965   :  { %v3520_v1 = vmul.f32 %v4036_v47, %v3519_v6 }
0x1967   :  { %v3524_v29 = vsel %vm3523_vm8, %v4036_v47, %v3520_v1 }
0x1968   :  { %v3526_v48 = vmul.f32 %v3524_v29, %v5506_v8 }
0x1969   :  { %v3560_v45 = vpop.permute.xlu1 %3559 }
0x196a   :  { %v3531_v9 = vmul.f32 %v3881_v39, %v3526_v48  ;;  %v3569_v12 = vsel %vm3567_vm13, %v3566_v4, %v3560_v45 }
0x196b   :  { %3571 = vst [vmem:[#allocation24 + $0x8] sm:$0xff] %v3569_v12 }
0x196c   :  { %v3536_v11 = vadd.f32 %v3882_v52, %v3531_v9  ;;  %3597 = dma.vmem_to_hbm [thread:$0]  %s3590_s19, 256, %s3592_s4, [#allocation25], %s5592_s25, %s5592_s25, %s4420_s22  }
0x196e   :  { %3538 = vst.msk [vmem:[#allocation23 + $0x8] sm:$0xff] %vm289_vm0, %v3536_v11 }
0x196f   :  { %3584 = dma.vmem_to_hbm [thread:$0]  %s3577_s0, 256, %s3579_s30, [#allocation4], %s5592_s25, %s5592_s25, %s4420_s22  }
0x1970   :  { %4414 = dma.done.wait [#allocation4], 256  }
0x1971   :  { %4415 = vsyncadd [#allocation4], 4294967040 }
0x1972   :  { %4416 = dma.done.wait [#allocation25], 256  }
0x1973   :  { %4417 = vsyncadd [#allocation25], 4294967040 }
0x1974   :  { %3606 = vsyncpa [#allocation3], 1 }
0x1975   :  { %3607 = vsyncpa [#allocation6], 1 }
0x1976   :  { %3608 = vsyncpa [#allocation9], 1 }
0x1977   :  { %3609 = vsyncpa [#allocation12], 1 }
0x1978   :  { %3610 = vsyncpa [#allocation15], 1 }
0x1979   :  { %3611 = vsyncpa [#allocation18], 1 }
0x197a   :  { %3612 = vsyncpa [#allocation21], 1 }
0x197b   :  { %3613 = vsyncpa [#allocation4], 1 }
0x197c   :  { %3614 = vsyncpa [#allocation25], 1 }

</bundles_post_ra>
